<compile_context>
chip_gen: v6e
topology: v6e:2x2x1
jax: 0.10.0
libtpu: 0.0.40
codegen_flags: <defaults>
</compile_context>

<pallas_src>
from functools import partial

import numpy as np

import jax
import jax.numpy as jnp
from jax.experimental import pallas as pl
from jax.experimental.pallas import tpu as pltpu

INPUT_DIM = 256   # hardcoded in CorrelationAttentivePooling.__init__
NHEADS = 4        # hardcoded in CorrelationAttentivePooling.__init__

_MIB = 1024 * 1024


def _corr_attn_pool_kernel(lens_ref, feat_ref, wa_ref, ba_ref, w_ref, bw_ref,
                           corr_ref, *, bb, Tp, T):
    """One grid step = `bb` utterances, fully batched (no per-sample unroll).

    lens_ref : (Bp,) int32 in SMEM (scalar prefetch)
    feat_ref : (bb, Tp, H) f32
    wa_ref   : (H, H)  bf16,  ba_ref: (1, H) f32
    w_ref    : (H, 4)  bf16,  bw_ref: (1, 4) f32
    corr_ref : (bb, H, H) bf16/f32
    """
    H = feat_ref.shape[-1]
    b0 = pl.program_id(0) * bb

    # ---- projections: ONE (bb*Tp, H) matmul each (bf16 operands, f32 accum) ----
    x3 = feat_ref[...]                                      # (bb, Tp, H) f32
    x2 = x3.reshape(bb * Tp, H)                             # pure view (Tp % 8 == 0)
    h = jnp.dot(x2.astype(jnp.bfloat16), wa_ref[...],
                preferred_element_type=jnp.float32) + ba_ref[...]
    h = jnp.maximum(h, 0.0)                                 # ReLU
    logits = jnp.dot(h.astype(jnp.bfloat16), w_ref[...],
                     preferred_element_type=jnp.float32) + bw_ref[...]    # (bb*Tp, 4)

    # logsumexp over the 4 heads
    m = jnp.max(logits, axis=-1, keepdims=True)
    lse = m + jnp.log(jnp.sum(jnp.exp(logits - m), axis=-1, keepdims=True))
    lse = lse.reshape(bb, Tp, 1)

    # ---- batched length mask + softmax over time ----
    t_iota = jax.lax.broadcasted_iota(jnp.int32, (bb, Tp, 1), 1)
    b_iota = jax.lax.broadcasted_iota(jnp.int32, (bb, Tp, 1), 0)
    lens_b = jnp.zeros((bb, Tp, 1), jnp.int32)
    for i in range(bb):                                     # bb cheap SMEM scalar reads
        lens_b = jnp.where(b_iota == i, lens_ref[b0 + i], lens_b)

    # The reference ADDS the boolean mask: +1.0 on valid frames, +0.0 on padding
    # inside the original T frames (those frames still take part in the softmax).
    att_logits = lse + (t_iota < lens_b).astype(jnp.float32)
    if Tp > T:
        # frames created by padding T up to a multiple of 8 do not exist in the
        # reference: push them out of the softmax entirely.
        att_logits = jnp.where(t_iota < T, att_logits, -1e30)

    mmax = jnp.max(att_logits, axis=1, keepdims=True)       # (bb, 1, 1)
    e = jnp.exp(att_logits - mmax)
    att_w = e / jnp.sum(e, axis=1, keepdims=True)           # exact normalization

    # ---- pooled vector, centering, weighted correlation ----
    sap = jnp.sum(att_w * x3, axis=1, keepdims=True)        # (bb, 1, H)
    xc = x3 - sap                                           # (bb, Tp, H)
    wxc = att_w * xc                                        # (bb, Tp, H)

    # Diagonal normalization folded into the matmul operands:
    #   corr / outer(s, s) == (wxc*s_inv)^T @ (xc*s_inv),  s_inv = rsqrt(diag + eps)
    diag = jnp.sum(wxc * xc, axis=1, keepdims=True)         # (bb, 1, H)
    s_inv = jax.lax.rsqrt(diag + 1e-9)
    corr = jnp.einsum('btk,btl->bkl', wxc * s_inv, xc * s_inv,
                      preferred_element_type=jnp.float32)   # (bb, H, H) f32
    corr_ref[...] = corr.astype(corr_ref.dtype)


def _num_tensorcores():
    """Best-effort TensorCores per device (v5e/v6e: 1; v7x/v5p/v4: 2)."""
    try:
        info = pltpu.get_tpu_info()
        for attr in ("num_tensorcores", "tensorcore_count", "num_cores", "core_count"):
            v = getattr(info, attr, None)
            if isinstance(v, int) and 0 < v <= 8:
                return v
    except Exception:
        pass
    try:
        kind = jax.devices()[0].device_kind.lower()
        if any(t in kind for t in ("v7", "v5p", "v4", "v3")):
            return 2
    except Exception:
        pass
    return 1


def _step_vmem_bytes(bb, Tp, H, out_bytes):
    """Rough per-grid-step VMEM footprint (double-buffered blocks + intermediates)."""
    feat_in = 2 * bb * Tp * H * 4               # (bb, Tp, H) f32 input, double-buffered
    corr_out = 2 * bb * H * H * out_bytes       # (bb, H, H) output, double-buffered
    corr_tmp = bb * H * H * 4                   # f32 einsum result before cast/store
    acts = 8 * bb * Tp * H * 4                  # h / xc / wxc / scaled operands + slack
    weights = 2 * (H * H * 2 + H * NHEADS * 2 + (H + NHEADS) * 4)
    return feat_in + corr_out + corr_tmp + acts + weights


def _pick_batch_block(B, Tp, H, out_bytes, n_cores, target_rows=512,
                      vmem_budget=30 * _MIB):
    """Samples per grid step.

    Targets ~target_rows rows (bb*Tp) per MXU matmul, shrinks bb until the
    per-step VMEM estimate fits the budget, and only splits the grid on
    multi-TensorCore chips (single-TC chips get the fewest possible steps).
    """
    bb = max(1, min(B, max(1, target_rows // Tp), 32))
    while bb > 1 and _step_vmem_bytes(bb, Tp, H, out_bytes) > vmem_budget:
        bb -= 1
    if n_cores > 1:
        bb = min(bb, max(1, -(-B // n_cores)))       # at least one block per core
    n_blocks = -(-B // bb)
    if n_cores > 1 and n_blocks % n_cores:
        n_blocks += n_cores - (n_blocks % n_cores)   # balanced across cores
    return bb, n_blocks


def correlation_attentive_pooling(feature_BxTxH, features_len, params,
                                  *, corr_dtype=jnp.bfloat16):
    """Returns (agg_vecs (B, H*(H-1)/2) f32, ones (B,)) — same as the PyTorch forward.

    corr_dtype: dtype of the (B, H, H) correlation tensor written by the kernel.
      bf16 (default) halves the dominant HBM write; pass jnp.float32 for a
      reference-precision correlation output.
    """
    # TODO(synk): Dropout2d(p=0.25) is train-time stochastic channel dropout;
    #             implemented here as eval-mode identity.
    # TODO(synk): for very long T (several thousand frames) add a T-tiled
    #             online-softmax path; this version keeps one (bb, Tp, H) block
    #             resident per grid step.
    B, T, H = feature_BxTxH.shape
    assert H == INPUT_DIM

    Tp = -(-T // 8) * 8                          # sublane-align the time axis
    out_bytes = jnp.dtype(corr_dtype).itemsize
    n_cores = _num_tensorcores()
    bb, n_blocks = _pick_batch_block(B, Tp, H, out_bytes, n_cores)
    Bp = n_blocks * bb

    feat = feature_BxTxH.astype(jnp.float32)
    lens = features_len.astype(jnp.int32)
    if Tp != T:
        feat = jnp.pad(feat, ((0, 0), (0, Tp - T), (0, 0)))
    if Bp != B:
        # padded samples: zero features, len=T -> finite, all-zero corr, sliced away
        feat = jnp.pad(feat, ((0, Bp - B), (0, 0), (0, 0)))
        lens = jnp.pad(lens, (0, Bp - B), constant_values=T)

    # weights stored (in, out); bf16 MXU operands, f32 biases / accumulation
    wa = params["wa"].astype(jnp.bfloat16)
    w = params["w"].astype(jnp.bfloat16)
    ba = params["ba"].astype(jnp.float32).reshape(1, H)
    bw = params["bw"].astype(jnp.float32).reshape(1, NHEADS)

    vmem_limit = int(min(48 * _MIB,
                         max(32 * _MIB, 2 * _step_vmem_bytes(bb, Tp, H, out_bytes))))

    kernel = partial(_corr_attn_pool_kernel, bb=bb, Tp=Tp, T=T)

    corr = pl.pallas_call(
        kernel,
        out_shape=jax.ShapeDtypeStruct((Bp, H, H), corr_dtype),
        grid_spec=pltpu.PrefetchScalarGridSpec(
            num_scalar_prefetch=1,                     # features_len -> SMEM
            grid=(n_blocks,),
            in_specs=[
                pl.BlockSpec((bb, Tp, H), lambda b, lens_ref: (b, 0, 0)),   # features
                pl.BlockSpec((H, H), lambda b, lens_ref: (0, 0)),           # W_a weight
                pl.BlockSpec((1, H), lambda b, lens_ref: (0, 0)),           # W_a bias
                pl.BlockSpec((H, NHEADS), lambda b, lens_ref: (0, 0)),      # W weight
                pl.BlockSpec((1, NHEADS), lambda b, lens_ref: (0, 0)),      # W bias
            ],
            out_specs=pl.BlockSpec((bb, H, H), lambda b, lens_ref: (b, 0, 0)),
        ),
        compiler_params=pltpu.CompilerParams(
            dimension_semantics=("parallel",),
            vmem_limit_bytes=vmem_limit),
    )(lens, feat, wa, ba, w, bw)

    # strict upper triangle (offset=1), row-major — matches torch.triu_indices;
    # single constant-index gather on the flattened minor dim (fast XLA lowering).
    iu_r, iu_c = np.triu_indices(H, k=1)
    flat_idx = jnp.asarray(iu_r * H + iu_c, dtype=jnp.int32)
    agg_vecs = corr[:B].reshape(B, H * H)[:, flat_idx].astype(jnp.float32)
    return agg_vecs, jnp.ones((B,), dtype=jnp.int32)


def _reference(feature_BxTxH, features_len, params):
    """Pure-JAX f32 reference mirroring the PyTorch forward (eval mode)."""
    B, T, H = feature_BxTxH.shape
    x = feature_BxTxH.astype(jnp.float32)
    h = jnp.maximum(x @ params["wa"] + params["ba"].reshape(1, 1, H), 0.0)
    logits = h @ params["w"] + params["bw"].reshape(1, 1, NHEADS)
    lse = jax.scipy.special.logsumexp(logits, axis=-1)                      # (B, T)
    mask = (jnp.arange(T)[None, :] < features_len[:, None]).astype(jnp.float32)
    att_w = jax.nn.softmax(mask + lse, axis=-1)[..., None]                  # (B, T, 1)
    sap = jnp.sum(att_w * x, axis=1, keepdims=True)
    xc = x - sap
    corr = jnp.einsum('btk,btl->bkl', att_w * xc, xc)
    s = jnp.sqrt(jnp.diagonal(corr, axis1=1, axis2=2) + 1e-9)               # (B, H)
    corr = corr / (s[:, :, None] * s[:, None, :])
    iu_r, iu_c = np.triu_indices(H, k=1)
    return corr[:, iu_r, iu_c]


def _init_params(key, input_dim=INPUT_DIM, nheads=NHEADS):
    """Deterministic init mimicking nn.Linear default (uniform ±1/sqrt(fan_in))."""
    k1, k2, k3, k4 = jax.random.split(key, 4)
    bound = 1.0 / jnp.sqrt(jnp.float32(input_dim))
    wa = jax.random.uniform(k1, (input_dim, input_dim), jnp.float32, -bound, bound)
    ba = jax.random.uniform(k2, (1, input_dim), jnp.float32, -bound, bound)
    w = jax.random.uniform(k3, (input_dim, nheads), jnp.float32, -bound, bound)
    bw = jax.random.uniform(k4, (1, nheads), jnp.float32, -bound, bound)
    return {"wa": wa, "ba": ba, "w": w, "bw": bw}


if __name__ == "__main__":
    key = jax.random.PRNGKey(0)
    kf, kp = jax.random.split(key)

    B, T, H = 8, 16, INPUT_DIM
    feature = jax.random.normal(kf, (B, T, H), dtype=jnp.float32)
    # the reference builds its mask with arange(features_len.max()) -> max == T
    features_len = jnp.array([16, 11, 16, 8, 13, 16, 5, 9], dtype=jnp.int32)
    params = _init_params(kp)

    agg_vecs, lens_out = correlation_attentive_pooling(feature, features_len, params)
    agg_vecs = jax.block_until_ready(agg_vecs)
    lens_out = jax.block_until_ready(lens_out)

    assert agg_vecs.shape == (B, H * (H - 1) // 2)
    assert lens_out.shape == (B,)
    assert bool(jnp.all(jnp.isfinite(agg_vecs)))

    # loose tolerance: bf16 MXU operands for the projections + bf16 corr output
    # (values are normalized correlations in [-1, 1])
    ref = _reference(feature, features_len, params)
    max_err = float(jnp.max(jnp.abs(agg_vecs - ref)))
    assert max_err < 0.1, f"max abs err vs f32 reference: {max_err}"
    print("KERNEL_OK")
</pallas_src>

<mosaic_0001>
module attributes {stable_mosaic.version = 11 : i64} {
  func.func @_corr_attn_pool_kernel(%arg0: i32, %arg1: memref<8xi32, #tpu.memory_space<smem>>, %arg2: memref<8x16x256xf32, #tpu.memory_space<vmem>>, %arg3: memref<256x256xbf16, #tpu.memory_space<vmem>>, %arg4: memref<1x256xf32, #tpu.memory_space<vmem>>, %arg5: memref<256x4xbf16, #tpu.memory_space<vmem>>, %arg6: memref<1x4xf32, #tpu.memory_space<vmem>>, %arg7: memref<8x256x256xbf16, #tpu.memory_space<vmem>>) attributes {dimension_semantics = [#tpu.dimension_semantics<parallel>], iteration_bounds = array<i64: 1>, scalar_prefetch = 1 : i64, scratch_operands = 0 : i64, tpu.core_type = #tpu.core_type<tc>, window_params = [{transform_indices = @transform_0, window_bounds = array<i64: 8, 16, 256>}, {pipeline_mode = #tpu.pipeline_mode<synchronous>, transform_indices = @transform_1, window_bounds = array<i64: 256, 256>}, {pipeline_mode = #tpu.pipeline_mode<synchronous>, transform_indices = @transform_2, window_bounds = array<i64: 1, 256>}, {pipeline_mode = #tpu.pipeline_mode<synchronous>, transform_indices = @transform_3, window_bounds = array<i64: 256, 4>}, {pipeline_mode = #tpu.pipeline_mode<synchronous>, transform_indices = @transform_4, window_bounds = array<i64: 1, 4>}, {transform_indices = @transform_5, window_bounds = array<i64: 8, 256, 256>}]} {
    %c8_i32 = arith.constant 8 : i32
    %0 = arith.muli %arg0, %c8_i32 : i32
    %c0 = arith.constant 0 : index
    %c0_0 = arith.constant 0 : index
    %c0_1 = arith.constant 0 : index
    %1 = vector.load %arg2[%c0, %c0_0, %c0_1] : memref<8x16x256xf32, #tpu.memory_space<vmem>>, vector<8x16x256xf32>
    %2 = vector.shape_cast %1 : vector<8x16x256xf32> to vector<128x256xf32>
    %3 = arith.truncf %2 : vector<128x256xf32> to vector<128x256xbf16>
    %c0_2 = arith.constant 0 : index
    %c0_3 = arith.constant 0 : index
    %4 = vector.load %arg3[%c0_2, %c0_3] : memref<256x256xbf16, #tpu.memory_space<vmem>>, vector<256x256xbf16>
    %cst = arith.constant dense<0.000000e+00> : vector<128x256xf32>
    %5 = tpu.matmul %3, %4, %cst {dimension_numbers = #tpu.dot_dimension_numbers<[1], [0], [0], [1], [0, 0, 1, 1], [], []>} : vector<128x256xbf16>, vector<256x256xbf16>, vector<128x256xf32> -> vector<128x256xf32>
    %c0_4 = arith.constant 0 : index
    %c0_5 = arith.constant 0 : index
    %6 = vector.load %arg4[%c0_4, %c0_5] : memref<1x256xf32, #tpu.memory_space<vmem>>, vector<1x256xf32>
    %7 = vector.broadcast %6 : vector<1x256xf32> to vector<128x256xf32>
    %8 = arith.addf %5, %7 : vector<128x256xf32>
    %cst_6 = arith.constant 0.000000e+00 : f32
    %9 = vector.broadcast %cst_6 : f32 to vector<128x256xf32>
    %10 = arith.maximumf %8, %9 : vector<128x256xf32>
    %11 = arith.truncf %10 : vector<128x256xf32> to vector<128x256xbf16>
    %c0_7 = arith.constant 0 : index
    %c0_8 = arith.constant 0 : index
    %12 = vector.load %arg5[%c0_7, %c0_8] : memref<256x4xbf16, #tpu.memory_space<vmem>>, vector<256x4xbf16>
    %cst_9 = arith.constant dense<0.000000e+00> : vector<128x4xf32>
    %13 = tpu.matmul %11, %12, %cst_9 {dimension_numbers = #tpu.dot_dimension_numbers<[1], [0], [0], [1], [0, 0, 1, 1], [], []>} : vector<128x256xbf16>, vector<256x4xbf16>, vector<128x4xf32> -> vector<128x4xf32>
    %c0_10 = arith.constant 0 : index
    %c0_11 = arith.constant 0 : index
    %14 = vector.load %arg6[%c0_10, %c0_11] : memref<1x4xf32, #tpu.memory_space<vmem>>, vector<1x4xf32>
    %15 = vector.broadcast %14 : vector<1x4xf32> to vector<128x4xf32>
    %16 = arith.addf %13, %15 : vector<128x4xf32>
    %cst_12 = arith.constant dense<0xFF800000> : vector<128xf32>
    %17 = vector.multi_reduction <maximumf>, %16, %cst_12 [1] : vector<128x4xf32> to vector<128xf32>
    %18 = vector.shape_cast %17 : vector<128xf32> to vector<128x1xf32>
    %19 = vector.broadcast %18 : vector<128x1xf32> to vector<128x4xf32>
    %20 = arith.subf %16, %19 : vector<128x4xf32>
    %21 = math.exp %20 : vector<128x4xf32>
    %cst_13 = arith.constant dense<0.000000e+00> : vector<128xf32>
    %22 = vector.multi_reduction <add>, %21, %cst_13 [1] : vector<128x4xf32> to vector<128xf32>
    %23 = vector.shape_cast %22 : vector<128xf32> to vector<128x1xf32>
    %24 = math.log %23 : vector<128x1xf32>
    %25 = arith.addf %18, %24 : vector<128x1xf32>
    %26 = vector.shape_cast %25 : vector<128x1xf32> to vector<8x16x1xf32>
    %27 = tpu.iota {dimensions = array<i32: 1>} : vector<8x16x1xi32>
    %28 = tpu.iota {dimensions = array<i32: 0>} : vector<8x16x1xi32>
    %c0_i32 = arith.constant 0 : i32
    %29 = vector.broadcast %c0_i32 : i32 to vector<8x16x1xi32>
    %c0_i32_14 = arith.constant 0 : i32
    %30 = vector.broadcast %c0_i32_14 : i32 to vector<8x16x1xi32>
    %31 = arith.cmpi eq, %28, %30 : vector<8x16x1xi32>
    %c0_i32_15 = arith.constant 0 : i32
    %32 = arith.addi %0, %c0_i32_15 : i32
    %33 = arith.index_cast %32 : i32 to index
    %34 = memref.load %arg1[%33] : memref<8xi32, #tpu.memory_space<smem>>
    %35 = vector.broadcast %34 : i32 to vector<8x16x1xi32>
    %36 = arith.select %31, %35, %29 : vector<8x16x1xi1>, vector<8x16x1xi32>
    %c1_i32 = arith.constant 1 : i32
    %37 = vector.broadcast %c1_i32 : i32 to vector<8x16x1xi32>
    %38 = arith.cmpi eq, %28, %37 : vector<8x16x1xi32>
    %c1_i32_16 = arith.constant 1 : i32
    %39 = arith.addi %0, %c1_i32_16 : i32
    %40 = arith.index_cast %39 : i32 to index
    %41 = memref.load %arg1[%40] : memref<8xi32, #tpu.memory_space<smem>>
    %42 = vector.broadcast %41 : i32 to vector<8x16x1xi32>
    %43 = arith.select %38, %42, %36 : vector<8x16x1xi1>, vector<8x16x1xi32>
    %c2_i32 = arith.constant 2 : i32
    %44 = vector.broadcast %c2_i32 : i32 to vector<8x16x1xi32>
    %45 = arith.cmpi eq, %28, %44 : vector<8x16x1xi32>
    %c2_i32_17 = arith.constant 2 : i32
    %46 = arith.addi %0, %c2_i32_17 : i32
    %47 = arith.index_cast %46 : i32 to index
    %48 = memref.load %arg1[%47] : memref<8xi32, #tpu.memory_space<smem>>
    %49 = vector.broadcast %48 : i32 to vector<8x16x1xi32>
    %50 = arith.select %45, %49, %43 : vector<8x16x1xi1>, vector<8x16x1xi32>
    %c3_i32 = arith.constant 3 : i32
    %51 = vector.broadcast %c3_i32 : i32 to vector<8x16x1xi32>
    %52 = arith.cmpi eq, %28, %51 : vector<8x16x1xi32>
    %c3_i32_18 = arith.constant 3 : i32
    %53 = arith.addi %0, %c3_i32_18 : i32
    %54 = arith.index_cast %53 : i32 to index
    %55 = memref.load %arg1[%54] : memref<8xi32, #tpu.memory_space<smem>>
    %56 = vector.broadcast %55 : i32 to vector<8x16x1xi32>
    %57 = arith.select %52, %56, %50 : vector<8x16x1xi1>, vector<8x16x1xi32>
    %c4_i32 = arith.constant 4 : i32
    %58 = vector.broadcast %c4_i32 : i32 to vector<8x16x1xi32>
    %59 = arith.cmpi eq, %28, %58 : vector<8x16x1xi32>
    %c4_i32_19 = arith.constant 4 : i32
    %60 = arith.addi %0, %c4_i32_19 : i32
    %61 = arith.index_cast %60 : i32 to index
    %62 = memref.load %arg1[%61] : memref<8xi32, #tpu.memory_space<smem>>
    %63 = vector.broadcast %62 : i32 to vector<8x16x1xi32>
    %64 = arith.select %59, %63, %57 : vector<8x16x1xi1>, vector<8x16x1xi32>
    %c5_i32 = arith.constant 5 : i32
    %65 = vector.broadcast %c5_i32 : i32 to vector<8x16x1xi32>
    %66 = arith.cmpi eq, %28, %65 : vector<8x16x1xi32>
    %c5_i32_20 = arith.constant 5 : i32
    %67 = arith.addi %0, %c5_i32_20 : i32
    %68 = arith.index_cast %67 : i32 to index
    %69 = memref.load %arg1[%68] : memref<8xi32, #tpu.memory_space<smem>>
    %70 = vector.broadcast %69 : i32 to vector<8x16x1xi32>
    %71 = arith.select %66, %70, %64 : vector<8x16x1xi1>, vector<8x16x1xi32>
    %c6_i32 = arith.constant 6 : i32
    %72 = vector.broadcast %c6_i32 : i32 to vector<8x16x1xi32>
    %73 = arith.cmpi eq, %28, %72 : vector<8x16x1xi32>
    %c6_i32_21 = arith.constant 6 : i32
    %74 = arith.addi %0, %c6_i32_21 : i32
    %75 = arith.index_cast %74 : i32 to index
    %76 = memref.load %arg1[%75] : memref<8xi32, #tpu.memory_space<smem>>
    %77 = vector.broadcast %76 : i32 to vector<8x16x1xi32>
    %78 = arith.select %73, %77, %71 : vector<8x16x1xi1>, vector<8x16x1xi32>
    %c7_i32 = arith.constant 7 : i32
    %79 = vector.broadcast %c7_i32 : i32 to vector<8x16x1xi32>
    %80 = arith.cmpi eq, %28, %79 : vector<8x16x1xi32>
    %c7_i32_22 = arith.constant 7 : i32
    %81 = arith.addi %0, %c7_i32_22 : i32
    %82 = arith.index_cast %81 : i32 to index
    %83 = memref.load %arg1[%82] : memref<8xi32, #tpu.memory_space<smem>>
    %84 = vector.broadcast %83 : i32 to vector<8x16x1xi32>
    %85 = arith.select %80, %84, %78 : vector<8x16x1xi1>, vector<8x16x1xi32>
    %86 = arith.cmpi slt, %27, %85 : vector<8x16x1xi32>
    %87 = arith.extui %86 : vector<8x16x1xi1> to vector<8x16x1xi32>
    %88 = arith.sitofp %87 : vector<8x16x1xi32> to vector<8x16x1xf32>
    %89 = arith.addf %26, %88 : vector<8x16x1xf32>
    %cst_23 = arith.constant dense<0xFF800000> : vector<8x1xf32>
    %90 = vector.multi_reduction <maximumf>, %89, %cst_23 [1] : vector<8x16x1xf32> to vector<8x1xf32>
    %91 = vector.shape_cast %90 : vector<8x1xf32> to vector<8x1x1xf32>
    %92 = vector.broadcast %91 : vector<8x1x1xf32> to vector<8x16x1xf32>
    %93 = arith.subf %89, %92 : vector<8x16x1xf32>
    %94 = math.exp %93 : vector<8x16x1xf32>
    %cst_24 = arith.constant dense<0.000000e+00> : vector<8x1xf32>
    %95 = vector.multi_reduction <add>, %94, %cst_24 [1] : vector<8x16x1xf32> to vector<8x1xf32>
    %96 = vector.shape_cast %95 : vector<8x1xf32> to vector<8x1x1xf32>
    %97 = vector.broadcast %96 : vector<8x1x1xf32> to vector<8x16x1xf32>
    %98 = arith.divf %94, %97 : vector<8x16x1xf32>
    %99 = vector.broadcast %98 : vector<8x16x1xf32> to vector<8x16x256xf32>
    %100 = arith.mulf %99, %1 : vector<8x16x256xf32>
    %cst_25 = arith.constant dense<0.000000e+00> : vector<8x256xf32>
    %101 = vector.multi_reduction <add>, %100, %cst_25 [1] : vector<8x16x256xf32> to vector<8x256xf32>
    %102 = vector.shape_cast %101 : vector<8x256xf32> to vector<8x1x256xf32>
    %103 = vector.broadcast %102 : vector<8x1x256xf32> to vector<8x16x256xf32>
    %104 = arith.subf %1, %103 : vector<8x16x256xf32>
    %105 = vector.broadcast %98 : vector<8x16x1xf32> to vector<8x16x256xf32>
    %106 = arith.mulf %105, %104 : vector<8x16x256xf32>
    %107 = arith.mulf %106, %104 : vector<8x16x256xf32>
    %cst_26 = arith.constant dense<0.000000e+00> : vector<8x256xf32>
    %108 = vector.multi_reduction <add>, %107, %cst_26 [1] : vector<8x16x256xf32> to vector<8x256xf32>
    %109 = vector.shape_cast %108 : vector<8x256xf32> to vector<8x1x256xf32>
    %cst_27 = arith.constant 9.99999971E-10 : f32
    %110 = vector.broadcast %cst_27 : f32 to vector<8x1x256xf32>
    %111 = arith.addf %109, %110 : vector<8x1x256xf32>
    %112 = math.rsqrt %111 : vector<8x1x256xf32>
    %113 = vector.broadcast %112 : vector<8x1x256xf32> to vector<8x16x256xf32>
    %114 = arith.mulf %106, %113 : vector<8x16x256xf32>
    %115 = vector.broadcast %112 : vector<8x1x256xf32> to vector<8x16x256xf32>
    %116 = arith.mulf %104, %115 : vector<8x16x256xf32>
    "tpu.trace_start"() <{level = 10 : i32, message = "btk,btl->bkl"}> : () -> ()
    %cst_28 = arith.constant dense<0.000000e+00> : vector<8x256x256xf32>
    %117 = tpu.matmul %114, %116, %cst_28 {dimension_numbers = #tpu.dot_dimension_numbers<[1], [1], [2], [2], [0, 0, 0, 2, 1, 2], [0], [0]>} : vector<8x16x256xf32>, vector<8x16x256xf32>, vector<8x256x256xf32> -> vector<8x256x256xf32>
    "tpu.trace_stop"() : () -> ()
    %118 = arith.truncf %117 : vector<8x256x256xf32> to vector<8x256x256xbf16>
    %c0_29 = arith.constant 0 : index
    %c0_30 = arith.constant 0 : index
    %c0_31 = arith.constant 0 : index
    %119 = vector.load %arg7[%c0_29, %c0_30, %c0_31] : memref<8x256x256xbf16, #tpu.memory_space<vmem>>, vector<8x256x256xbf16>
    tpu.vector_store %arg7[%c0_29, %c0_30, %c0_31], %118 {strides = array<i32>} : memref<8x256x256xbf16, #tpu.memory_space<vmem>>, vector<8x256x256xbf16>,
    return
  }
  func.func @transform_0(%arg0: i32, %arg1: memref<8xi32, #tpu.memory_space<smem>>) -> (i32, i32, i32) {
    %c0_i32 = arith.constant 0 : i32
    %c0_i32_0 = arith.constant 0 : i32
    %c0_i32_1 = arith.constant 0 : i32
    return %arg0, %c0_i32, %c0_i32_0 : i32, i32, i32
  }
  func.func @transform_1(%arg0: i32, %arg1: memref<8xi32, #tpu.memory_space<smem>>) -> (i32, i32) {
    %c0_i32 = arith.constant 0 : i32
    %c0_i32_0 = arith.constant 0 : i32
    %c0_i32_1 = arith.constant 0 : i32
    return %c0_i32, %c0_i32_0 : i32, i32
  }
  func.func @transform_2(%arg0: i32, %arg1: memref<8xi32, #tpu.memory_space<smem>>) -> (i32, i32) {
    %c0_i32 = arith.constant 0 : i32
    %c0_i32_0 = arith.constant 0 : i32
    %c0_i32_1 = arith.constant 0 : i32
    return %c0_i32, %c0_i32_0 : i32, i32
  }
  func.func @transform_3(%arg0: i32, %arg1: memref<8xi32, #tpu.memory_space<smem>>) -> (i32, i32) {
    %c0_i32 = arith.constant 0 : i32
    %c0_i32_0 = arith.constant 0 : i32
    %c0_i32_1 = arith.constant 0 : i32
    return %c0_i32, %c0_i32_0 : i32, i32
  }
  func.func @transform_4(%arg0: i32, %arg1: memref<8xi32, #tpu.memory_space<smem>>) -> (i32, i32) {
    %c0_i32 = arith.constant 0 : i32
    %c0_i32_0 = arith.constant 0 : i32
    %c0_i32_1 = arith.constant 0 : i32
    return %c0_i32, %c0_i32_0 : i32, i32
  }
  func.func @transform_5(%arg0: i32, %arg1: memref<8xi32, #tpu.memory_space<smem>>) -> (i32, i32, i32) {
    %c0_i32 = arith.constant 0 : i32
    %c0_i32_0 = arith.constant 0 : i32
    %c0_i32_1 = arith.constant 0 : i32
    return %arg0, %c0_i32, %c0_i32_0 : i32, i32, i32
  }
}

</mosaic_0001>

<bundles_post_ra>
// kernel: tpu_custom_call.1
= control target key start
LH: loop header
LB: loop body
LE: loop exit
PB: predicated region body
PF: predicated region fallthrough
CT: control target
= control target key end

     0   :  { %s9546_s0 = inlined_call_operand.vmem [shape: s32[8], index: 0, kind: input, shape index: {}]   ;;  %s9547_s1 = inlined_call_operand.hbm [shape: f32[8,16,256], index: 1, kind: input, shape index: {}]   ;;  %s9548_s2 = inlined_call_operand.hbm [shape: bf16[256,256], index: 2, kind: input, shape index: {}]   ;;  %s9549_s3 = inlined_call_operand.vmem [shape: f32[1,256], index: 3, kind: input, shape index: {}]   ;;  %s9550_s4 = inlined_call_operand.vmem [shape: bf16[256,4], index: 4, kind: input, shape index: {}]   ;;  %s9551_s5 = inlined_call_operand.vmem [shape: f32[1,4], index: 5, kind: input, shape index: {}]   ;;  %s9552_s6 = inlined_call_operand.hbm [shape: bf16[8,256,256], index: 6, kind: output, shape index: {}]  }
   0x1   :  { %s11_s23 = sshll.u32 %s9546_s0, 4  ;;  %s12_s23 = int_to_ptr.vmem [resolvable:$true] %s11_s23 }
   0x2   :  { %s7922_s24 = scalar_lea.vmem %s12_s23, 16  ;;  %p7927_p1 = scmp.lt.s32.totalorder %s12_s23, %s12_s23 }
   0x3   :  { %p7923_p0 = scmp.ne.s32.totalorder %s12_s23, %s7922_s24  ;;  %p7928_p2 = scmp.lt.s32.totalorder %s7922_s24, %s7922_s24 }
   0x5   :  { %p7929_p3 = por %p7928_p2, %p7927_p1 }
   0x7   :  { %p7930_p4 = pnand %p7929_p3, %p7923_p0 }
   0x9   :  { %7933 = shalt.err (!%p7930_p4)  }
   0xa   :  { %s8002_s25 = smov [#allocation3]  }
   0xb   :  { %14 = dma.vmem_to_smem %s12_s23, 16, %s8002_s25, [#allocation2] }
   0xc   :  { %7994 = dma.done.wait [#allocation2], 16 }
   0xd   :  { %7995 = vsyncadd [#allocation2], 4294967280 }
   0xe   :  { %16 = sfence }
   0xf   :  { %17 = vsyncpa [#allocation5], 0 }
  0x10   :  { %18 = vsyncpa [#allocation8], 0 }
  0x11   :  { %19 = vsyncpa [#allocation6], 0  ;;  %s8003_s26 = smov [#allocation4]  }
  0x12   :  { %s25_s27 = sshll.u32 %s8003_s26, 4  ;;  %s26_s27 = int_to_ptr.vmem [resolvable:$true] %s25_s27 }
  0x13   :  { %s7942_s0 = scalar_lea.vmem %s26_s27, 4096  ;;  %p7947_p6 = scmp.lt.s32.totalorder %s26_s27, %s26_s27 }
  0x14   :  { %p7943_p5 = scmp.ne.s32.totalorder %s26_s27, %s7942_s0  ;;  %p7948_p7 = scmp.lt.s32.totalorder %s7942_s0, %s7942_s0 }
  0x16   :  { %p7949_p8 = por %p7948_p7, %p7947_p6 }
  0x18   :  { %p7950_p9 = pnand %p7949_p8, %p7943_p5 }
  0x1a   :  { %7953 = shalt.err (!%p7950_p9)
}
  0x1b   :  { %s8004_s28 = smov 256   ;;  %s8005_s29 = smov 16  }
  0x1c   :  { %31 = dma.hbm_to_vmem [thread:$0]  %s9547_s1, 4096, %s26_s27, [#allocation5], %s8004_s28, %s8004_s28, %s8005_s29  }
  0x1d   :  { %s8006_s8 = smov [#allocation7]  }
  0x1e   :  { %s37_s9 = sshll.u32 %s8006_s8, 4  ;;  %s38_s9 = int_to_ptr.vmem [resolvable:$true] %s37_s9 }
  0x1f   :  { %s7962_s10 = scalar_lea.vmem %s38_s9, 4096  ;;  %p7967_p11 = scmp.lt.s32.totalorder %s38_s9, %s38_s9 }
  0x20   :  { %p7963_p10 = scmp.ne.s32.totalorder %s38_s9, %s7962_s10  ;;  %p7968_p12 = scmp.lt.s32.totalorder %s7962_s10, %s7962_s10 }
  0x22   :  { %p7969_p13 = por %p7968_p12, %p7967_p11 }
  0x24   :  { %p7970_p0 = pnand %p7969_p13, %p7963_p10 }
  0x26   :  { %7973 = shalt.err (!%p7970_p0)
}
  0x27   :  { %s8007_s11 = smov 128   ;;  %s8008_s12 = smov 8  }
  0x28   :  { %43 = dma.hbm_to_vmem [thread:$0]  %s9548_s2, 4096, %s38_s9, [#allocation8], %s8007_s11, %s8007_s11, %s8008_s12  }
  0x29   :  { %7996 = dma.done.wait [#allocation5], 4096  }
  0x2a   :  { %7997 = vsyncadd [#allocation5], 4294963200 }
  0x2b   :  { %7998 = dma.done.wait [#allocation8], 4096  }
  0x2c   :  { %7999 = vsyncadd [#allocation8], 4294963200  ;;  %v7682_v0 = vld [vmem:[#allocation7 + $0x74] ss:$8 sps:$4 sm:$0xff]   ;;  %v7684_v1 = vld [vmem:[#allocation7 + $0x70] ss:$8 sps:$4 sm:$0xff]  }
  0x2d   :  { %310 = vmatprep.subr.bf16.mxu0 %v7682_v0  ;;  %v7685_v2 = vld [vmem:[#allocation7 + $0x64] ss:$8 sps:$4 sm:$0xff]   ;;  %v7687_v3 = vld [vmem:[#allocation7 + $0x60] ss:$8 sps:$4 sm:$0xff]   ;;  %v7688_v4 = vld [vmem:[#allocation7 + $0x54] ss:$8 sps:$4 sm:$0xff]  }
  0x2e   :  { %311 = vmatpush1.bf16.msra.mxu0 %v7684_v1  ;;  %v7690_v5 = vld [vmem:[#allocation7 + $0x50] ss:$8 sps:$4 sm:$0xff]   ;;  %v7691_v6 = vld [vmem:[#allocation7 + $0x44] ss:$8 sps:$4 sm:$0xff]   ;;  %v7693_v7 = vld [vmem:[#allocation7 + $0x40] ss:$8 sps:$4 sm:$0xff]  }
  0x2f   :  { %312 = vmatprep.subr.bf16.mxu0 %v7685_v2  ;;  %v7694_v8 = vld [vmem:[#allocation7 + $0x34] ss:$8 sps:$4 sm:$0xff]   ;;  %v7696_v9 = vld [vmem:[#allocation7 + $0x30] ss:$8 sps:$4 sm:$0xff]   ;;  %v7697_v10 = vld [vmem:[#allocation7 + $0x24] ss:$8 sps:$4 sm:$0xff]  }
  0x30   :  { %v7699_v11 = vld [vmem:[#allocation7 + $0x20] ss:$8 sps:$4 sm:$0xff]   ;;  %v7700_v12 = vld [vmem:[#allocation7 + $0x14] ss:$8 sps:$4 sm:$0xff]   ;;  %v7702_v16 = vld [vmem:[#allocation7 + $0x10] ss:$8 sps:$4 sm:$0xff]  }
  0x31   :  { %v59_v13 = vld [vmem:[#allocation4 + $0x8] sm:$0xff]  ;;  %v61_v14 = vld [vmem:[#allocation4 + $0x18] sm:$0xff]  ;;  %v7732_v24 = vld [vmem:[%s9550_s4 + $0x70] sm:$0xff]   ;;  %vm703_vm0 = vcmask 31744   ;;  %s8258_s22 = sld [smem:[#allocation3 + $0x1]]  ;;  %vm1682_vm15 = vcmask 130048  }
  0x32   :  { %313 = vmatpush1.bf16.msra.mxu0 %v7687_v3  ;;  %v91_v15 = vpack.c.bf16 %v61_v14, %v59_v13  ;;  %v7703_v17 = vld [vmem:[#allocation7 + $0x4] ss:$8 sps:$4 sm:$0xff]   ;;  %v7705_v18 = vld [vmem:[#allocation7] ss:$8 sps:$4 sm:$0xff]   ;;  %v7706_v19 = vld [vmem:[#allocation7 + $0xf4] ss:$8 sps:$4 sm:$0xff]  }
  0x33   :  { %314 = vmatprep.subr.bf16.mxu0 %v7688_v4  ;;  %v7708_v20 = vld [vmem:[#allocation7 + $0xf0] ss:$8 sps:$4 sm:$0xff]   ;;  %v7709_v21 = vld [vmem:[#allocation7 + $0xe4] ss:$8 sps:$4 sm:$0xff]   ;;  %v7711_v26 = vld [vmem:[#allocation7 + $0xe0] ss:$8 sps:$4 sm:$0xff]  }
  0x34   :  { %342 = vmatprep.mubr.bf16.mxu0 %v91_v15  ;;  %v7730_v22 = vld [vmem:[%s9550_s4 + $0x78] sm:$0xff]   ;;  %v7733_v25 = vld [vmem:[%s9550_s4 + $0x30] sm:$0xff]   ;;  %v7734_v27 = vld [vmem:[%s9550_s4 + $0x68] sm:$0xff]   ;;  %s6815_s23 = sld [smem:[#allocation3 + $0x2]]  ;;  %s8010_s28 = smov [#allocation9]  }
  0x35   :  { %v7731_v23 = vld [vmem:[%s9550_s4 + $0x38] sm:$0xff]   ;;  %7605 = vmatprep.subr.bf16.mxu1 %v7730_v22  ;;  %v7735_v29 = vld [vmem:[%s9550_s4 + $0x28] sm:$0xff]   ;;  %v7736_v30 = vld [vmem:[%s9550_s4 + $0x60] sm:$0xff]   ;;  %s6816_s24 = sld [smem:[#allocation3 + $0x3]]  ;;  %s6752_s29 = sshll.u32 %s8010_s28, 4  ;;  %s6753_s29 = int_to_ptr.vmem [resolvable:$true] %s6752_s29 }
  0x36   :  { %315 = vmatpush1.bf16.msra.mxu0 %v7690_v5  ;;  %7606 = vmatpush3.bf16.msra.mxu1 %v7731_v23  ;;  %v7712_v28 = vld [vmem:[#allocation7 + $0xd4] ss:$8 sps:$4 sm:$0xff]   ;;  %v7714_v31 = vld [vmem:[#allocation7 + $0xd0] ss:$8 sps:$4 sm:$0xff]   ;;  %v7715_v32 = vld [vmem:[#allocation7 + $0xc4] ss:$8 sps:$4 sm:$0xff]   ;;  %p7979_p2 = scmp.lt.s32.totalorder %s6753_s29, %s6753_s29 }
  0x37   :  { %316 = vmatprep.subr.bf16.mxu0 %v7691_v6  ;;  %7607 = vmatprep.subr.bf16.mxu1 %v7732_v24  ;;  %v7717_v33 = vld [vmem:[#allocation7 + $0xc0] ss:$8 sps:$4 sm:$0xff]   ;;  %v7718_v35 = vld [vmem:[#allocation7 + $0xb4] ss:$8 sps:$4 sm:$0xff]   ;;  %v7720_v38 = vld [vmem:[#allocation7 + $0xb0] ss:$8 sps:$4 sm:$0xff]  }
  0x38   :  { %v7737_v34 = vld [vmem:[%s9550_s4 + $0x20] sm:$0xff]   ;;  %v7738_v36 = vld [vmem:[%s9550_s4 + $0x58] sm:$0xff]   ;;  %v8090_v46 = vld [vmem:[#allocation4 + $0x10] sm:$0xff]  ;;  %s8421_s25 = sld [smem:[#allocation3 + $0x4]]  ;;  %s7974_s30 = scalar_lea.vmem %s6753_s29, 32768 }
  0x39   :  { %v7739_v37 = vld [vmem:[%s9550_s4 + $0x18] sm:$0xff]   ;;  %v7721_v39 = vld [vmem:[#allocation7 + $0xa4] ss:$8 sps:$4 sm:$0xff]   ;;  %v7723_v40 = vld [vmem:[#allocation7 + $0xa0] ss:$8 sps:$4 sm:$0xff]   ;;  %s8423_s26 = sld [smem:[#allocation3 + $0x5]]  ;;  %p7975_p1 = scmp.ne.s32.totalorder %s6753_s29, %s7974_s30 }
  0x3a   :  { %317 = vmatpush1.bf16.msra.mxu0 %v7693_v7  ;;  %7608 = vmatpush3.bf16.msra.mxu1 %v7733_v25  ;;  %v7724_v41 = vld [vmem:[#allocation7 + $0x94] ss:$8 sps:$4 sm:$0xff]   ;;  %v7726_v42 = vld [vmem:[#allocation7 + $0x90] ss:$8 sps:$4 sm:$0xff]   ;;  %v7727_v43 = vld [vmem:[#allocation7 + $0x84] ss:$8 sps:$4 sm:$0xff]   ;;  %p7980_p3 = scmp.lt.s32.totalorder %s7974_s30, %s7974_s30 }
  0x3b   :  { %318 = vmatprep.subr.bf16.mxu0 %v7694_v8  ;;  %7609 = vmatprep.subr.bf16.mxu1 %v7734_v27  ;;  %v7729_v44 = vld [vmem:[#allocation7 + $0x80] ss:$8 sps:$4 sm:$0xff]   ;;  %v8094_v48 = vld [vmem:[#allocation4 + $0x38] sm:$0xff]  ;;  %v8102_v52 = vld [vmem:[#allocation4 + $0x30] sm:$0xff]  ;;  %s8428_s27 = sld [smem:[#allocation3 + $0x6]] }
  0x3c   :  { %v8088_v45 = vld [vmem:[#allocation4] sm:$0xff]  ;;  %v8092_v47 = vld [vmem:[#allocation4 + $0x28] sm:$0xff]  ;;  %v69_v54 = vld [vmem:[#allocation4 + $0x58] sm:$0xff]  ;;  %s6820_s0 = sld [smem:[#allocation3 + $0x7]]  ;;  %p7981_p4 = por %p7980_p3, %p7979_p2 }
  0x3d   :  { %v90_v49 = vpack.c.bf16 %v8090_v46, %v8088_v45  ;;  %v93_v50 = vpack.c.bf16 %v8094_v48, %v8092_v47  ;;  %v8100_v51 = vld [vmem:[#allocation4 + $0x20] sm:$0xff]  ;;  %v67_v53 = vld [vmem:[#allocation4 + $0x48] sm:$0xff]  ;;  %v68_v58 = vld [vmem:[#allocation4 + $0x50] sm:$0xff] }
  0x3e   :  { %319 = vmatpush1.bf16.msra.mxu0 %v7696_v9  ;;  %7610 = vmatpush3.bf16.msra.mxu1 %v7735_v29  ;;  %v92_v55 = vpack.c.bf16 %v8102_v52, %v8100_v51  ;;  %v95_v56 = vpack.c.bf16 %v69_v54, %v67_v53  ;;  %v66_v57 = vld [vmem:[#allocation4 + $0x40] sm:$0xff]  ;;  %v71_v59 = vld [vmem:[#allocation4 + $0x68] sm:$0xff]  ;;  %v73_v60 = vld [vmem:[#allocation4 + $0x78] sm:$0xff]  ;;  %p7982_p5 = pnand %p7981_p4, %p7975_p1 }
  0x3f   :  { %320 = vmatprep.subr.bf16.mxu0 %v7697_v10  ;;  %7611 = vmatprep.subr.bf16.mxu1 %v7736_v30  ;;  %v94_v61 = vpack.c.bf16 %v68_v58, %v66_v57  ;;  %v97_v62 = vpack.c.bf16 %v73_v60, %v71_v59  ;;  %v70_v63 = vld [vmem:[#allocation4 + $0x60] sm:$0xff]  ;;  %v72_v0 = vld [vmem:[#allocation4 + $0x70] sm:$0xff]  ;;  %v75_v1 = vld [vmem:[#allocation4 + $0x88] sm:$0xff] }
  0x40   :  { %v77_v2 = vld [vmem:[#allocation4 + $0x98] sm:$0xff]  ;;  %v96_v3 = vpack.c.bf16 %v72_v0, %v70_v63  ;;  %v74_v5 = vld [vmem:[#allocation4 + $0x80] sm:$0xff]  ;;  %v76_v6 = vld [vmem:[#allocation4 + $0x90] sm:$0xff] }
  0x41   :  { %v99_v4 = vpack.c.bf16 %v77_v2, %v75_v1  ;;  %v79_v7 = vld [vmem:[#allocation4 + $0xa8] sm:$0xff]  ;;  %v81_v8 = vld [vmem:[#allocation4 + $0xb8] sm:$0xff]  ;;  %v98_v9 = vpack.c.bf16 %v76_v6, %v74_v5  ;;  %v86_v23 = vld [vmem:[#allocation4 + $0xe0] sm:$0xff] }
  0x42   :  { %321 = vmatpush1.bf16.msra.mxu0 %v7699_v11  ;;  %7612 = vmatpush3.bf16.msra.mxu1 %v7737_v34  ;;  %v101_v10 = vpack.c.bf16 %v81_v8, %v79_v7  ;;  %v78_v11 = vld [vmem:[#allocation4 + $0xa0] sm:$0xff]  ;;  %v83_v13 = vld [vmem:[#allocation4 + $0xc8] sm:$0xff]  ;;  %v85_v14 = vld [vmem:[#allocation4 + $0xd8] sm:$0xff] }
  0x43   :  { %322 = vmatprep.subr.bf16.mxu0 %v7700_v12  ;;  %7613 = vmatprep.subr.bf16.mxu1 %v7738_v36  ;;  %v80_v12 = vld [vmem:[#allocation4 + $0xb0] sm:$0xff]  ;;  %v7743_v29 = vld [vmem:[%s9550_s4 + $0x8] sm:$0xff]   ;;  %v7744_v30 = vld [vmem:[%s9550_s4 + $0x40] sm:$0xff]  }
  0x44   :  { %v100_v15 = vpack.c.bf16 %v80_v12, %v78_v11  ;;  %v88_v24 = vld [vmem:[#allocation4 + $0xf0] sm:$0xff]  ;;  %v138_v36 = vld [vmem:[%s9549_s3] sm:$0x3] }
  0x45   :  { %v104_v25 = vpack.c.bf16 %v88_v24, %v86_v23  ;;  %v7741_v27 = vld [vmem:[%s9550_s4 + $0x10] sm:$0xff]  }
  0x46   :  { %323 = vmatpush1.bf16.msra.mxu0 %v7702_v16  ;;  %7614 = vmatpush3.bf16.msra.mxu1 %v7739_v37  ;;  %v103_v16 = vpack.c.bf16 %v85_v14, %v83_v13 }
  0x47   :  { %324 = vmatprep.subr.bf16.mxu0 %v7703_v17  ;;  %v82_v17 = vld [vmem:[#allocation4 + $0xc0] sm:$0xff] }
  0x4a   :  { %325 = vmatpush1.bf16.msra.mxu0 %v7705_v18  ;;  %v84_v18 = vld [vmem:[#allocation4 + $0xd0] sm:$0xff] }
  0x4b   :  { %326 = vmatprep.subr.bf16.mxu0 %v7706_v19  ;;  %v87_v19 = vld [vmem:[#allocation4 + $0xe8] sm:$0xff] }
  0x4e   :  { %327 = vmatpush2.bf16.msra.mxu0 %v7708_v20  ;;  %v89_v20 = vld [vmem:[#allocation4 + $0xf8] sm:$0xff] }
  0x4f   :  { %328 = vmatprep.subr.bf16.mxu0 %v7709_v21  ;;  %v102_v21 = vpack.c.bf16 %v84_v18, %v82_v17  ;;  %v105_v22 = vpack.c.bf16 %v89_v20, %v87_v19 }
  0x52   :  { %329 = vmatpush2.bf16.msra.mxu0 %v7711_v26  ;;  %v7740_v26 = vld [vmem:[%s9550_s4 + $0x50] sm:$0xff]  }
  0x53   :  { %330 = vmatprep.subr.bf16.mxu0 %v7712_v28  ;;  %7615 = vmatprep.subr.bf16.mxu1 %v7740_v26  ;;  %v7742_v28 = vld [vmem:[%s9550_s4 + $0x48] sm:$0xff]  }
  0x54   :  { %7616 = vmatpush3.bf16.msra.mxu1 %v7741_v27 }
  0x55   :  { %7617 = vmatprep.subr.bf16.mxu1 %v7742_v28 }
  0x56   :  { %331 = vmatpush2.bf16.msra.mxu0 %v7714_v31  ;;  %v7745_v31 = vld [vmem:[%s9550_s4] sm:$0xff]  }
  0x57   :  { %332 = vmatprep.subr.bf16.mxu0 %v7715_v32  ;;  %v140_v32 = vlaneseq }
  0x58   :  { %7618 = vmatpush3.bf16.msra.mxu1 %v7743_v29 }
  0x59   :  { %7619 = vmatprep.subr.bf16.mxu1 %v7744_v30 }
  0x5a   :  { %333 = vmatpush2.bf16.msra.mxu0 %v7717_v33  ;;  %v8124_v33 = vshrl.u32 %v140_v32, 7 }
  0x5b   :  { %334 = vmatprep.subr.bf16.mxu0 %v7718_v35 }
  0x5c   :  { %7620 = vmatpush3.bf16.msra.mxu1 %v7745_v31  ;;  %9557 = vst [vmem:[#allocation14_spill] sm:$0xff] %v8124_v33  ;;  %v146_v34 = vsub.s32 1, %v8124_v33  ;;  %v142_v35 = vsub.s32 0, %v8124_v33 }
  0x5e   :  { %335 = vmatpush2.bf16.msra.mxu0 %v7720_v38  ;;  %v8131_v38 = vrot.slane %v138_v36, %v146_v34 }
  0x5f   :  { %336 = vmatprep.subr.bf16.mxu0 %v7721_v39  ;;  %v8133_v39 = vrot.slane %v138_v36, %v142_v35 }
  0x62   :  { %337 = vmatpush2.bf16.msra.mxu0 %v7723_v40 }
  0x63   :  { %338 = vmatprep.subr.bf16.mxu0 %v7724_v41 }
  0x66   :  { %339 = vmatpush2.bf16.msra.mxu0 %v7726_v42 }
  0x67   :  { %340 = vmatprep.subr.bf16.mxu0 %v7727_v43 }
  0x6a   :  { %341 = vmatpush2.bf16.msra.mxu0 %v7729_v44 }
  0x6d   :  { %343 = vmatmul.mubr.bf16.vlgmr.msra.gmra.mxu0 %v90_v49 }
  0x6e   :  { %352 = vmatprep.mubr.bf16.mxu0 %v93_v50 }
  0x75   :  { %353 = vmatmul.mubr.bf16.gmra.mxu0 %v92_v55 }
  0x76   :  { %362 = vmatprep.mubr.bf16.mxu0 %v95_v56 }
  0x7d   :  { %363 = vmatmul.mubr.bf16.gmra.mxu0 %v94_v61 }
  0x7e   :  { %372 = vmatprep.mubr.bf16.mxu0 %v97_v62 }
  0x85   :  { %373 = vmatmul.mubr.bf16.gmra.mxu0 %v96_v3 }
  0x86   :  { %382 = vmatprep.mubr.bf16.mxu0 %v99_v4 }
  0x8d   :  { %383 = vmatmul.mubr.bf16.gmra.mxu0 %v98_v9 }
  0x8e   :  { %392 = vmatprep.mubr.bf16.mxu0 %v101_v10 }
  0x95   :  { %393 = vmatmul.mubr.bf16.gmra.mxu0 %v100_v15 }
  0x96   :  { %402 = vmatprep.mubr.bf16.mxu0 %v103_v16 }
  0x9d   :  { %403 = vmatmul.mubr.bf16.gmra.mxu0 %v102_v21 }
  0x9e   :  { %412 = vmatprep.mubr.bf16.mxu0 %v105_v22 }
  0xa5   :  { %413 = vmatmul.mubr.bf16.gmra.mxu0 %v104_v25 }
 0x12d   :  { %v344_v37 = vpop.f32.mrf.mxu0 }
 0x12e   :  { %v345_v44 = vadd.f32 %v344_v37, %v8133_v39 }
 0x12f   :  { %v346_v40 = vpop.f32.mrf.mxu0 }
 0x130   :  { %v347_v42 = vadd.f32 %v346_v40, %v8131_v38  ;;  %v423_v57 = vmax.f32 %v345_v44, 0.0 }
 0x131   :  { %v348_v41 = vpop.f32.mrf.mxu0 }
 0x132   :  { %v349_v43 = vadd.f32 %v348_v41, %v8133_v39  ;;  %v424_v55 = vmax.f32 %v347_v42, 0.0 }
 0x133   :  { %v350_v49 = vpop.f32.mrf.mxu0 }
 0x134   :  { %v351_v50 = vadd.f32 %v350_v49, %v8131_v38  ;;  %v425_v53 = vmax.f32 %v349_v43, 0.0 }
 0x135   :  { %v354_v54 = vpop.f32.mrf.mxu0 }
 0x136   :  { %v426_v56 = vmax.f32 %v351_v50, 0.0  ;;  %v455_v60 = vpack.c.bf16 %v425_v53, %v423_v57  ;;  %v355_v0 = vadd.f32 %v354_v54, %v8133_v39 }
 0x137   :  { %v356_v58 = vpop.f32.mrf.mxu0 }
 0x138   :  { %v456_v59 = vpack.c.bf16 %v426_v56, %v424_v55  ;;  %v357_v62 = vadd.f32 %v356_v58, %v8131_v38  ;;  %v427_v7 = vmax.f32 %v355_v0, 0.0 }
 0x139   :  { %v358_v61 = vpop.f32.mrf.mxu0 }
 0x13a   :  { %v359_v63 = vadd.f32 %v358_v61, %v8133_v39  ;;  %638 = vmatprep.mubr.bf16.mxu1 %v456_v59  ;;  %v428_v5 = vmax.f32 %v357_v62, 0.0 }
 0x13b   :  { %v360_v1 = vpop.f32.mrf.mxu0  ;;  %639 = vmatmul.mubr.bf16.vlgmr.msra.gmra.mxu1 %v455_v60 }
 0x13c   :  { %v361_v2 = vadd.f32 %v360_v1, %v8131_v38  ;;  %v429_v3 = vmax.f32 %v359_v63, 0.0 }
 0x13d   :  { %v364_v4 = vpop.f32.mrf.mxu0 }
 0x13e   :  { %v430_v6 = vmax.f32 %v361_v2, 0.0  ;;  %v365_v8 = vadd.f32 %v364_v4, %v8133_v39  ;;  %v457_v12 = vpack.c.bf16 %v429_v3, %v427_v7 }
 0x13f   :  { %v366_v9 = vpop.f32.mrf.mxu0 }
 0x140   :  { %v458_v10 = vpack.c.bf16 %v430_v6, %v428_v5  ;;  %v367_v11 = vadd.f32 %v366_v9, %v8131_v38  ;;  %v431_v15 = vmax.f32 %v365_v8, 0.0 }
 0x141   :  { %v368_v13 = vpop.f32.mrf.mxu0 }
 0x142   :  { %646 = vmatprep.mubr.bf16.mxu1 %v458_v10  ;;  %v369_v14 = vadd.f32 %v368_v13, %v8133_v39  ;;  %v432_v17 = vmax.f32 %v367_v11, 0.0 }
 0x143   :  { %647 = vmatmul.mubr.bf16.gmra.mxu1 %v457_v12  ;;  %v370_v16 = vpop.f32.mrf.mxu0 }
 0x144   :  { %v433_v18 = vmax.f32 %v369_v14, 0.0  ;;  %v371_v19 = vadd.f32 %v370_v16, %v8131_v38 }
 0x145   :  { %v374_v20 = vpop.f32.mrf.mxu0 }
 0x146   :  { %v434_v21 = vmax.f32 %v371_v19, 0.0  ;;  %v459_v22 = vpack.c.bf16 %v433_v18, %v431_v15  ;;  %v375_v23 = vadd.f32 %v374_v20, %v8133_v39 }
 0x147   :  { %v376_v24 = vpop.f32.mrf.mxu0 }
 0x148   :  { %v377_v25 = vadd.f32 %v376_v24, %v8131_v38  ;;  %v460_v26 = vpack.c.bf16 %v434_v21, %v432_v17  ;;  %v435_v29 = vmax.f32 %v375_v23, 0.0 }
 0x149   :  { %v378_v27 = vpop.f32.mrf.mxu0 }
 0x14a   :  { %v379_v28 = vadd.f32 %v378_v27, %v8133_v39  ;;  %654 = vmatprep.mubr.bf16.mxu1 %v460_v26  ;;  %v436_v31 = vmax.f32 %v377_v25, 0.0 }
 0x14b   :  { %v380_v30 = vpop.f32.mrf.mxu0  ;;  %655 = vmatmul.mubr.bf16.gmra.mxu1 %v459_v22 }
 0x14c   :  { %v437_v32 = vmax.f32 %v379_v28, 0.0  ;;  %v381_v34 = vadd.f32 %v380_v30, %v8131_v38 }
 0x14d   :  { %v384_v35 = vpop.f32.mrf.mxu0 }
 0x14e   :  { %v438_v36 = vmax.f32 %v381_v34, 0.0  ;;  %v461_v37 = vpack.c.bf16 %v437_v32, %v435_v29  ;;  %v385_v40 = vadd.f32 %v384_v35, %v8133_v39 }
 0x14f   :  { %v386_v41 = vpop.f32.mrf.mxu0 }
 0x150   :  { %v387_v42 = vadd.f32 %v386_v41, %v8131_v38  ;;  %v462_v43 = vpack.c.bf16 %v438_v36, %v436_v31  ;;  %v439_v50 = vmax.f32 %v385_v40, 0.0 }
 0x151   :  { %v388_v44 = vpop.f32.mrf.mxu0 }
 0x152   :  { %v389_v49 = vadd.f32 %v388_v44, %v8133_v39  ;;  %662 = vmatprep.mubr.bf16.mxu1 %v462_v43  ;;  %v440_v54 = vmax.f32 %v387_v42, 0.0  ;;  %v8170_v43 = vld [vmem:[%s9551_s5] ss:$0 sm:$0xff]  ;;  %s899_s5 = sld [smem:[#allocation3]] }
 0x153   :  { %v390_v53 = vpop.f32.mrf.mxu0  ;;  %663 = vmatmul.mubr.bf16.gmra.mxu1 %v461_v37 }
 0x154   :  { %v441_v55 = vmax.f32 %v389_v49, 0.0  ;;  %v391_v56 = vadd.f32 %v390_v53, %v8131_v38 }
 0x155   :  { %v394_v57 = vpop.f32.mrf.mxu0 }
 0x156   :  { %v442_v58 = vmax.f32 %v391_v56, 0.0  ;;  %v463_v59 = vpack.c.bf16 %v441_v55, %v439_v50  ;;  %v395_v60 = vadd.f32 %v394_v57, %v8133_v39 }
 0x157   :  { %v396_v61 = vpop.f32.mrf.mxu0 }
 0x158   :  { %v397_v62 = vadd.f32 %v396_v61, %v8131_v38  ;;  %v464_v63 = vpack.c.bf16 %v442_v58, %v440_v54  ;;  %v443_v2 = vmax.f32 %v395_v60, 0.0 }
 0x159   :  { %v398_v0 = vpop.f32.mrf.mxu0 }
 0x15a   :  { %v399_v1 = vadd.f32 %v398_v0, %v8133_v39  ;;  %670 = vmatprep.mubr.bf16.mxu1 %v464_v63  ;;  %v444_v4 = vmax.f32 %v397_v62, 0.0 }
 0x15b   :  { %v400_v3 = vpop.f32.mrf.mxu0  ;;  %671 = vmatmul.mubr.bf16.gmra.mxu1 %v463_v59 }
 0x15c   :  { %v445_v5 = vmax.f32 %v399_v1, 0.0  ;;  %v401_v6 = vadd.f32 %v400_v3, %v8131_v38 }
 0x15d   :  { %v404_v7 = vpop.f32.mrf.mxu0 }
 0x15e   :  { %v446_v8 = vmax.f32 %v401_v6, 0.0  ;;  %v465_v9 = vpack.c.bf16 %v445_v5, %v443_v2  ;;  %v405_v10 = vadd.f32 %v404_v7, %v8133_v39  ;;  %v8009_v2 = vmov 0.0  }
 0x15f   :  { %v406_v11 = vpop.f32.mrf.mxu0  ;;  %2260 = vmatprep.mubr.f32.mxu0 %v8009_v2 }
 0x160   :  { %v407_v12 = vadd.f32 %v406_v11, %v8131_v38  ;;  %v466_v13 = vpack.c.bf16 %v446_v8, %v444_v4  ;;  %v447_v16 = vmax.f32 %v405_v10, 0.0 }
 0x161   :  { %v408_v14 = vpop.f32.mrf.mxu0 }
 0x162   :  { %v409_v15 = vadd.f32 %v408_v14, %v8133_v39  ;;  %678 = vmatprep.mubr.bf16.mxu1 %v466_v13  ;;  %v448_v18 = vmax.f32 %v407_v12, 0.0 }
 0x163   :  { %v410_v17 = vpop.f32.mrf.mxu0  ;;  %679 = vmatmul.mubr.bf16.gmra.mxu1 %v465_v9 }
 0x164   :  { %v449_v19 = vmax.f32 %v409_v15, 0.0  ;;  %v411_v20 = vadd.f32 %v410_v17, %v8131_v38 }
 0x165   :  { %v414_v21 = vpop.f32.mrf.mxu0 }
 0x166   :  { %v450_v22 = vmax.f32 %v411_v20, 0.0  ;;  %v467_v23 = vpack.c.bf16 %v449_v19, %v447_v16  ;;  %v415_v24 = vadd.f32 %v414_v21, %v8133_v39 }
 0x167   :  { %v416_v25 = vpop.f32.mrf.mxu0 }
 0x168   :  { %v417_v26 = vadd.f32 %v416_v25, %v8131_v38  ;;  %v468_v27 = vpack.c.bf16 %v450_v22, %v448_v18  ;;  %v451_v30 = vmax.f32 %v415_v24, 0.0 }
 0x169   :  { %v418_v28 = vpop.f32.mrf.mxu0 }
 0x16a   :  { %v419_v29 = vadd.f32 %v418_v28, %v8133_v39  ;;  %686 = vmatprep.mubr.bf16.mxu1 %v468_v27  ;;  %v452_v32 = vmax.f32 %v417_v26, 0.0 }
 0x16b   :  { %v420_v31 = vpop.f32.mrf.mxu0  ;;  %687 = vmatmul.mubr.bf16.gmra.mxu1 %v467_v23 }
 0x16c   :  { %v453_v34 = vmax.f32 %v419_v29, 0.0  ;;  %v421_v35 = vadd.f32 %v420_v31, %v8131_v38 }
 0x16e   :  { %v454_v36 = vmax.f32 %v421_v35, 0.0  ;;  %v469_v37 = vpack.c.bf16 %v453_v34, %v451_v30 }
 0x170   :  { %v470_v40 = vpack.c.bf16 %v454_v36, %v452_v32 }
 0x172   :  { %694 = vmatprep.mubr.bf16.mxu1 %v470_v40 }
 0x173   :  { %695 = vmatmul.mubr.bf16.gmra.mxu1 %v469_v37 }
 0x174   :  { %1843 = vmatprep.mubr.f32.mxu1 %v8009_v2 }
 0x1fb   :  { %v7621_v41 = vpop.f32.mrf.mxu1 }
 0x1fd   :  { %v7622_v42 = vpop.f32.mrf.mxu1 }
 0x1fe   :  { %v7623_v39 = vadd.f32 %v7622_v42, %v7621_v41 }
 0x1ff   :  { %v7624_v44 = vpop.f32.mrf.mxu1 }
 0x200   :  { %v641_v49 = vadd.f32 %v7623_v39, %v8170_v43 }
 0x201   :  { %v7625_v50 = vpop.f32.mrf.mxu1 }
 0x202   :  { %v7626_v53 = vadd.f32 %v7625_v50, %v7624_v44  ;;  %v704_v38 = vsel %vm703_vm0, %v641_v49, -inf }
 0x203   :  { %v7627_v54 = vpop.f32.mrf.mxu1  ;;  %705 = vmax.xlane.f32.xlu0 %v704_v38 }
 0x204   :  { %v644_v55 = vadd.f32 %v7626_v53, %v8170_v43 }
 0x205   :  { %v7628_v56 = vpop.f32.mrf.mxu1 }
 0x206   :  { %v7629_v57 = vadd.f32 %v7628_v56, %v7627_v54  ;;  %v707_v58 = vsel %vm703_vm0, %v644_v55, -inf }
 0x207   :  { %v7630_v59 = vpop.f32.mrf.mxu1  ;;  %708 = vmax.xlane.f32.xlu0 %v707_v58 }
 0x208   :  { %v649_v60 = vadd.f32 %v7629_v57, %v8170_v43 }
 0x209   :  { %v7631_v61 = vpop.f32.mrf.mxu1 }
 0x20a   :  { %v7632_v62 = vadd.f32 %v7631_v61, %v7630_v59  ;;  %v710_v63 = vsel %vm703_vm0, %v649_v60, -inf }
 0x20b   :  { %711 = vmax.xlane.f32.xlu1 %v710_v63  ;;  %v7633_v3 = vpop.f32.mrf.mxu1 }
 0x20c   :  { %v652_v0 = vadd.f32 %v7632_v62, %v8170_v43 }
 0x20d   :  { %v7634_v4 = vpop.f32.mrf.mxu1 }
 0x20e   :  { %v713_v1 = vsel %vm703_vm0, %v652_v0, -inf  ;;  %v7635_v40 = vadd.f32 %v7634_v4, %v7633_v3 }
 0x20f   :  { %714 = vmax.xlane.f32.xlu1 %v713_v1  ;;  %v7636_v5 = vpop.f32.mrf.mxu1 }
 0x210   :  { %v8198_v53 = vadd.f32 %v7635_v40, %v8170_v43 }
 0x211   :  { %v7637_v6 = vpop.f32.mrf.mxu1 }
 0x212   :  { %v7638_v39 = vadd.f32 %v7637_v6, %v7636_v5  ;;  %v716_v58 = vsel %vm703_vm0, %v8198_v53, -inf }
 0x213   :  { %v7639_v7 = vpop.f32.mrf.mxu1 }
 0x215   :  { %v7640_v8 = vpop.f32.mrf.mxu1 }
 0x217   :  { %v7642_v9 = vpop.f32.mrf.mxu1 }
 0x219   :  { %v7643_v10 = vpop.f32.mrf.mxu1 }
 0x21a   :  { %v7644_v57 = vadd.f32 %v7643_v10, %v7642_v9 }
 0x21b   :  { %v7645_v11 = vpop.f32.mrf.mxu1 }
 0x21c   :  { %v8217_v4 = vadd.f32 %v7644_v57, %v8170_v43 }
 0x21d   :  { %v7646_v12 = vpop.f32.mrf.mxu1 }
 0x21e   :  { %v7647_v38 = vadd.f32 %v7646_v12, %v7645_v11  ;;  %v725_v11 = vsel %vm703_vm0, %v8217_v4, -inf }
 0x21f   :  { %v7648_v13 = vpop.f32.mrf.mxu1 }
 0x220   :  { %v8210_v63 = vadd.f32 %v7647_v38, %v8170_v43 }
 0x221   :  { %v7649_v14 = vpop.f32.mrf.mxu1 }
 0x222   :  { %v7650_v62 = vadd.f32 %v7649_v14, %v7648_v13 }
 0x223   :  { %v7651_v15 = vpop.f32.mrf.mxu1 }
 0x224   :  { %v8225_v9 = vadd.f32 %v7650_v62, %v8170_v43 }
 0x225   :  { %v7652_v18 = vpop.f32.mrf.mxu1 }
 0x226   :  { %v7653_v61 = vadd.f32 %v7652_v18, %v7651_v15  ;;  %v731_v15 = vsel %vm703_vm0, %v8225_v9, -inf }
 0x227   :  { %v7654_v22 = vpop.f32.mrf.mxu1 }
 0x228   :  { %v8220_v6 = vadd.f32 %v7653_v61, %v8170_v43 }
 0x229   :  { %v7655_v26 = vpop.f32.mrf.mxu1 }
 0x22a   :  { %v734_v12 = vsel %vm703_vm0, %v8220_v6, -inf }
 0x22b   :  { %v7657_v30 = vpop.f32.mrf.mxu1 }
 0x22d   :  { %v7658_v34 = vpop.f32.mrf.mxu1 }
 0x22e   :  { %v7659_v5 = vadd.f32 %v7658_v34, %v7657_v30 }
 0x22f   :  { %v7660_v37 = vpop.f32.mrf.mxu1 }
 0x230   :  { %v8232_v13 = vadd.f32 %v7659_v5, %v8170_v43 }
 0x231   :  { %v7661_v44 = vpop.f32.mrf.mxu1 }
 0x232   :  { %v7662_v14 = vadd.f32 %v7661_v44, %v7660_v37 }
 0x233   :  { %v7663_v56 = vpop.f32.mrf.mxu1 }
 0x28c   :  { %v8182_v16 = vpop.xlane.xlu0 %705 }
 0x28d   :  { %v752_v17 = vsub.f32 %v641_v49, %v8182_v16  ;;  %v7641_v49 = vadd.f32 %v7640_v8, %v7639_v7  ;;  %v7656_v7 = vadd.f32 %v7655_v26, %v7654_v22  ;;  %v728_v8 = vsel %vm703_vm0, %v8210_v63, -inf }
 0x28e   :  { %v8247_v26 = vadd.f32 %v7662_v14, %v8170_v43 }
 0x28f   :  { %v768_v19 = vmul.f32 1.442695, %v752_v17  ;;  %v8237_v18 = vadd.f32 %v7656_v7, %v8170_v43 }
 0x290   :  { %v8185_v20 = vpop.xlane.xlu0 %708 }
 0x291   :  { %7746 = vpow2.f32 %v768_v19  ;;  %v753_v21 = vsub.f32 %v644_v55, %v8185_v20  ;;  %v8201_v55 = vadd.f32 %v7638_v39, %v8170_v43  ;;  %v737_v22 = vsel %vm703_vm0, %v8237_v18, -inf }
 0x293   :  { %v770_v23 = vmul.f32 1.442695, %v753_v21  ;;  %v719_v3 = vsel %vm703_vm0, %v8201_v55, -inf  ;;  %v740_v21 = vsel %vm703_vm0, %v8232_v13, -inf }
 0x294   :  { %v8188_v24 = vpop.xlane.xlu1 %711 }
 0x295   :  { %7748 = vpow2.f32 %v770_v23  ;;  %v754_v25 = vsub.f32 %v649_v60, %v8188_v24  ;;  %v8207_v60 = vadd.f32 %v7641_v49, %v8170_v43 }
 0x297   :  { %v772_v27 = vmul.f32 1.442695, %v754_v25  ;;  %v722_v1 = vsel %vm703_vm0, %v8207_v60, -inf }
 0x298   :  { %v8191_v28 = vpop.xlane.xlu1 %714 }
 0x299   :  { %7750 = vpow2.f32 %v772_v27  ;;  %v755_v29 = vsub.f32 %v652_v0, %v8191_v28  ;;  %v7664_v0 = vpop.f32.mrf.mxu1 }
 0x29a   :  { %v7665_v17 = vadd.f32 %v7664_v0, %v7663_v56  ;;  %v903_v0 = vstv %s8258_s22 }
 0x29b   :  { %v774_v31 = vmul.f32 1.442695, %v755_v29  ;;  %v7666_v10 = vpop.f32.mrf.mxu1  ;;  %v743_v29 = vsel %vm703_vm0, %v8247_v26, -inf  ;;  %vm924_vm3 = vcmp.lt.s32.totalorder %v8124_v33, %v903_v0 }
 0x29c   :  { %v8244_v25 = vadd.f32 %v7665_v17, %v8170_v43 }
 0x29d   :  { %7752 = vpow2.f32 %v774_v31  ;;  %v7667_v19 = vpop.f32.mrf.mxu1 }
 0x29e   :  { %v7747_v32 = vpop.eup %7746  ;;  %v7668_v23 = vadd.f32 %v7667_v19, %v7666_v10  ;;  %v746_v27 = vsel %vm703_vm0, %v8244_v25, -inf }
 0x29f   :  { %v800_v35 = vsel %vm703_vm0, %v7747_v32, 0.0 }
 0x2a0   :  { %801 = vadd.xlane.f32.xlu0 %v800_v35  ;;  %v8254_v30 = vadd.f32 %v7668_v23, %v8170_v43  ;;  %v8263_v43 = vadd.s32 8, %v8124_v33 }
 0x2a2   :  { %v7749_v36 = vpop.eup %7748  ;;  %9558 = vst [vmem:[#allocation15_spill] sm:$0xff] %v8254_v30  ;;  %v749_v31 = vsel %vm703_vm0, %v8254_v30, -inf  ;;  %9559 = vst [vmem:[#allocation16_spill] sm:$0xff] %v8263_v43  ;;  %vm925_vm4 = vcmp.lt.s32.totalorder %v8263_v43, %v903_v0 }
 0x2a3   :  { %v803_v41 = vsel %vm703_vm0, %v7749_v36, 0.0  ;;  %v900_v36 = vstv %s899_s5 }
 0x2a4   :  { %804 = vadd.xlane.f32.xlu1 %v803_v41  ;;  %vm922_vm1 = vcmp.lt.s32.totalorder %v8124_v33, %v900_v36  ;;  %vm923_vm2 = vcmp.lt.s32.totalorder %v8263_v43, %v900_v36 }
 0x2a5   :  { %v6821_v56 = vsel %vm922_vm1, 1.0, %v8009_v2  ;;  %v6822_v62 = vsel %vm923_vm2, 1.0, %v8009_v2 }
 0x2a6   :  { %v7751_v42 = vpop.eup %7750 }
 0x2a7   :  { %v806_v50 = vsel %vm703_vm0, %v7751_v42, 0.0 }
 0x2a8   :  { %807 = vadd.xlane.f32.xlu0 %v806_v50 }
 0x2aa   :  { %v7753_v54 = vpop.eup %7752 }
 0x2ab   :  { %v809_v59 = vsel %vm703_vm0, %v7753_v54, 0.0 }
 0x2ac   :  { %717 = vmax.xlane.f32.xlu0 %v716_v58  ;;  %810 = vadd.xlane.f32.xlu1 %v809_v59 }
 0x2b0   :  { %723 = vmax.xlane.f32.xlu0 %v722_v1  ;;  %720 = vmax.xlane.f32.xlu1 %v719_v3 }
 0x2b4   :  { %729 = vmax.xlane.f32.xlu0 %v728_v8  ;;  %726 = vmax.xlane.f32.xlu1 %v725_v11 }
 0x2b8   :  { %735 = vmax.xlane.f32.xlu0 %v734_v12  ;;  %732 = vmax.xlane.f32.xlu1 %v731_v15 }
 0x2bc   :  { %741 = vmax.xlane.f32.xlu0 %v740_v21  ;;  %738 = vmax.xlane.f32.xlu1 %v737_v22  ;;  %v6823_v22 = vsel %vm924_vm3, 1.0, %v8009_v2 }
 0x2c0   :  { %747 = vmax.xlane.f32.xlu0 %v746_v27  ;;  %744 = vmax.xlane.f32.xlu1 %v743_v29  ;;  %v6824_v29 = vsel %vm925_vm4, 1.0, %v8009_v2 }
 0x2c4   :  { %750 = vmax.xlane.f32.xlu1 %v749_v31 }
 0x329   :  { %v802_v32 = vpop.xlane.xlu0 %801 }
 0x32a   :  { %7754 = vlog2.f32 %v802_v32 }
 0x32d   :  { %v805_v34 = vpop.xlane.xlu1 %804 }
 0x32e   :  { %7756 = vlog2.f32 %v805_v34 }
 0x331   :  { %v808_v35 = vpop.xlane.xlu0 %807 }
 0x332   :  { %7758 = vlog2.f32 %v808_v35 }
 0x335   :  { %v811_v37 = vpop.xlane.xlu1 %810  ;;  %v8260_v40 = vpop.xlane.xlu0 %717 }
 0x336   :  { %7760 = vlog2.f32 %v811_v37  ;;  %v756_v41 = vsub.f32 %v8198_v53, %v8260_v40 }
 0x337   :  { %v7755_v42 = vpop.eup %7754 }
 0x338   :  { %v849_v39 = vmul.f32 0.6931472, %v7755_v42  ;;  %v776_v44 = vmul.f32 1.442695, %v756_v41 }
 0x339   :  { %v8268_v49 = vpop.xlane.xlu1 %720  ;;  %v8270_v50 = vpop.xlane.xlu0 %723 }
 0x33a   :  { %7762 = vpow2.f32 %v776_v44  ;;  %v757_v38 = vsub.f32 %v8201_v55, %v8268_v49  ;;  %v758_v54 = vsub.f32 %v8207_v60, %v8270_v50  ;;  %v880_v57 = vadd.f32 %v849_v39, %v8182_v16 }
 0x33b   :  { %v7757_v53 = vpop.eup %7756 }
 0x33c   :  { %v851_v58 = vmul.f32 0.6931472, %v7757_v53  ;;  %v778_v59 = vmul.f32 1.442695, %v757_v38  ;;  %v780_v61 = vmul.f32 1.442695, %v758_v54  ;;  %v8290_v7 = vadd.f32 %v6821_v56, %v880_v57 }
 0x33d   :  { %v8281_v1 = vpop.xlane.xlu1 %726  ;;  %v8283_v3 = vpop.xlane.xlu0 %729 }
 0x33e   :  { %v881_v55 = vadd.f32 %v851_v58, %v8185_v20  ;;  %7764 = vpow2.f32 %v778_v59  ;;  %v759_v60 = vsub.f32 %v8217_v4, %v8281_v1  ;;  %v760_v5 = vsub.f32 %v8210_v63, %v8283_v3 }
 0x33f   :  { %v7759_v16 = vpop.eup %7758  ;;  %7766 = vpow2.f32 %v780_v61 }
 0x340   :  { %v8292_v8 = vadd.f32 %v6822_v62, %v881_v55  ;;  %v853_v10 = vmul.f32 0.6931472, %v7759_v16  ;;  %v782_v11 = vmul.f32 1.442695, %v759_v60  ;;  %v784_v12 = vmul.f32 1.442695, %v760_v5 }
 0x341   :  { %v8295_v14 = vpop.xlane.xlu1 %732  ;;  %v8297_v20 = vpop.xlane.xlu0 %735 }
 0x342   :  { %v986_v4 = vmax.f32 %v8290_v7, %v8292_v8  ;;  %7768 = vpow2.f32 %v782_v11  ;;  %v761_v63 = vsub.f32 %v8225_v9, %v8295_v14  ;;  %v882_v17 = vadd.f32 %v853_v10, %v8188_v24 }
 0x343   :  { %v7761_v15 = vpop.eup %7760  ;;  %7770 = vpow2.f32 %v784_v12  ;;  %v762_v19 = vsub.f32 %v8220_v6, %v8297_v20 }
 0x344   :  { %v987_v21 = vrot.slane %v986_v4, 4  ;;  %v855_v23 = vmul.f32 0.6931472, %v7761_v15  ;;  %v786_v27 = vmul.f32 1.442695, %v761_v63  ;;  %v972_v36 = vadd.f32 %v6823_v22, %v882_v17 }
 0x345   :  { %v788_v31 = vmul.f32 1.442695, %v762_v19  ;;  %v8309_v32 = vpop.xlane.xlu1 %738  ;;  %v8311_v34 = vpop.xlane.xlu0 %741 }
 0x346   :  { %v988_v9 = vmax.f32 %v986_v4, %v987_v21  ;;  %v883_v35 = vadd.f32 %v855_v23, %v8191_v28  ;;  %7772 = vpow2.f32 %v786_v27  ;;  %v763_v24 = vsub.f32 %v8237_v18, %v8309_v32 }
 0x347   :  { %v7763_v6 = vpop.eup %7762  ;;  %7774 = vpow2.f32 %v788_v31  ;;  %v764_v37 = vsub.f32 %v8232_v13, %v8311_v34 }
 0x348   :  { %v989_v41 = vrot.slane %v988_v9, 2  ;;  %v973_v42 = vadd.f32 %v6824_v29, %v883_v35  ;;  %v790_v39 = vmul.f32 1.442695, %v763_v24  ;;  %v812_v44 = vsel %vm703_vm0, %v7763_v6, 0.0 }
 0x349   :  { %v792_v38 = vmul.f32 1.442695, %v764_v37  ;;  %v8319_v54 = vpop.xlane.xlu1 %744  ;;  %813 = vadd.xlane.f32.xlu0 %v812_v44 }
 0x34a   :  { %v990_v28 = vmax.f32 %v988_v9, %v989_v41  ;;  %v993_v53 = vmax.f32 %v972_v36, %v973_v42  ;;  %7776 = vpow2.f32 %v790_v39  ;;  %v765_v18 = vsub.f32 %v8247_v26, %v8319_v54 }
 0x34b   :  { %v7765_v56 = vpop.eup %7764  ;;  %7778 = vpow2.f32 %v792_v38 }
 0x34c   :  { %v7767_v57 = vpop.eup %7766  ;;  %v991_v58 = vrot.slane %v990_v28, 1  ;;  %v994_v13 = vrot.slane %v993_v53, 4  ;;  %v794_v59 = vmul.f32 1.442695, %v765_v18  ;;  %v815_v61 = vsel %vm703_vm0, %v7765_v56, 0.0 }
 0x34d   :  { %816 = vadd.xlane.f32.xlu1 %v815_v61  ;;  %v818_v62 = vsel %vm703_vm0, %v7767_v57, 0.0 }
 0x34e   :  { %v992_v0 = vmax.f32 %v990_v28, %v991_v58  ;;  %v995_v55 = vmax.f32 %v993_v53, %v994_v13  ;;  %7780 = vpow2.f32 %v794_v59  ;;  %819 = vadd.xlane.f32.xlu0 %v818_v62 }
 0x34f   :  { %v7769_v60 = vpop.eup %7768 }
 0x350   :  { %v7771_v5 = vpop.eup %7770  ;;  %v1042_v16 = vsub.f32 %v8290_v7, %v992_v0  ;;  %v1043_v26 = vsub.f32 %v8292_v8, %v992_v0  ;;  %v996_v10 = vrot.slane %v995_v55, 2  ;;  %v821_v11 = vsel %vm703_vm0, %v7769_v60, 0.0 }
 0x351   :  { %v824_v12 = vsel %vm703_vm0, %v7771_v5, 0.0  ;;  %822 = vadd.xlane.f32.xlu1 %v821_v11 }
 0x352   :  { %v1058_v4 = vmul.f32 1.442695, %v1042_v16  ;;  %v1060_v63 = vmul.f32 1.442695, %v1043_v26  ;;  %v997_v15 = vmax.f32 %v995_v55, %v996_v10  ;;  %825 = vadd.xlane.f32.xlu0 %v824_v12  ;;  %v7890_v10 = vld [vmem:[#allocation4 + $0x8] sm:$0xff]  ;;  %v7891_v12 = vld [vmem:[#allocation4 + $0x18] sm:$0xff] }
 0x353   :  { %v7773_v17 = vpop.eup %7772 }
 0x354   :  { %v7775_v19 = vpop.eup %7774  ;;  %7782 = vpow2.f32 %v1058_v4  ;;  %v998_v21 = vrot.slane %v997_v15, 1  ;;  %v827_v22 = vsel %vm703_vm0, %v7773_v17, 0.0 }
 0x355   :  { %7784 = vpow2.f32 %v1060_v63  ;;  %v830_v7 = vsel %vm703_vm0, %v7775_v19, 0.0  ;;  %828 = vadd.xlane.f32.xlu1 %v827_v22 }
 0x356   :  { %v999_v8 = vmax.f32 %v997_v15, %v998_v21  ;;  %831 = vadd.xlane.f32.xlu0 %v830_v7 }
 0x357   :  { %v7777_v23 = vpop.eup %7776 }
 0x358   :  { %v7779_v27 = vpop.eup %7778  ;;  %v1044_v29 = vsub.f32 %v972_v36, %v999_v8  ;;  %v1045_v31 = vsub.f32 %v973_v42, %v999_v8  ;;  %v833_v9 = vsel %vm703_vm0, %v7777_v23, 0.0 }
 0x359   :  { %v836_v35 = vsel %vm703_vm0, %v7779_v27, 0.0  ;;  %834 = vadd.xlane.f32.xlu1 %v833_v9 }
 0x35a   :  { %v1062_v24 = vmul.f32 1.442695, %v1044_v29  ;;  %v1064_v6 = vmul.f32 1.442695, %v1045_v31  ;;  %837 = vadd.xlane.f32.xlu0 %v836_v35 }
 0x35b   :  { %v7781_v37 = vpop.eup %7780 }
 0x35c   :  { %7786 = vpow2.f32 %v1062_v24  ;;  %v839_v41 = vsel %vm703_vm0, %v7781_v37, 0.0 }
 0x35d   :  { %7788 = vpow2.f32 %v1064_v6  ;;  %840 = vadd.xlane.f32.xlu1 %v839_v41 }
 0x361   :  { %v7783_v39 = vpop.eup %7782 }
 0x362   :  { %v7785_v44 = vpop.eup %7784 }
 0x363   :  { %v1090_v38 = vadd.f32 %v7785_v44, %v7783_v39 }
 0x365   :  { %v1091_v28 = vrot.slane %v1090_v38, 4 }
 0x367   :  { %v1092_v36 = vadd.f32 %v1091_v28, %v1090_v38 }
 0x369   :  { %v7787_v42 = vpop.eup %7786  ;;  %v1093_v53 = vrot.slane %v1092_v36, 2 }
 0x36a   :  { %v7789_v18 = vpop.eup %7788 }
 0x36b   :  { %v1094_v56 = vadd.f32 %v1093_v53, %v1092_v36  ;;  %v1097_v57 = vadd.f32 %v7789_v18, %v7787_v42 }
 0x36d   :  { %v1095_v58 = vrot.slane %v1094_v56, 1  ;;  %v1098_v13 = vrot.slane %v1097_v57, 4 }
 0x36f   :  { %v1096_v59 = vadd.f32 %v1095_v58, %v1094_v56  ;;  %v1099_v61 = vadd.f32 %v1098_v13, %v1097_v57 }
 0x371   :  { %7790 = vrcp.f32 %v1096_v59  ;;  %v1100_v62 = vrot.slane %v1099_v61, 2 }
 0x373   :  { %v1101_v0 = vadd.f32 %v1100_v62, %v1099_v61 }
 0x375   :  { %v1102_v55 = vrot.slane %v1101_v0, 1 }
 0x377   :  { %v1103_v60 = vadd.f32 %v1102_v55, %v1101_v0 }
 0x379   :  { %7792 = vrcp.f32 %v1103_v60 }
 0x37e   :  { %v7791_v5 = vpop.eup %7790 }
 0x37f   :  { %v1147_v16 = vmul.f32 %v7791_v5, %v7783_v39  ;;  %v1148_v26 = vmul.f32 %v7791_v5, %v7785_v44 }
 0x381   :  { %v1171_v11 = vmul.f32 %v7890_v10, %v1147_v16  ;;  %v1173_v4 = vmul.f32 %v7891_v12, %v1148_v26  ;;  %v1170_v63 = vmul.f32 %v1147_v16, %v8088_v45  ;;  %v1172_v15 = vmul.f32 %v1148_v26, %v8090_v46 }
 0x383   :  { %v1209_v17 = vadd.f32 %v1173_v4, %v1171_v11  ;;  %v1202_v19 = vadd.f32 %v1172_v15, %v1170_v63 }
 0x385   :  { %v1210_v21 = vrot.slane %v1209_v17, 4  ;;  %v1203_v22 = vrot.slane %v1202_v19, 4 }
 0x386   :  { %v7793_v7 = vpop.eup %7792 }
 0x387   :  { %v1211_v8 = vadd.f32 %v1210_v21, %v1209_v17  ;;  %v1204_v23 = vadd.f32 %v1203_v22, %v1202_v19  ;;  %v1150_v27 = vmul.f32 %v7793_v7, %v7787_v42  ;;  %v1151_v29 = vmul.f32 %v7793_v7, %v7789_v18  ;;  %v7894_v7 = vld [vmem:[#allocation4 + $0x28] sm:$0xff] }
 0x389   :  { %v1212_v31 = vrot.slane %v1211_v8, 2  ;;  %v1205_v9 = vrot.slane %v1204_v23, 2  ;;  %v1175_v35 = vmul.f32 %v1150_v27, %v8092_v47  ;;  %v1177_v24 = vmul.f32 %v1151_v29, %v8094_v48  ;;  %v7892_v48 = vld [vmem:[#allocation4] sm:$0xff] }
 0x38a   :  { %v1174_v6 = vmul.f32 %v1150_v27, %v8100_v51  ;;  %v1176_v45 = vmul.f32 %v1151_v29, %v8102_v52  ;;  %v7893_v52 = vld [vmem:[#allocation4 + $0x10] sm:$0xff] }
 0x38b   :  { %v1213_v46 = vadd.f32 %v1212_v31, %v1211_v8  ;;  %v1206_v37 = vadd.f32 %v1205_v9, %v1204_v23  ;;  %v1223_v41 = vadd.f32 %v1177_v24, %v1175_v35  ;;  %v7895_v23 = vld [vmem:[#allocation4 + $0x38] sm:$0xff]  ;;  %v7896_v9 = vld [vmem:[#allocation4 + $0x20] sm:$0xff]  ;;  %v7897_v24 = vld [vmem:[#allocation4 + $0x30] sm:$0xff] }
 0x38c   :  { %v1216_v39 = vadd.f32 %v1176_v45, %v1174_v6 }
 0x38d   :  { %v1214_v44 = vrot.slane %v1213_v46, 1  ;;  %v1207_v38 = vrot.slane %v1206_v37, 1  ;;  %v1224_v28 = vrot.slane %v1223_v41, 4 }
 0x38e   :  { %v1217_v36 = vrot.slane %v1216_v39, 4 }
 0x38f   :  { %v1215_v42 = vadd.f32 %v1214_v44, %v1213_v46  ;;  %v1208_v53 = vadd.f32 %v1207_v38, %v1206_v37  ;;  %v1225_v18 = vadd.f32 %v1224_v28, %v1223_v41 }
 0x390   :  { %v1218_v56 = vadd.f32 %v1217_v36, %v1216_v39 }
 0x391   :  { %v8340_v57 = vsub.f32 %v7890_v10, %v1215_v42  ;;  %v8342_v47 = vsub.f32 %v7891_v12, %v1215_v42  ;;  %v8344_v51 = vsub.f32 %v7892_v48, %v1208_v53  ;;  %v8346_v58 = vsub.f32 %v7893_v52, %v1208_v53 }
 0x392   :  { %v1226_v13 = vrot.slane %v1225_v18, 2  ;;  %v1219_v59 = vrot.slane %v1218_v56, 2 }
 0x393   :  { %v8349_v61 = vmul.f32 %v8340_v57, %v1147_v16  ;;  %v8352_v62 = vmul.f32 %v8342_v47, %v1148_v26  ;;  %v8355_v0 = vmul.f32 %v8344_v51, %v1147_v16  ;;  %v8358_v55 = vmul.f32 %v8346_v58, %v1148_v26 }
 0x394   :  { %v1227_v60 = vadd.f32 %v1226_v13, %v1225_v18  ;;  %v1220_v5 = vadd.f32 %v1219_v59, %v1218_v56 }
 0x395   :  { %v1379_v10 = vmul.f32 %v8349_v61, %v8340_v57  ;;  %v1381_v11 = vmul.f32 %v8352_v62, %v8342_v47  ;;  %v1378_v12 = vmul.f32 %v8355_v0, %v8344_v51  ;;  %v1380_v4 = vmul.f32 %v8358_v55, %v8346_v58 }
 0x396   :  { %v1228_v63 = vrot.slane %v1227_v60, 1  ;;  %v1221_v16 = vrot.slane %v1220_v5, 1 }
 0x397   :  { %v1417_v15 = vadd.f32 %v1381_v11, %v1379_v10  ;;  %v1410_v17 = vadd.f32 %v1380_v4, %v1378_v12 }
 0x398   :  { %v1229_v26 = vadd.f32 %v1228_v63, %v1227_v60  ;;  %v1222_v19 = vadd.f32 %v1221_v16, %v1220_v5 }
 0x399   :  { %v1418_v21 = vrot.slane %v1417_v15, 4  ;;  %v1411_v22 = vrot.slane %v1410_v17, 4 }
 0x39a   :  { %v8368_v8 = vsub.f32 %v7894_v7, %v1229_v26  ;;  %v8370_v31 = vsub.f32 %v7895_v23, %v1229_v26  ;;  %v8372_v35 = vsub.f32 %v7896_v9, %v1222_v19  ;;  %v8374_v6 = vsub.f32 %v7897_v24, %v1222_v19 }
 0x39b   :  { %v1419_v45 = vadd.f32 %v1418_v21, %v1417_v15  ;;  %v1412_v46 = vadd.f32 %v1411_v22, %v1410_v17 }
 0x39c   :  { %v1351_v37 = vmul.f32 %v8368_v8, %v1150_v27  ;;  %v1353_v41 = vmul.f32 %v8370_v31, %v1151_v29  ;;  %v1350_v39 = vmul.f32 %v8372_v35, %v1150_v27  ;;  %v8380_v44 = vmul.f32 %v8374_v6, %v1151_v29 }
 0x39d   :  { %v1420_v38 = vrot.slane %v1419_v45, 2  ;;  %v1413_v28 = vrot.slane %v1412_v46, 2 }
 0x39e   :  { %v1383_v36 = vmul.f32 %v1351_v37, %v8368_v8  ;;  %v1385_v42 = vmul.f32 %v1353_v41, %v8370_v31  ;;  %v1382_v53 = vmul.f32 %v1350_v39, %v8372_v35  ;;  %v1384_v18 = vmul.f32 %v8380_v44, %v8374_v6 }
 0x39f   :  { %v1421_v56 = vadd.f32 %v1420_v38, %v1419_v45  ;;  %v1414_v48 = vadd.f32 %v1413_v28, %v1412_v46 }
 0x3a0   :  { %v1431_v52 = vadd.f32 %v1385_v42, %v1383_v36  ;;  %v1424_v13 = vadd.f32 %v1384_v18, %v1382_v53 }
 0x3a1   :  { %v1422_v59 = vrot.slane %v1421_v56, 1  ;;  %v1415_v27 = vrot.slane %v1414_v48, 1 }
 0x3a2   :  { %v1432_v60 = vrot.slane %v1431_v52, 4  ;;  %v1425_v29 = vrot.slane %v1424_v13, 4 }
 0x3a3   :  { %v1423_v5 = vadd.f32 %v1422_v59, %v1421_v56  ;;  %v1416_v10 = vadd.f32 %v1415_v27, %v1414_v48  ;;  %v906_v27 = vstv %s6815_s23 }
 0x3a4   :  { %v1433_v11 = vadd.f32 %v1432_v60, %v1431_v52  ;;  %v1426_v12 = vadd.f32 %v1425_v29, %v1424_v13  ;;  %vm926_vm5 = vcmp.lt.s32.totalorder %v8124_v33, %v906_v27  ;;  %vm927_vm6 = vcmp.lt.s32.totalorder %v8263_v43, %v906_v27 }
 0x3a5   :  { %v1523_v4 = vadd.f32 1e-09, %v1423_v5  ;;  %v1522_v63 = vadd.f32 1e-09, %v1416_v10 }
 0x3a6   :  { %v1434_v16 = vrot.slane %v1433_v11, 2  ;;  %v1427_v15 = vrot.slane %v1426_v12, 2 }
 0x3a7   :  { %7794 = vrsqrt.f32 %v1523_v4 }
 0x3a8   :  { %7796 = vrsqrt.f32 %v1522_v63  ;;  %v1435_v17 = vadd.f32 %v1434_v16, %v1433_v11  ;;  %v1428_v26 = vadd.f32 %v1427_v15, %v1426_v12  ;;  %v909_v63 = vstv %s6816_s24 }
 0x3a9   :  { %v6825_v16 = vsel %vm926_vm5, 1.0, %v8009_v2  ;;  %v6826_v15 = vsel %vm927_vm6, 1.0, %v8009_v2  ;;  %vm928_vm7 = vcmp.lt.s32.totalorder %v8124_v33, %v909_v63  ;;  %vm929_vm8 = vcmp.lt.s32.totalorder %v8263_v43, %v909_v63 }
 0x3aa   :  { %v1436_v19 = vrot.slane %v1435_v17, 1  ;;  %v1429_v21 = vrot.slane %v1428_v26, 1 }
 0x3ac   :  { %v1437_v22 = vadd.f32 %v1436_v19, %v1435_v17  ;;  %v1430_v7 = vadd.f32 %v1429_v21, %v1428_v26 }
 0x3ae   :  { %v1525_v23 = vadd.f32 1e-09, %v1437_v22  ;;  %v1524_v9 = vadd.f32 1e-09, %v1430_v7  ;;  %v912_v7 = vstv %s8421_s25 }
 0x3af   :  { %vm930_vm9 = vcmp.lt.s32.totalorder %v8124_v33, %v912_v7  ;;  %vm931_vm10 = vcmp.lt.s32.totalorder %v8263_v43, %v912_v7 }
 0x3b0   :  { %7798 = vrsqrt.f32 %v1525_v23 }
 0x3b1   :  { %7800 = vrsqrt.f32 %v1524_v9 }
 0x3b4   :  { %v7795_v24 = vpop.eup %7794 }
 0x3b5   :  { %v7797_v45 = vpop.eup %7796  ;;  %v1589_v46 = vmul.f32 %v7795_v24, %v8342_v47  ;;  %v8389_v38 = vmul.f32 %v7795_v24, %v8349_v61  ;;  %v8392_v28 = vmul.f32 %v7795_v24, %v8352_v62  ;;  %v1587_v53 = vmul.f32 %v7795_v24, %v8340_v57 }
 0x3b6   :  { %v1554_v36 = vmul.f32 %v7797_v45, %v8355_v0  ;;  %v1588_v42 = vmul.f32 %v7797_v45, %v8346_v58  ;;  %v1586_v18 = vmul.f32 %v7797_v45, %v8344_v51  ;;  %v1556_v47 = vmul.f32 %v7797_v45, %v8358_v55 }
 0x3b7   :  { %1807 = vmatprep.subr.mxu1 %v1589_v46  ;;  %v915_v45 = vstv %s8423_s26  ;;  %v6827_v46 = vsel %vm928_vm7, 1.0, %v8009_v2 }
 0x3b8   :  { %1618 = vxpose.xlu0.b32.start [1/2] (short) %v1554_v36, 128  ;;  %1808 = vmatpush1.msra.mxu1 %v1588_v42  ;;  %v6828_v36 = vsel %vm929_vm8, 1.0, %v8009_v2  ;;  %vm8450_vm11 = vcmp.lt.s32.totalorder %v8124_v33, %v915_v45  ;;  %vm933_vm12 = vcmp.lt.s32.totalorder %v8263_v43, %v915_v45 }
 0x3b9   :  { %1809 = vmatprep.subr.mxu1 %v1587_v53 }
 0x3ba   :  { %1810 = vmatpush1.msra.mxu1 %v1586_v18 }
 0x3bc   :  { %1619 = vxpose.xlu0.b32.end [2/2] (short) %v1556_v47, 128 }
 0x3bd   :  { %v7799_v61 = vpop.eup %7798 }
 0x3be   :  { %v7801_v56 = vpop.eup %7800  ;;  %v1593_v62 = vmul.f32 %v7799_v61, %v8370_v31  ;;  %v8400_v48 = vmul.f32 %v7799_v61, %v1351_v37  ;;  %v8402_v0 = vmul.f32 %v7799_v61, %v1353_v41  ;;  %v8408_v51 = vmul.f32 %v7799_v61, %v8368_v8  ;;  %v8419_v37 = vpop.xlane.xlu1 %750 }
 0x3bf   :  { %v1558_v58 = vmul.f32 %v7801_v56, %v1350_v39  ;;  %v8405_v57 = vmul.f32 %v7801_v56, %v8374_v6  ;;  %v8412_v55 = vmul.f32 %v7801_v56, %v8372_v35  ;;  %v1560_v31 = vmul.f32 %v7801_v56, %v8380_v44  ;;  %v8417_v6 = vpop.xlane.xlu0 %747  ;;  %9560 = vst [vmem:[#allocation17_spill] sm:$0xff] %v8419_v37 }
 0x3c0   :  { %2224 = vmatprep.subr.mxu0 %v1593_v62  ;;  %7669 = vmatprep.subr.mxu1 %v1593_v62  ;;  %v918_v61 = vstv %s8428_s27 }
 0x3c1   :  { %2036 = vxpose.xlu1.b32.start [1/2] (short) %v1558_v58, 128  ;;  %2225 = vmatpush1.msra.mxu0 %v8405_v57  ;;  %vm8471_vm13 = vcmp.lt.s32.totalorder %v8124_v33, %v918_v61  ;;  %vm935_vm14 = vcmp.lt.s32.totalorder %v8263_v43, %v918_v61 }
 0x3c2   :  { %2226 = vmatprep.subr.mxu0 %v8408_v51 }
 0x3c3   :  { %2227 = vmatpush1.msra.mxu0 %v8412_v55 }
 0x3c5   :  { %2037 = vxpose.xlu1.b32.end [2/2] (short) %v1560_v31, 128 }
 0x3d2   :  { %v814_v41 = vpop.xlane.xlu0 %813 }
 0x3d3   :  { %7802 = vlog2.f32 %v814_v41 }
 0x3d6   :  { %v817_v8 = vpop.xlane.xlu1 %816 }
 0x3d7   :  { %7804 = vlog2.f32 %v817_v8  ;;  %v820_v39 = vpop.xlane.xlu0 %819  ;;  %v6829_v8 = vsel %vm930_vm9, 1.0, %v8009_v2 }
 0x3d8   :  { %7806 = vlog2.f32 %v820_v39  ;;  %v6830_v39 = vsel %vm931_vm10, 1.0, %v8009_v2 }
 0x3da   :  { %v823_v35 = vpop.xlane.xlu1 %822 }
 0x3db   :  { %v826_v52 = vpop.xlane.xlu0 %825  ;;  %7808 = vlog2.f32 %v823_v35 }
 0x3dc   :  { %7810 = vlog2.f32 %v826_v52 }
 0x3de   :  { %v829_v13 = vpop.xlane.xlu1 %828 }
 0x3df   :  { %v832_v59 = vpop.xlane.xlu0 %831  ;;  %7812 = vlog2.f32 %v829_v13 }
 0x3e0   :  { %v7803_v44 = vpop.eup %7802  ;;  %7814 = vlog2.f32 %v832_v59 }
 0x3e1   :  { %v857_v60 = vmul.f32 0.6931472, %v7803_v44 }
 0x3e2   :  { %v835_v29 = vpop.xlane.xlu1 %834 }
 0x3e3   :  { %v838_v5 = vpop.xlane.xlu0 %837  ;;  %7816 = vlog2.f32 %v835_v29  ;;  %v884_v12 = vadd.f32 %v857_v60, %v8260_v40 }
 0x3e4   :  { %v7805_v10 = vpop.eup %7804  ;;  %7818 = vlog2.f32 %v838_v5 }
 0x3e5   :  { %v7807_v11 = vpop.eup %7806  ;;  %v859_v4 = vmul.f32 0.6931472, %v7805_v10  ;;  %v8435_v21 = vadd.f32 %v6825_v16, %v884_v12 }
 0x3e6   :  { %v861_v17 = vmul.f32 0.6931472, %v7807_v11  ;;  %v841_v19 = vpop.xlane.xlu1 %840 }
 0x3e7   :  { %v885_v26 = vadd.f32 %v859_v4, %v8268_v49  ;;  %7820 = vlog2.f32 %v841_v19  ;;  %v6832_v4 = vsel %vm933_vm12, 1.0, %v8009_v2 }
 0x3e8   :  { %v7809_v40 = vpop.eup %7808  ;;  %v886_v9 = vadd.f32 %v861_v17, %v8270_v50 }
 0x3e9   :  { %v8437_v22 = vadd.f32 %v6826_v15, %v885_v26  ;;  %v7811_v23 = vpop.eup %7810  ;;  %v863_v24 = vmul.f32 0.6931472, %v7809_v40  ;;  %v6833_v40 = vsel %vm8471_vm13, 1.0, %v8009_v2 }
 0x3ea   :  { %v865_v42 = vmul.f32 0.6931472, %v7811_v23  ;;  %v8455_v62 = vadd.f32 %v6827_v46, %v886_v9 }
 0x3eb   :  { %v1000_v49 = vmax.f32 %v8435_v21, %v8437_v22  ;;  %v887_v53 = vadd.f32 %v863_v24, %v8281_v1 }
 0x3ec   :  { %v7813_v18 = vpop.eup %7812  ;;  %v888_v31 = vadd.f32 %v865_v42, %v8283_v3  ;;  %v6831_v3 = vsel %vm8450_vm11, 1.0, %v8009_v2 }
 0x3ed   :  { %v1001_v47 = vrot.slane %v1000_v49, 4  ;;  %v7815_v56 = vpop.eup %7814  ;;  %v8457_v58 = vadd.f32 %v6828_v36, %v887_v53  ;;  %v867_v1 = vmul.f32 0.6931472, %v7813_v18 }
 0x3ee   :  { %v869_v35 = vmul.f32 0.6931472, %v7815_v56  ;;  %v978_v10 = vadd.f32 %v6829_v8, %v888_v31 }
 0x3ef   :  { %v1002_v41 = vmax.f32 %v1000_v49, %v1001_v47  ;;  %v1007_v52 = vmax.f32 %v8455_v62, %v8457_v58  ;;  %v889_v13 = vadd.f32 %v867_v1, %v8295_v14 }
 0x3f0   :  { %v7817_v59 = vpop.eup %7816  ;;  %v890_v27 = vadd.f32 %v869_v35, %v8297_v20 }
 0x3f1   :  { %v1003_v44 = vrot.slane %v1002_v41, 2  ;;  %v7819_v29 = vpop.eup %7818  ;;  %v1008_v5 = vrot.slane %v1007_v52, 4  ;;  %v979_v11 = vadd.f32 %v6830_v39, %v889_v13  ;;  %v871_v14 = vmul.f32 0.6931472, %v7817_v59 }
 0x3f2   :  { %v873_v63 = vmul.f32 0.6931472, %v7819_v29  ;;  %v980_v19 = vadd.f32 %v6831_v3, %v890_v27 }
 0x3f3   :  { %v1004_v12 = vmax.f32 %v1002_v41, %v1003_v44  ;;  %v1009_v16 = vmax.f32 %v1007_v52, %v1008_v5  ;;  %v1014_v15 = vmax.f32 %v978_v10, %v979_v11  ;;  %v891_v17 = vadd.f32 %v871_v14, %v8309_v32 }
 0x3f4   :  { %v7821_v20 = vpop.eup %7820  ;;  %v892_v7 = vadd.f32 %v873_v63, %v8311_v34  ;;  %v6834_v32 = vsel %vm935_vm14, 1.0, %v8009_v2 }
 0x3f5   :  { %v1005_v26 = vrot.slane %v1004_v12, 1  ;;  %1650 = vxpose.xlu0.b32.start [1/2] (short) %v8389_v38, 128  ;;  %v1010_v23 = vrot.slane %v1009_v16, 2  ;;  %v1015_v9 = vrot.slane %v1014_v15, 4  ;;  %v981_v24 = vadd.f32 %v6832_v4, %v891_v17 }
 0x3f6   :  { %v875_v45 = vmul.f32 0.6931472, %v7821_v20  ;;  %v982_v50 = vadd.f32 %v6833_v40, %v892_v7 }
 0x3f7   :  { %v1006_v49 = vmax.f32 %v1004_v12, %v1005_v26  ;;  %v1011_v46 = vmax.f32 %v1009_v16, %v1010_v23  ;;  %v1016_v36 = vmax.f32 %v1014_v15, %v1015_v9  ;;  %v1021_v42 = vmax.f32 %v980_v19, %v981_v24 }
 0x3f8   :  { %v893_v53 = vadd.f32 %v875_v45, %v8319_v54 }
 0x3f9   :  { %v1046_v18 = vsub.f32 %v8435_v21, %v1006_v49  ;;  %v1047_v47 = vsub.f32 %v8437_v22, %v1006_v49  ;;  %1651 = vxpose.xlu0.b32.end [2/2] (short) %v8392_v28, 128  ;;  %v1012_v34 = vrot.slane %v1011_v46, 1  ;;  %v1017_v38 = vrot.slane %v1016_v36, 2 }
 0x3fa   :  { %v1022_v61 = vrot.slane %v1021_v42, 4  ;;  %v983_v56 = vadd.f32 %v6834_v32, %v893_v53 }
 0x3fb   :  { %v1066_v31 = vmul.f32 1.442695, %v1046_v18  ;;  %v1068_v1 = vmul.f32 1.442695, %v1047_v47  ;;  %v1013_v41 = vmax.f32 %v1011_v46, %v1012_v34  ;;  %v1018_v8 = vmax.f32 %v1016_v36, %v1017_v38 }
 0x3fc   :  { %v1023_v39 = vmax.f32 %v1021_v42, %v1022_v61  ;;  %v1028_v35 = vmax.f32 %v982_v50, %v983_v56 }
 0x3fd   :  { %7822 = vpow2.f32 %v1066_v31  ;;  %v1048_v54 = vsub.f32 %v8455_v62, %v1013_v41  ;;  %v1049_v21 = vsub.f32 %v8457_v58, %v1013_v41  ;;  %v1019_v22 = vrot.slane %v1018_v8, 1 }
 0x3fe   :  { %7824 = vpow2.f32 %v1068_v1  ;;  %2068 = vxpose.xlu1.b32.start [1/2] (short) %v8400_v48, 128  ;;  %v1024_v28 = vrot.slane %v1023_v39, 2  ;;  %v1029_v52 = vrot.slane %v1028_v35, 4 }
 0x3ff   :  { %v1070_v13 = vmul.f32 1.442695, %v1048_v54  ;;  %v1072_v59 = vmul.f32 1.442695, %v1049_v21  ;;  %v1020_v44 = vmax.f32 %v1018_v8, %v1019_v22 }
 0x400   :  { %v1025_v3 = vmax.f32 %v1023_v39, %v1024_v28  ;;  %v1030_v27 = vmax.f32 %v1028_v35, %v1029_v52 }
 0x401   :  { %7826 = vpow2.f32 %v1070_v13  ;;  %v1050_v60 = vsub.f32 %v978_v10, %v1020_v44  ;;  %v1051_v29 = vsub.f32 %v979_v11, %v1020_v44 }
 0x402   :  { %2069 = vxpose.xlu1.b32.end [2/2] (short) %v8402_v0, 128  ;;  %7828 = vpow2.f32 %v1072_v59  ;;  %v1026_v5 = vrot.slane %v1025_v3, 1  ;;  %v1031_v62 = vrot.slane %v1030_v27, 2 }
 0x403   :  { %v1074_v14 = vmul.f32 1.442695, %v1050_v60  ;;  %v1076_v58 = vmul.f32 1.442695, %v1051_v29 }
 0x404   :  { %v1027_v12 = vmax.f32 %v1025_v3, %v1026_v5  ;;  %v1032_v4 = vmax.f32 %v1030_v27, %v1031_v62 }
 0x405   :  { %7830 = vpow2.f32 %v1074_v14 }
 0x406   :  { %7832 = vpow2.f32 %v1076_v58  ;;  %v1052_v48 = vsub.f32 %v980_v19, %v1027_v12  ;;  %v1053_v63 = vsub.f32 %v981_v24, %v1027_v12  ;;  %v1033_v16 = vrot.slane %v1032_v4, 1 }
 0x408   :  { %v1078_v15 = vmul.f32 1.442695, %v1052_v48  ;;  %v1080_v17 = vmul.f32 1.442695, %v1053_v63  ;;  %v1034_v20 = vmax.f32 %v1032_v4, %v1033_v16  ;;  %v8514_v63 = vld [vmem:[#allocation4 + $0x40] sm:$0xff] }
 0x40a   :  { %v7823_v26 = vpop.eup %7822  ;;  %7834 = vpow2.f32 %v1078_v15  ;;  %v1054_v11 = vsub.f32 %v982_v50, %v1034_v20  ;;  %v1055_v0 = vsub.f32 %v983_v56, %v1034_v20  ;;  %v8518_v15 = vld [vmem:[#allocation4 + $0x50] sm:$0xff]  ;;  %v8522_v20 = vld [vmem:[#allocation4 + $0x48] sm:$0xff] }
 0x40b   :  { %v7825_v10 = vpop.eup %7824  ;;  %7836 = vpow2.f32 %v1080_v17 }
 0x40c   :  { %v1104_v40 = vadd.f32 %v7825_v10, %v7823_v26  ;;  %v1082_v7 = vmul.f32 1.442695, %v1054_v11  ;;  %v1084_v23 = vmul.f32 1.442695, %v1055_v0  ;;  %v8526_v0 = vld [vmem:[#allocation4 + $0x58] sm:$0xff] }
 0x40e   :  { %v1105_v9 = vrot.slane %v1104_v40, 4  ;;  %v7827_v45 = vpop.eup %7826  ;;  %7838 = vpow2.f32 %v1082_v7 }
 0x40f   :  { %v7829_v49 = vpop.eup %7828  ;;  %7840 = vpow2.f32 %v1084_v23 }
 0x410   :  { %v1106_v32 = vadd.f32 %v1105_v9, %v1104_v40  ;;  %v1111_v19 = vadd.f32 %v7829_v49, %v7827_v45 }
 0x412   :  { %v1107_v24 = vrot.slane %v1106_v32, 2  ;;  %v8492_v46 = vpop.eup %7830  ;;  %v1112_v36 = vrot.slane %v1111_v19, 4 }
 0x413   :  { %v8494_v42 = vpop.eup %7832 }
 0x414   :  { %v1108_v53 = vadd.f32 %v1107_v24, %v1106_v32  ;;  %v1113_v18 = vadd.f32 %v1112_v36, %v1111_v19  ;;  %v1118_v47 = vadd.f32 %v8494_v42, %v8492_v46  ;;  %v8534_v36 = vld [vmem:[#allocation4 + $0x68] sm:$0xff] }
 0x416   :  { %v1109_v50 = vrot.slane %v1108_v53, 1  ;;  %v1114_v34 = vrot.slane %v1113_v18, 2  ;;  %v1119_v38 = vrot.slane %v1118_v47, 4 }
 0x417   :  { %v8498_v61 = vpop.eup %7834 }
 0x418   :  { %v1110_v56 = vadd.f32 %v1109_v50, %v1108_v53  ;;  %v8500_v31 = vpop.eup %7836  ;;  %v1115_v1 = vadd.f32 %v1114_v34, %v1113_v18  ;;  %v1120_v41 = vadd.f32 %v1119_v38, %v1118_v47  ;;  %v8538_v18 = vld [vmem:[#allocation4 + $0x78] sm:$0xff]  ;;  %v8542_v50 = vld [vmem:[#allocation4 + $0x60] sm:$0xff] }
 0x419   :  { %v1125_v8 = vadd.f32 %v8500_v31, %v8498_v61 }
 0x41a   :  { %7842 = vrcp.f32 %v1110_v56  ;;  %v1116_v39 = vrot.slane %v1115_v1, 1  ;;  %v1121_v35 = vrot.slane %v1120_v41, 2  ;;  %v8546_v56 = vld [vmem:[#allocation4 + $0x70] sm:$0xff] }
 0x41b   :  { %v8504_v54 = vpop.eup %7838  ;;  %v1126_v21 = vrot.slane %v1125_v8, 4 }
 0x41c   :  { %v8506_v22 = vpop.eup %7840  ;;  %v1117_v28 = vadd.f32 %v1116_v39, %v1115_v1  ;;  %v1122_v52 = vadd.f32 %v1121_v35, %v1120_v41 }
 0x41d   :  { %v1127_v13 = vadd.f32 %v1126_v21, %v1125_v8  ;;  %v1132_v59 = vadd.f32 %v8506_v22, %v8504_v54 }
 0x41e   :  { %7844 = vrcp.f32 %v1117_v28  ;;  %v1123_v44 = vrot.slane %v1122_v52, 1 }
 0x41f   :  { %v1128_v3 = vrot.slane %v1127_v13, 2  ;;  %v1133_v27 = vrot.slane %v1132_v59, 4 }
 0x420   :  { %v1124_v60 = vadd.f32 %v1123_v44, %v1122_v52 }
 0x421   :  { %v1129_v29 = vadd.f32 %v1128_v3, %v1127_v13  ;;  %v1134_v62 = vadd.f32 %v1133_v27, %v1132_v59  ;;  %v8556_v59 = vld [vmem:[#allocation4 + $0x88] sm:$0xff]  ;;  %v8560_v3 = vld [vmem:[#allocation4 + $0x98] sm:$0xff] }
 0x422   :  { %7846 = vrcp.f32 %v1124_v60 }
 0x423   :  { %v1130_v5 = vrot.slane %v1129_v29, 1  ;;  %v1135_v12 = vrot.slane %v1134_v62, 2 }
 0x425   :  { %v1131_v14 = vadd.f32 %v1130_v5, %v1129_v29  ;;  %v1136_v40 = vadd.f32 %v1135_v12, %v1134_v62  ;;  %v8568_v62 = vld [vmem:[#allocation4 + $0x90] sm:$0xff] }
 0x427   :  { %v7843_v58 = vpop.eup %7842  ;;  %7848 = vrcp.f32 %v1131_v14 }
 0x428   :  { %v8510_v4 = vmul.f32 %v7843_v58, %v7823_v26  ;;  %v8512_v48 = vmul.f32 %v7843_v58, %v7825_v10 }
 0x42a   :  { %v1178_v16 = vmul.f32 %v8514_v63, %v8510_v4  ;;  %v1180_v17 = vmul.f32 %v8518_v15, %v8512_v48  ;;  %v1179_v11 = vmul.f32 %v8522_v20, %v8510_v4  ;;  %v1181_v26 = vmul.f32 %v8526_v0, %v8512_v48 }
 0x42b   :  { %v7845_v10 = vpop.eup %7844 }
 0x42c   :  { %v1230_v7 = vadd.f32 %v1180_v17, %v1178_v16  ;;  %v1237_v23 = vadd.f32 %v1181_v26, %v1179_v11  ;;  %v8530_v9 = vmul.f32 %v7845_v10, %v7827_v45  ;;  %v8532_v32 = vmul.f32 %v7845_v10, %v7829_v49 }
 0x42d   :  { %v1137_v49 = vrot.slane %v1136_v40, 1 }
 0x42e   :  { %v1231_v19 = vrot.slane %v1230_v7, 4  ;;  %v1238_v24 = vrot.slane %v1237_v23, 4  ;;  %v1183_v53 = vmul.f32 %v8534_v36, %v8530_v9  ;;  %v1185_v47 = vmul.f32 %v8538_v18, %v8532_v32 }
 0x42f   :  { %v1182_v45 = vmul.f32 %v8542_v50, %v8530_v9  ;;  %v7847_v34 = vpop.eup %7846  ;;  %v1184_v1 = vmul.f32 %v8546_v56, %v8532_v32  ;;  %v1138_v12 = vadd.f32 %v1137_v49, %v1136_v40  ;;  %v8589_v49 = vld [vmem:[#allocation4 + $0xb8] sm:$0xff] }
 0x430   :  { %v1232_v38 = vadd.f32 %v1231_v19, %v1230_v7  ;;  %v1239_v41 = vadd.f32 %v1238_v24, %v1237_v23  ;;  %v1251_v8 = vadd.f32 %v1185_v47, %v1183_v53  ;;  %v8551_v39 = vmul.f32 %v7847_v34, %v8492_v46 }
 0x431   :  { %v8554_v35 = vmul.f32 %v7847_v34, %v8494_v42  ;;  %v1244_v28 = vadd.f32 %v1184_v1, %v1182_v45  ;;  %v8564_v42 = vld [vmem:[#allocation4 + $0x80] sm:$0xff]  ;;  %v8585_v34 = vld [vmem:[#allocation4 + $0xa8] sm:$0xff]  ;;  %7850 = vrcp.f32 %v1138_v12 }
 0x432   :  { %v1233_v21 = vrot.slane %v1232_v38, 2  ;;  %v1240_v52 = vrot.slane %v1239_v41, 2  ;;  %v1252_v13 = vrot.slane %v1251_v8, 4  ;;  %v1187_v44 = vmul.f32 %v8556_v59, %v8551_v39 }
 0x433   :  { %v1189_v27 = vmul.f32 %v8560_v3, %v8554_v35  ;;  %v1245_v29 = vrot.slane %v1244_v28, 4  ;;  %v1186_v5 = vmul.f32 %v8564_v42, %v8551_v39  ;;  %v1188_v14 = vmul.f32 %v8568_v62, %v8554_v35 }
 0x434   :  { %v1634_v46 = vpop.trf.xlu0  ;;  %v1234_v60 = vadd.f32 %v1233_v21, %v1232_v38  ;;  %v7849_v58 = vpop.eup %7848  ;;  %v1241_v16 = vadd.f32 %v1240_v52, %v1239_v41  ;;  %v1253_v17 = vadd.f32 %v1252_v13, %v1251_v8 }
 0x435   :  { %6837 = vmatmul.mubr.msk.f32.vlgmr.msra.gmra.mxu1 %vm1682_vm15, %v1634_v46  ;;  %v1265_v11 = vadd.f32 %v1189_v27, %v1187_v44  ;;  %v1246_v10 = vadd.f32 %v1245_v29, %v1244_v28  ;;  %v8576_v7 = vmul.f32 %v7849_v58, %v8498_v61  ;;  %v8579_v23 = vmul.f32 %v7849_v58, %v8500_v31 }
 0x436   :  { %7671 = vmatpush1.msra.mxu1 %v8405_v57  ;;  %1849 = vmatprep.mubr.f32.mxu1 %v8009_v2  ;;  %v1235_v26 = vrot.slane %v1234_v60, 1  ;;  %v1242_v40 = vrot.slane %v1241_v16, 1  ;;  %v1254_v19 = vrot.slane %v1253_v17, 2  ;;  %v8582_v53 = vadd.f32 %v1188_v14, %v1186_v5 }
 0x437   :  { %7670 = vmatprep.subr.mxu1 %v8408_v51  ;;  %v1266_v24 = vrot.slane %v1265_v11, 4  ;;  %v1247_v45 = vrot.slane %v1246_v10, 2  ;;  %v1191_v61 = vmul.f32 %v8585_v34, %v8576_v7  ;;  %v1193_v51 = vmul.f32 %v8589_v49, %v8579_v23 }
 0x438   :  { %7672 = vmatpush1.msra.mxu1 %v8412_v55  ;;  %v1635_v57 = vpop.trf.xlu0  ;;  %v1236_v47 = vadd.f32 %v1235_v26, %v1234_v60  ;;  %v1243_v31 = vadd.f32 %v1242_v40, %v1241_v16  ;;  %v1255_v38 = vadd.f32 %v1254_v19, %v1253_v17 }
 0x439   :  { %6838 = vmatmul.mubr.msk.f32.gmra.mxu1 %vm1682_vm15, %v1635_v57  ;;  %v1267_v1 = vadd.f32 %v1266_v24, %v1265_v11  ;;  %v1248_v8 = vadd.f32 %v1247_v45, %v1246_v10  ;;  %v1279_v21 = vadd.f32 %v1193_v51, %v1191_v61 }
 0x43a   :  { %1855 = vmatprep.mubr.f32.mxu1 %v8009_v2  ;;  %v8596_v55 = vsub.f32 %v8514_v63, %v1236_v47  ;;  %v8599_v41 = vsub.f32 %v8518_v15, %v1236_v47  ;;  %v8602_v28 = vsub.f32 %v8522_v20, %v1243_v31  ;;  %v8605_v52 = vsub.f32 %v8526_v0, %v1243_v31 }
 0x43b   :  { %v1256_v13 = vrot.slane %v1255_v38, 1  ;;  %v1268_v44 = vrot.slane %v1267_v1, 2  ;;  %v1249_v15 = vrot.slane %v1248_v8, 1  ;;  %v1280_v60 = vrot.slane %v1279_v21, 4 }
 0x43c   :  { %v1636_v27 = vpop.trf.xlu0  ;;  %v8609_v46 = vmul.f32 %v8596_v55, %v8510_v4  ;;  %v8613_v63 = vmul.f32 %v8599_v41, %v8512_v48  ;;  %v8618_v0 = vmul.f32 %v8602_v28, %v8510_v4  ;;  %v8622_v29 = vmul.f32 %v8605_v52, %v8512_v48 }
 0x43d   :  { %6839 = vmatmul.mubr.msk.f32.gmra.mxu1 %vm1682_vm15, %v1636_v27  ;;  %v2052_v20 = vpop.trf.xlu1  ;;  %v1257_v5 = vadd.f32 %v1256_v13, %v1255_v38  ;;  %v1269_v14 = vadd.f32 %v1268_v44, %v1267_v1  ;;  %v1250_v16 = vadd.f32 %v1249_v15, %v1248_v8  ;;  %v1259_v4 = vrot.slane %v8582_v53, 4 }
 0x43e   :  { %1861 = vmatprep.mubr.f32.mxu1 %v8009_v2  ;;  %v1386_v58 = vmul.f32 %v8609_v46, %v8596_v55  ;;  %v1388_v12 = vmul.f32 %v8613_v63, %v8599_v41  ;;  %6869 = vmatmul.mubr.msk.f32.vlgmr.msra.gmra.mxu0 %vm1682_vm15, %v2052_v20  ;;  %v1387_v17 = vmul.f32 %v8618_v0, %v8602_v28 }
 0x43f   :  { %v1389_v48 = vmul.f32 %v8622_v29, %v8605_v52  ;;  %v8636_v11 = vsub.f32 %v8534_v36, %v1257_v5  ;;  %v8639_v26 = vsub.f32 %v8538_v18, %v1257_v5  ;;  %2266 = vmatprep.mubr.f32.mxu0 %v8009_v2  ;;  %v8643_v19 = vsub.f32 %v8542_v50, %v1250_v16 }
 0x440   :  { %v1637_v10 = vpop.trf.xlu0  ;;  %v1438_v40 = vadd.f32 %v1388_v12, %v1386_v58  ;;  %v8646_v24 = vsub.f32 %v8546_v56, %v1250_v16  ;;  %v1281_v57 = vadd.f32 %v1280_v60, %v1279_v21  ;;  %v1270_v61 = vrot.slane %v1269_v14, 1 }
 0x441   :  { %6840 = vmatmul.mubr.msk.f32.gmra.mxu1 %vm1682_vm15, %v1637_v10  ;;  %v2053_v47 = vpop.trf.xlu1  ;;  %v1445_v45 = vadd.f32 %v1389_v48, %v1387_v17  ;;  %v8651_v36 = vmul.f32 %v8636_v11, %v8530_v9  ;;  %v8655_v18 = vmul.f32 %v8639_v26, %v8532_v32  ;;  %v8660_v56 = vmul.f32 %v8643_v19, %v8530_v9 }
 0x442   :  { %1867 = vmatprep.mubr.f32.mxu1 %v8009_v2  ;;  %v1439_v50 = vrot.slane %v1438_v40, 4  ;;  %v8664_v51 = vmul.f32 %v8646_v24, %v8532_v32  ;;  %v1282_v31 = vrot.slane %v1281_v57, 2  ;;  %6870 = vmatmul.mubr.msk.f32.gmra.mxu0 %vm1682_vm15, %v2053_v47  ;;  %v1271_v21 = vadd.f32 %v1270_v61, %v1269_v14  ;;  %v8683_v14 = vpop.eup %7850 }
 0x443   :  { %v1446_v38 = vrot.slane %v1445_v45, 4  ;;  %v1391_v1 = vmul.f32 %v8651_v36, %v8636_v11  ;;  %v1393_v8 = vmul.f32 %v8655_v18, %v8639_v26  ;;  %2272 = vmatprep.mubr.f32.mxu0 %v8009_v2  ;;  %v1390_v44 = vmul.f32 %v8660_v56, %v8643_v19 }
 0x444   :  { %v1638_v13 = vpop.trf.xlu0  ;;  %v1440_v9 = vadd.f32 %v1439_v50, %v1438_v40  ;;  %v1392_v32 = vmul.f32 %v8664_v51, %v8646_v24  ;;  %v1283_v27 = vadd.f32 %v1282_v31, %v1281_v57  ;;  %v8678_v5 = vsub.f32 %v8556_v59, %v1271_v21 }
 0x445   :  { %6841 = vmatmul.mubr.msk.f32.gmra.mxu1 %vm1682_vm15, %v1638_v13  ;;  %v2054_v15 = vpop.trf.xlu1  ;;  %v1447_v60 = vadd.f32 %v1446_v38, %v1445_v45  ;;  %v1459_v20 = vadd.f32 %v1393_v8, %v1391_v1  ;;  %v8681_v58 = vsub.f32 %v8560_v3, %v1271_v21  ;;  %v1260_v48 = vadd.f32 %v1259_v4, %v8582_v53 }
 0x446   :  { %1873 = vmatprep.mubr.f32.mxu1 %v8009_v2  ;;  %v1441_v12 = vrot.slane %v1440_v9, 2  ;;  %v1452_v16 = vadd.f32 %v1392_v32, %v1390_v44  ;;  %v1284_v17 = vrot.slane %v1283_v27, 1  ;;  %6871 = vmatmul.mubr.msk.f32.gmra.mxu0 %vm1682_vm15, %v2054_v15  ;;  %v8691_v59 = vmul.f32 %v8678_v5, %v8551_v39 }
 0x447   :  { %v1448_v10 = vrot.slane %v1447_v60, 2  ;;  %v1460_v40 = vrot.slane %v1459_v20, 4  ;;  %2278 = vmatprep.mubr.f32.mxu0 %v8009_v2  ;;  %v8695_v3 = vmul.f32 %v8681_v58, %v8554_v35  ;;  %v1261_v50 = vrot.slane %v1260_v48, 2 }
 0x448   :  { %v1639_v57 = vpop.trf.xlu0  ;;  %v1442_v47 = vadd.f32 %v1441_v12, %v1440_v9  ;;  %v1453_v45 = vrot.slane %v1452_v16, 4  ;;  %v1285_v61 = vadd.f32 %v1284_v17, %v1283_v27  ;;  %v1395_v38 = vmul.f32 %v8691_v59, %v8678_v5 }
 0x449   :  { %6842 = vmatmul.mubr.msk.f32.gmra.mxu1 %vm1682_vm15, %v1639_v57  ;;  %v2055_v53 = vpop.trf.xlu1  ;;  %v1449_v4 = vadd.f32 %v1448_v10, %v1447_v60  ;;  %v1461_v31 = vadd.f32 %v1460_v40, %v1459_v20  ;;  %v1397_v1 = vmul.f32 %v8695_v3, %v8681_v58  ;;  %v1262_v15 = vadd.f32 %v1261_v50, %v1260_v48 }
 0x44a   :  { %1879 = vmatprep.mubr.f32.mxu1 %v8009_v2  ;;  %v1443_v8 = vrot.slane %v1442_v47, 1  ;;  %v1454_v21 = vadd.f32 %v1453_v45, %v1452_v16  ;;  %v8704_v13 = vsub.f32 %v8585_v34, %v1285_v61  ;;  %v8707_v9 = vsub.f32 %v8589_v49, %v1285_v61  ;;  %6872 = vmatmul.mubr.msk.f32.gmra.mxu0 %vm1682_vm15, %v2055_v53 }
 0x44b   :  { %v1450_v44 = vrot.slane %v1449_v4, 1  ;;  %v1462_v32 = vrot.slane %v1461_v31, 2  ;;  %2284 = vmatprep.mubr.f32.mxu0 %v8009_v2  ;;  %v1473_v27 = vadd.f32 %v1397_v1, %v1395_v38  ;;  %v1263_v57 = vrot.slane %v1262_v15, 1 }
 0x44c   :  { %v1640_v60 = vpop.trf.xlu0  ;;  %v1444_v20 = vadd.f32 %v1443_v8, %v1442_v47  ;;  %v1455_v12 = vrot.slane %v1454_v21, 2  ;;  %v8713_v16 = vmul.f32 %v8704_v13, %v8576_v7  ;;  %v8717_v34 = vmul.f32 %v8707_v9, %v8579_v23 }
 0x44d   :  { %6843 = vmatmul.mubr.msk.f32.gmra.mxu1 %vm1682_vm15, %v1640_v60  ;;  %v2056_v49 = vpop.trf.xlu1  ;;  %v1451_v17 = vadd.f32 %v1450_v44, %v1449_v4  ;;  %v1463_v10 = vadd.f32 %v1462_v32, %v1461_v31  ;;  %v1474_v40 = vrot.slane %v1473_v27, 4  ;;  %v1264_v31 = vadd.f32 %v1263_v57, %v1262_v15 }
 0x44e   :  { %1885 = vmatprep.mubr.f32.mxu1 %v8009_v2  ;;  %v1526_v48 = vadd.f32 1e-09, %v1444_v20  ;;  %v1456_v47 = vadd.f32 %v1455_v12, %v1454_v21  ;;  %v1399_v45 = vmul.f32 %v8713_v16, %v8704_v13  ;;  %v1401_v61 = vmul.f32 %v8717_v34, %v8707_v9  ;;  %6873 = vmatmul.mubr.msk.f32.gmra.mxu0 %vm1682_vm15, %v2056_v49 }
 0x44f   :  { %v1527_v50 = vadd.f32 1e-09, %v1451_v17  ;;  %v1464_v53 = vrot.slane %v1463_v10, 1  ;;  %2290 = vmatprep.mubr.f32.mxu0 %v8009_v2  ;;  %v1475_v4 = vadd.f32 %v1474_v40, %v1473_v27  ;;  %v8729_v21 = vmul.f32 %v8683_v14, %v8504_v54 }
 0x450   :  { %v1641_v38 = vpop.trf.xlu0  ;;  %7852 = vrsqrt.f32 %v1526_v48  ;;  %v1457_v1 = vrot.slane %v1456_v47, 1  ;;  %v1487_v8 = vadd.f32 %v1401_v61, %v1399_v45  ;;  %v8733_v20 = vsub.f32 %v8564_v42, %v1264_v31 }
 0x451   :  { %6844 = vmatmul.mubr.msk.f32.gmra.mxu1 %vm1682_vm15, %v1641_v38  ;;  %v2057_v44 = vpop.trf.xlu1  ;;  %7854 = vrsqrt.f32 %v1527_v50  ;;  %v1465_v32 = vadd.f32 %v1464_v53, %v1463_v10  ;;  %v1476_v60 = vrot.slane %v1475_v4, 2  ;;  %v8738_v12 = vsub.f32 %v8568_v62, %v1264_v31  ;;  %v8749_v10 = vld [vmem:[#allocation4 + $0xc8] sm:$0xff]  ;;  %v8764_v50 = vld [vmem:[#allocation4 + $0xa0] sm:$0xff] }
 0x452   :  { %1891 = vmatprep.mubr.f32.mxu1 %v8009_v2  ;;  %v1458_v27 = vadd.f32 %v1457_v1, %v1456_v47  ;;  %v1488_v15 = vrot.slane %v1487_v8, 4  ;;  %6874 = vmatmul.mubr.msk.f32.gmra.mxu0 %vm1682_vm15, %v2057_v44  ;;  %v8742_v54 = vmul.f32 %v8683_v14, %v8506_v22  ;;  %v8747_v42 = vmul.f32 %v8733_v20, %v8551_v39  ;;  %v8757_v14 = vld [vmem:[#allocation4 + $0xd8] sm:$0xff]  ;;  %v8773_v1 = vld [vmem:[#allocation4 + $0xb0] sm:$0xff]  ;;  %v8777_v44 = vld [vmem:[#allocation4 + $0xc0] sm:$0xff] }
 0x453   :  { %v1529_v49 = vadd.f32 1e-09, %v1465_v32  ;;  %2296 = vmatprep.mubr.f32.mxu0 %v8009_v2  ;;  %v1477_v17 = vadd.f32 %v1476_v60, %v1475_v4  ;;  %v1195_v40 = vmul.f32 %v8749_v10, %v8729_v21  ;;  %v8755_v22 = vmul.f32 %v8738_v12, %v8554_v35  ;;  %v8781_v60 = vld [vmem:[#allocation4 + $0xd0] sm:$0xff] }
 0x454   :  { %v1642_v57 = vpop.trf.xlu0  ;;  %v1528_v62 = vadd.f32 1e-09, %v1458_v27  ;;  %v1489_v48 = vadd.f32 %v1488_v15, %v1487_v8  ;;  %v1197_v47 = vmul.f32 %v8757_v14, %v8742_v54  ;;  %v1394_v61 = vmul.f32 %v8747_v42, %v8733_v20 }
 0x455   :  { %6845 = vmatmul.mubr.msk.f32.gmra.mxu1 %vm1682_vm15, %v1642_v57  ;;  %v2058_v39 = vpop.trf.xlu1  ;;  %7856 = vrsqrt.f32 %v1529_v49  ;;  %v1478_v45 = vrot.slane %v1477_v17, 1  ;;  %v1190_v53 = vmul.f32 %v8764_v50, %v8576_v7  ;;  %v1396_v4 = vmul.f32 %v8755_v22, %v8738_v12 }
 0x456   :  { %1897 = vmatprep.mubr.f32.mxu1 %v8009_v2  ;;  %7858 = vrsqrt.f32 %v1528_v62  ;;  %v1490_v35 = vrot.slane %v1489_v48, 2  ;;  %6875 = vmatmul.mubr.msk.f32.gmra.mxu0 %vm1682_vm15, %v2058_v39  ;;  %v1293_v31 = vadd.f32 %v1197_v47, %v1195_v40  ;;  %v1192_v8 = vmul.f32 %v8773_v1, %v8579_v23 }
 0x457   :  { %2302 = vmatprep.mubr.f32.mxu0 %v8009_v2  ;;  %v1479_v38 = vadd.f32 %v1478_v45, %v1477_v17  ;;  %v1194_v32 = vmul.f32 %v8777_v44, %v8729_v21  ;;  %v1196_v27 = vmul.f32 %v8781_v60, %v8742_v54  ;;  %v1466_v40 = vadd.f32 %v1396_v4, %v1394_v61 }
 0x458   :  { %v1643_v15 = vpop.trf.xlu0  ;;  %v1491_v49 = vadd.f32 %v1490_v35, %v1489_v48  ;;  %v1294_v57 = vrot.slane %v1293_v31, 4  ;;  %v1272_v47 = vadd.f32 %v1192_v8, %v1190_v53 }
 0x459   :  { %6846 = vmatmul.mubr.msk.f32.gmra.mxu1 %vm1682_vm15, %v1643_v15  ;;  %v2059_v17 = vpop.trf.xlu1  ;;  %v1531_v62 = vadd.f32 1e-09, %v1479_v38  ;;  %v1286_v39 = vadd.f32 %v1196_v27, %v1194_v32  ;;  %v1467_v33 = vrot.slane %v1466_v40, 4 }
 0x45a   :  { %1903 = vmatprep.mubr.f32.mxu1 %v8009_v2  ;;  %v1492_v45 = vrot.slane %v1491_v49, 1  ;;  %6876 = vmatmul.mubr.msk.f32.gmra.mxu0 %vm1682_vm15, %v2059_v17  ;;  %v1295_v43 = vadd.f32 %v1294_v57, %v1293_v31  ;;  %v1273_v30 = vrot.slane %v1272_v47, 4 }
 0x45b   :  { %2308 = vmatprep.mubr.f32.mxu0 %v8009_v2  ;;  %7860 = vrsqrt.f32 %v1531_v62  ;;  %v1287_v48 = vrot.slane %v1286_v39, 4  ;;  %v1468_v4 = vadd.f32 %v1467_v33, %v1466_v40 }
 0x45c   :  { %v1644_v61 = vpop.trf.xlu0  ;;  %v1493_v35 = vadd.f32 %v1492_v45, %v1491_v49  ;;  %v1296_v15 = vrot.slane %v1295_v43, 2  ;;  %v1274_v38 = vadd.f32 %v1273_v30, %v1272_v47 }
 0x45d   :  { %v7853_v37 = vpop.eup %7852  ;;  %6847 = vmatmul.mubr.msk.f32.gmra.mxu1 %vm1682_vm15, %v1644_v61  ;;  %v2060_v53 = vpop.trf.xlu1  ;;  %v1288_v57 = vadd.f32 %v1287_v48, %v1286_v39  ;;  %v1469_v40 = vrot.slane %v1468_v4, 2 }
 0x45e   :  { %v7855_v8 = vpop.eup %7854  ;;  %1909 = vmatprep.mubr.f32.mxu1 %v8009_v2  ;;  %v1562_v32 = vmul.f32 %v7853_v37, %v8609_v46  ;;  %v1533_v31 = vadd.f32 1e-09, %v1493_v35  ;;  %6877 = vmatmul.mubr.msk.f32.gmra.mxu0 %vm1682_vm15, %v2060_v53  ;;  %v8794_v27 = vmul.f32 %v7853_v37, %v8599_v41  ;;  %v8802_v30 = vmul.f32 %v7853_v37, %v8596_v55 }
 0x45f   :  { %v1597_v33 = vmul.f32 %v7855_v8, %v8605_v52  ;;  %2314 = vmatprep.mubr.f32.mxu0 %v8009_v2  ;;  %v8799_v49 = vmul.f32 %v7855_v8, %v8602_v28  ;;  %v1297_v46 = vadd.f32 %v1296_v15, %v1295_v43  ;;  %v1275_v62 = vrot.slane %v1274_v38, 2 }
 0x460   :  { %v1645_v17 = vpop.trf.xlu0  ;;  %2453 = vxpose.xlu0.b32.start [1/2] (short) %v1562_v32, 128  ;;  %7862 = vrsqrt.f32 %v1533_v31  ;;  %v8805_v41 = vmul.f32 %v7855_v8, %v8618_v0  ;;  %v1470_v47 = vadd.f32 %v1469_v40, %v1468_v4  ;;  %v8809_v28 = vmul.f32 %v7855_v8, %v8622_v29 }
 0x461   :  { %6848 = vmatmul.mubr.msk.f32.gmra.mxu1 %vm1682_vm15, %v1645_v17  ;;  %2641 = vmatprep.subr.mxu1 %v1597_v33  ;;  %v2061_v52 = vpop.trf.xlu1  ;;  %v1564_v55 = vmul.f32 %v7853_v37, %v8613_v63  ;;  %v1298_v43 = vrot.slane %v1297_v46, 1  ;;  %v1276_v45 = vadd.f32 %v1275_v62, %v1274_v38  ;;  %v1289_v48 = vrot.slane %v1288_v57, 2 }
 0x462   :  { %v7857_v39 = vpop.eup %7856  ;;  %1915 = vmatprep.mubr.f32.mxu1 %v8009_v2  ;;  %6878 = vmatmul.mubr.msk.f32.gmra.mxu0 %vm1682_vm15, %v2061_v52  ;;  %v1471_v35 = vrot.slane %v1470_v47, 1 }
 0x463   :  { %v7859_v0 = vpop.eup %7858  ;;  %v1601_v61 = vmul.f32 %v7857_v39, %v8639_v26  ;;  %2320 = vmatprep.mubr.f32.mxu0 %v8009_v2  ;;  %v8817_v4 = vmul.f32 %v7857_v39, %v8651_v36  ;;  %v1599_v63 = vmul.f32 %v7857_v39, %v8636_v11  ;;  %v1299_v26 = vadd.f32 %v1298_v43, %v1297_v46 }
 0x464   :  { %v1646_v29 = vpop.trf.xlu0  ;;  %v1566_v15 = vmul.f32 %v7859_v0, %v8660_v56  ;;  %2454 = vxpose.xlu0.b32.end [2/2] (short) %v1564_v55, 128  ;;  %v1600_v37 = vmul.f32 %v7859_v0, %v8646_v24  ;;  %v1472_v38 = vadd.f32 %v1471_v35, %v1470_v47  ;;  %v1277_v8 = vrot.slane %v1276_v45, 1 }
 0x465   :  { %3058 = vmatprep.subr.mxu0 %v1601_v61  ;;  %6849 = vmatmul.mubr.msk.f32.gmra.mxu1 %vm1682_vm15, %v1646_v29  ;;  %v2062_v53 = vpop.trf.xlu1  ;;  %v8824_v32 = vmul.f32 %v7857_v39, %v8655_v18  ;;  %v1598_v36 = vmul.f32 %v7859_v0, %v8643_v19  ;;  %v1290_v56 = vadd.f32 %v1289_v48, %v1288_v57 }
 0x466   :  { %2870 = vxpose.xlu1.b32.start [1/2] (short) %v1566_v15, 128  ;;  %3059 = vmatpush1.msra.mxu0 %v1600_v37  ;;  %v1530_v24 = vadd.f32 1e-09, %v1472_v38  ;;  %v8829_v11 = vsub.f32 %v8749_v10, %v1299_v26  ;;  %v8832_v31 = vsub.f32 %v8757_v14, %v1299_v26  ;;  %v1278_v33 = vadd.f32 %v1277_v8, %v1276_v45 }
 0x467   :  { %3060 = vmatprep.subr.mxu0 %v1599_v63  ;;  %1921 = vmatprep.mubr.f32.mxu1 %v8009_v2  ;;  %v1568_v17 = vmul.f32 %v7859_v0, %v8664_v51  ;;  %v1291_v46 = vrot.slane %v1290_v56, 1 }
 0x468   :  { %v7861_v40 = vpop.eup %7860  ;;  %3061 = vmatpush1.msra.mxu0 %v1598_v36  ;;  %v1647_v18 = vpop.trf.xlu0  ;;  %7864 = vrsqrt.f32 %v1530_v24  ;;  %v8845_v14 = vmul.f32 %v8829_v11, %v8729_v21  ;;  %v8850_v51 = vmul.f32 %v8832_v31, %v8742_v54  ;;  %v8853_v62 = vsub.f32 %v8764_v50, %v1278_v33 }
 0x469   :  { %6850 = vmatmul.mubr.msk.f32.gmra.mxu1 %vm1682_vm15, %v1647_v18  ;;  %v2063_v19 = vpop.trf.xlu1  ;;  %6879 = vmatmul.mubr.msk.f32.gmra.mxu0 %vm1682_vm15, %v2062_v53  ;;  %v8838_v57 = vmul.f32 %v7861_v40, %v8681_v58  ;;  %v8841_v10 = vmul.f32 %v7861_v40, %v8678_v5  ;;  %v8856_v58 = vsub.f32 %v8773_v1, %v1278_v33 }
 0x46a   :  { %2871 = vxpose.xlu1.b32.end [2/2] (short) %v1568_v17, 128  ;;  %1927 = vmatprep.mubr.f32.mxu1 %v8009_v2  ;;  %v1403_v5 = vmul.f32 %v8845_v14, %v8829_v11  ;;  %v8862_v52 = vmul.f32 %v7861_v40, %v8691_v59  ;;  %v8865_v47 = vmul.f32 %v7861_v40, %v8695_v3 }
 0x46b   :  { %2326 = vmatprep.mubr.f32.mxu0 %v8009_v2  ;;  %v1292_v39 = vadd.f32 %v1291_v46, %v1290_v56  ;;  %v1405_v50 = vmul.f32 %v8850_v51, %v8832_v31  ;;  %v8871_v1 = vmul.f32 %v8853_v62, %v8576_v7  ;;  %v8875_v43 = vmul.f32 %v8856_v58, %v8579_v23 }
 0x46c   :  { %v1648_v55 = vpop.trf.xlu0 }
 0x46d   :  { %v7863_v45 = vpop.eup %7862  ;;  %6851 = vmatmul.mubr.msk.f32.gmra.mxu1 %vm1682_vm15, %v1648_v55  ;;  %v2064_v59 = vpop.trf.xlu1  ;;  %6880 = vmatmul.mubr.msk.f32.gmra.mxu0 %vm1682_vm15, %v2063_v19  ;;  %v8880_v3 = vsub.f32 %v8777_v44, %v1292_v39  ;;  %v8883_v48 = vsub.f32 %v8781_v60, %v1292_v39  ;;  %v1501_v7 = vadd.f32 %v1405_v50, %v1403_v5 }
 0x46e   :  { %v1609_v0 = vmul.f32 %v7863_v45, %v8707_v9  ;;  %1933 = vmatprep.mubr.f32.mxu1 %v8009_v2  ;;  %2332 = vmatprep.mubr.f32.mxu0 %v8009_v2  ;;  %v1398_v23 = vmul.f32 %v8871_v1, %v8853_v62  ;;  %v1400_v61 = vmul.f32 %v8875_v43, %v8856_v58 }
 0x46f   :  { %v8893_v35 = vmul.f32 %v7863_v45, %v8704_v13  ;;  %v8896_v44 = vmul.f32 %v7863_v45, %v8713_v16  ;;  %v8899_v60 = vmul.f32 %v7863_v45, %v8717_v34  ;;  %v1502_v29 = vrot.slane %v1501_v7, 4 }
 0x470   :  { %3892 = vmatprep.subr.mxu0 %v1609_v0  ;;  %v1649_v9 = vpop.trf.xlu0  ;;  %v8903_v15 = vmul.f32 %v8880_v3, %v8729_v21  ;;  %v8907_v37 = vmul.f32 %v8883_v48, %v8742_v54  ;;  %v1480_v16 = vadd.f32 %v1400_v61, %v1398_v23 }
 0x471   :  { %6852 = vmatmul.mubr.msk.f32.gmra.mxu1 %vm1682_vm15, %v1649_v9  ;;  %v2065_v13 = vpop.trf.xlu1  ;;  %6881 = vmatmul.mubr.msk.f32.gmra.mxu0 %vm1682_vm15, %v2064_v59  ;;  %v1503_v34 = vadd.f32 %v1502_v29, %v1501_v7 }
 0x472   :  { %1939 = vmatprep.mubr.f32.mxu1 %v8009_v2  ;;  %2338 = vmatprep.mubr.f32.mxu0 %v8009_v2  ;;  %v1402_v63 = vmul.f32 %v8903_v15, %v8880_v3  ;;  %v1404_v21 = vmul.f32 %v8907_v37, %v8883_v48  ;;  %v1481_v53 = vrot.slane %v1480_v16, 4 }
 0x473   :  { %v1504_v38 = vrot.slane %v1503_v34, 2 }
 0x474   :  { %v1666_v54 = vpop.trf.xlu0  ;;  %v1494_v26 = vadd.f32 %v1404_v21, %v1402_v63  ;;  %v1482_v36 = vadd.f32 %v1481_v53, %v1480_v16 }
 0x475   :  { %6853 = vmatmul.mubr.msk.f32.gmra.mxu1 %vm1682_vm15, %v1666_v54  ;;  %v2066_v8 = vpop.trf.xlu1  ;;  %6882 = vmatmul.mubr.msk.f32.gmra.mxu0 %vm1682_vm15, %v2065_v13  ;;  %v7865_v56 = vpop.eup %7864  ;;  %v1505_v24 = vadd.f32 %v1504_v38, %v1503_v34 }
 0x476   :  { %1945 = vmatprep.mubr.f32.mxu1 %v8009_v2  ;;  %2344 = vmatprep.mubr.f32.mxu0 %v8009_v2  ;;  %v1495_v33 = vrot.slane %v1494_v26, 4  ;;  %v8922_v40 = vmul.f32 %v7865_v56, %v8738_v12  ;;  %v8925_v18 = vmul.f32 %v7865_v56, %v8733_v20  ;;  %v1483_v17 = vrot.slane %v1482_v36, 2 }
 0x477   :  { %v8928_v46 = vmul.f32 %v7865_v56, %v8747_v42  ;;  %v1506_v5 = vrot.slane %v1505_v24, 1  ;;  %v8931_v39 = vmul.f32 %v7865_v56, %v8755_v22 }
 0x478   :  { %v1667_v19 = vpop.trf.xlu0  ;;  %v1496_v55 = vadd.f32 %v1495_v33, %v1494_v26  ;;  %v1484_v12 = vadd.f32 %v1483_v17, %v1482_v36 }
 0x479   :  { %6854 = vmatmul.mubr.msk.f32.gmra.mxu1 %vm1682_vm15, %v1667_v19  ;;  %v2067_v50 = vpop.trf.xlu1  ;;  %6883 = vmatmul.mubr.msk.f32.gmra.mxu0 %vm1682_vm15, %v2066_v8  ;;  %v1507_v20 = vadd.f32 %v1506_v5, %v1505_v24 }
 0x47a   :  { %1951 = vmatprep.mubr.f32.mxu1 %v8009_v2  ;;  %2350 = vmatprep.mubr.f32.mxu0 %v8009_v2  ;;  %v1497_v45 = vrot.slane %v1496_v55, 2  ;;  %v1485_v42 = vrot.slane %v1484_v12, 1 }
 0x47b   :  { %v1535_v0 = vadd.f32 1e-09, %v1507_v20 }
 0x47c   :  { %v1668_v59 = vpop.trf.xlu0  ;;  %v1498_v7 = vadd.f32 %v1497_v45, %v1496_v55  ;;  %v1486_v23 = vadd.f32 %v1485_v42, %v1484_v12 }
 0x47d   :  { %6855 = vmatmul.mubr.msk.f32.gmra.mxu1 %vm1682_vm15, %v1668_v59  ;;  %v2084_v22 = vpop.trf.xlu1  ;;  %6884 = vmatmul.mubr.msk.f32.gmra.mxu0 %vm1682_vm15, %v2067_v50  ;;  %7866 = vrsqrt.f32 %v1535_v0 }
 0x47e   :  { %1957 = vmatprep.mubr.f32.mxu1 %v8009_v2  ;;  %2356 = vmatprep.mubr.f32.mxu0 %v8009_v2  ;;  %v1499_v61 = vrot.slane %v1498_v7, 1  ;;  %v1532_v9 = vadd.f32 1e-09, %v1486_v23 }
 0x480   :  { %v1669_v29 = vpop.trf.xlu0  ;;  %v1500_v13 = vadd.f32 %v1499_v61, %v1498_v7  ;;  %7868 = vrsqrt.f32 %v1532_v9  ;;  %v766_v61 = vsub.f32 %v8244_v25, %v8417_v6  ;;  %v9565_v9 = vld [vmem:[#allocation17_spill] sm:$0xff] }
 0x481   :  { %6856 = vmatmul.mubr.msk.f32.gmra.mxu1 %vm1682_vm15, %v1669_v29  ;;  %v2085_v16 = vpop.trf.xlu1  ;;  %6885 = vmatmul.mubr.msk.f32.gmra.mxu0 %vm1682_vm15, %v2084_v22  ;;  %v9566_v29 = vld [vmem:[#allocation15_spill] sm:$0xff] }
 0x482   :  { %1963 = vmatprep.mubr.f32.mxu1 %v8009_v2  ;;  %2362 = vmatprep.mubr.f32.mxu0 %v8009_v2  ;;  %v1534_v34 = vadd.f32 1e-09, %v1500_v13  ;;  %v767_v13 = vsub.f32 %v9566_v29, %v9565_v9 }
 0x484   :  { %v1670_v63 = vpop.trf.xlu0  ;;  %7870 = vrsqrt.f32 %v1534_v34 }
 0x485   :  { %6857 = vmatmul.mubr.msk.f32.gmra.mxu1 %vm1682_vm15, %v1670_v63  ;;  %v2086_v21 = vpop.trf.xlu1  ;;  %6886 = vmatmul.mubr.msk.f32.gmra.mxu0 %vm1682_vm15, %v2085_v16  ;;  %v796_v63 = vmul.f32 1.442695, %v766_v61 }
 0x486   :  { %1969 = vmatprep.mubr.f32.mxu1 %v8009_v2  ;;  %2368 = vmatprep.mubr.f32.mxu0 %v8009_v2 }
 0x487   :  { %7872 = vpow2.f32 %v796_v63 }
 0x488   :  { %v1671_v53 = vpop.trf.xlu0 }
 0x489   :  { %6858 = vmatmul.mubr.msk.f32.gmra.mxu1 %vm1682_vm15, %v1671_v53  ;;  %v2087_v54 = vpop.trf.xlu1  ;;  %6887 = vmatmul.mubr.msk.f32.gmra.mxu0 %vm1682_vm15, %v2086_v21  ;;  %v798_v21 = vmul.f32 1.442695, %v767_v13 }
 0x48a   :  { %1975 = vmatprep.mubr.f32.mxu1 %v8009_v2  ;;  %2374 = vmatprep.mubr.f32.mxu0 %v8009_v2  ;;  %v8953_v38 = vpop.eup %7866 }
 0x48b   :  { %v8957_v8 = vmul.f32 %v8953_v38, %v8829_v11  ;;  %v8961_v36 = vmul.f32 %v8953_v38, %v8845_v14  ;;  %v8965_v56 = vmul.f32 %v8953_v38, %v8850_v51  ;;  %7874 = vpow2.f32 %v798_v21 }
 0x48c   :  { %v1672_v26 = vpop.trf.xlu0 }
 0x48d   :  { %6859 = vmatmul.mubr.msk.f32.gmra.mxu1 %vm1682_vm15, %v1672_v26  ;;  %v2088_v24 = vpop.trf.xlu1  ;;  %6888 = vmatmul.mubr.msk.f32.gmra.mxu0 %vm1682_vm15, %v2087_v54  ;;  %v7869_v33 = vpop.eup %7868  ;;  %v1613_v26 = vmul.f32 %v8953_v38, %v8832_v31 }
 0x48e   :  { %1981 = vmatprep.mubr.f32.mxu1 %v8009_v2  ;;  %2380 = vmatprep.mubr.f32.mxu0 %v8009_v2  ;;  %v8972_v11 = vmul.f32 %v7869_v33, %v8856_v58  ;;  %v8975_v14 = vmul.f32 %v7869_v33, %v8853_v62  ;;  %v8978_v17 = vmul.f32 %v7869_v33, %v8871_v1 }
 0x48f   :  { %v8981_v51 = vmul.f32 %v7869_v33, %v8875_v43 }
 0x490   :  { %v1673_v19 = vpop.trf.xlu0 }
 0x491   :  { %v7871_v5 = vpop.eup %7870  ;;  %6860 = vmatmul.mubr.msk.f32.gmra.mxu1 %vm1682_vm15, %v1673_v19  ;;  %v2089_v55 = vpop.trf.xlu1  ;;  %6889 = vmatmul.mubr.msk.f32.gmra.mxu0 %vm1682_vm15, %v2088_v24 }
 0x492   :  { %1987 = vmatprep.mubr.f32.mxu1 %v8009_v2  ;;  %2386 = vmatprep.mubr.f32.mxu0 %v8009_v2  ;;  %v8988_v62 = vmul.f32 %v7871_v5, %v8903_v15  ;;  %v8991_v58 = vmul.f32 %v7871_v5, %v8907_v37  ;;  %v8994_v1 = vmul.f32 %v7871_v5, %v8883_v48 }
 0x493   :  { %v8997_v43 = vmul.f32 %v7871_v5, %v8880_v3 }
 0x494   :  { %v1674_v50 = vpop.trf.xlu0 }
 0x495   :  { %6861 = vmatmul.mubr.msk.f32.gmra.mxu1 %vm1682_vm15, %v1674_v50  ;;  %v2090_v12 = vpop.trf.xlu1  ;;  %6890 = vmatmul.mubr.msk.f32.gmra.mxu0 %vm1682_vm15, %v2089_v55 }
 0x496   :  { %1993 = vmatprep.mubr.f32.mxu1 %v8009_v2  ;;  %2392 = vmatprep.mubr.f32.mxu0 %v8009_v2 }
 0x498   :  { %v1675_v15 = vpop.trf.xlu0 }
 0x499   :  { %6862 = vmatmul.mubr.msk.f32.gmra.mxu1 %vm1682_vm15, %v1675_v15  ;;  %v2091_v37 = vpop.trf.xlu1  ;;  %6891 = vmatmul.mubr.msk.f32.gmra.mxu0 %vm1682_vm15, %v2090_v12 }
 0x49a   :  { %1999 = vmatprep.mubr.f32.mxu1 %v8009_v2  ;;  %2398 = vmatprep.mubr.f32.mxu0 %v8009_v2 }
 0x49c   :  { %v1676_v3 = vpop.trf.xlu0 }
 0x49d   :  { %6863 = vmatmul.mubr.msk.f32.gmra.mxu1 %vm1682_vm15, %v1676_v3  ;;  %v2092_v48 = vpop.trf.xlu1  ;;  %6892 = vmatmul.mubr.msk.f32.gmra.mxu0 %vm1682_vm15, %v2091_v37 }
 0x49e   :  { %2005 = vmatprep.mubr.f32.mxu1 %v8009_v2  ;;  %2404 = vmatprep.mubr.f32.mxu0 %v8009_v2 }
 0x4a0   :  { %v1677_v20 = vpop.trf.xlu0 }
 0x4a1   :  { %6864 = vmatmul.mubr.msk.f32.gmra.mxu1 %vm1682_vm15, %v1677_v20  ;;  %v2093_v45 = vpop.trf.xlu1  ;;  %6893 = vmatmul.mubr.msk.f32.gmra.mxu0 %vm1682_vm15, %v2092_v48 }
 0x4a2   :  { %2011 = vmatprep.mubr.f32.mxu1 %v8009_v2  ;;  %2410 = vmatprep.mubr.f32.mxu0 %v8009_v2 }
 0x4a4   :  { %v1678_v42 = vpop.trf.xlu0 }
 0x4a5   :  { %6865 = vmatmul.mubr.msk.f32.gmra.mxu1 %vm1682_vm15, %v1678_v42  ;;  %v2094_v59 = vpop.trf.xlu1  ;;  %6894 = vmatmul.mubr.msk.f32.gmra.mxu0 %vm1682_vm15, %v2093_v45 }
 0x4a6   :  { %2017 = vmatprep.mubr.f32.mxu1 %v8009_v2  ;;  %2416 = vmatprep.mubr.f32.mxu0 %v8009_v2 }
 0x4a8   :  { %v1679_v0 = vpop.trf.xlu0 }
 0x4a9   :  { %6866 = vmatmul.mubr.msk.f32.gmra.mxu1 %vm1682_vm15, %v1679_v0  ;;  %v2095_v7 = vpop.trf.xlu1  ;;  %6895 = vmatmul.mubr.msk.f32.gmra.mxu0 %vm1682_vm15, %v2094_v59 }
 0x4aa   :  { %2023 = vmatprep.mubr.f32.mxu1 %v8009_v2  ;;  %2422 = vmatprep.mubr.f32.mxu0 %v8009_v2 }
 0x4ac   :  { %v1680_v22 = vpop.trf.xlu0 }
 0x4ad   :  { %6867 = vmatmul.mubr.msk.f32.gmra.mxu1 %vm1682_vm15, %v1680_v22  ;;  %6896 = vmatmul.mubr.msk.f32.gmra.mxu0 %vm1682_vm15, %v2095_v7  ;;  %v2096_v23 = vpop.trf.xlu1 }
 0x4ae   :  { %2029 = vmatprep.mubr.f32.mxu1 %v8009_v2  ;;  %3094 = vmatprep.mubr.f32.mxu0 %v8009_v2 }
 0x4b0   :  { %v1681_v16 = vpop.trf.xlu0 }
 0x4b1   :  { %6868 = vmatmul.mubr.msk.f32.gmra.mxu1 %vm1682_vm15, %v1681_v16  ;;  %v2097_v34 = vpop.trf.xlu1 }
 0x4b2   :  { %2428 = vmatprep.mubr.f32.mxu1 %v8009_v2 }
 0x4b5   :  { %6897 = vmatmul.mubr.msk.f32.vlgmr.msra.gmra.mxu1 %vm1682_vm15, %v2096_v23  ;;  %v2098_v25 = vpop.trf.xlu1 }
 0x4b6   :  { %2642 = vmatpush1.msra.mxu1 %v8794_v27  ;;  %2434 = vmatprep.mubr.f32.mxu1 %v8009_v2  ;;  %v7873_v27 = vpop.eup %7872 }
 0x4b7   :  { %2643 = vmatprep.subr.mxu1 %v8799_v49  ;;  %v7875_v49 = vpop.eup %7874  ;;  %v842_v54 = vsel %vm703_vm0, %v7873_v27, 0.0 }
 0x4b8   :  { %2644 = vmatpush1.msra.mxu1 %v8802_v30  ;;  %v845_v30 = vsel %vm703_vm0, %v7875_v49, 0.0 }
 0x4b9   :  { %3475 = vmatprep.subr.mxu1 %v8838_v57  ;;  %6898 = vmatmul.mubr.msk.f32.gmra.mxu1 %vm1682_vm15, %v2097_v34  ;;  %v2099_v53 = vpop.trf.xlu1 }
 0x4ba   :  { %2440 = vmatprep.mubr.f32.mxu1 %v8009_v2 }
 0x4bd   :  { %6899 = vmatmul.mubr.msk.f32.gmra.mxu1 %vm1682_vm15, %v2098_v25 }
 0x4be   :  { %2446 = vmatprep.mubr.f32.mxu1 %v8009_v2 }
 0x4c1   :  { %6900 = vmatmul.mubr.msk.f32.gmra.mxu1 %vm1682_vm15, %v2099_v53 }
 0x4c2   :  { %2677 = vmatprep.mubr.f32.mxu1 %v8009_v2 }
 0x4c9   :  { %846 = vadd.xlane.f32.xlu1 %v845_v30  ;;  %843 = vadd.xlane.f32.xlu0 %v842_v54 }
 0x4dc   :  { %v2469_v57 = vpop.trf.xlu0 }
 0x4dd   :  { %6901 = vmatmul.mubr.msk.f32.vlgmr.msra.gmra.mxu1 %vm1682_vm15, %v2469_v57 }
 0x4de   :  { %3476 = vmatpush1.msra.mxu1 %v8922_v40  ;;  %2683 = vmatprep.mubr.f32.mxu1 %v8009_v2 }
 0x4df   :  { %3477 = vmatprep.subr.mxu1 %v8841_v10 }
 0x4e0   :  { %3478 = vmatpush1.msra.mxu1 %v8925_v18  ;;  %v2470_v24 = vpop.trf.xlu0 }
 0x4e1   :  { %4309 = vmatprep.subr.mxu1 %v1613_v26  ;;  %6902 = vmatmul.mubr.msk.f32.gmra.mxu1 %vm1682_vm15, %v2470_v24 }
 0x4e2   :  { %v2886_v33 = vpop.trf.xlu1  ;;  %2689 = vmatprep.mubr.f32.mxu1 %v8009_v2 }
 0x4e3   :  { %6933 = vmatmul.mubr.msk.f32.vlgmr.msra.gmra.mxu0 %vm1682_vm15, %v2886_v33 }
 0x4e4   :  { %3893 = vmatpush1.msra.mxu0 %v8972_v11  ;;  %3100 = vmatprep.mubr.f32.mxu0 %v8009_v2  ;;  %v2471_v40 = vpop.trf.xlu0 }
 0x4e5   :  { %3894 = vmatprep.subr.mxu0 %v8893_v35  ;;  %6903 = vmatmul.mubr.msk.f32.gmra.mxu1 %vm1682_vm15, %v2471_v40 }
 0x4e6   :  { %3895 = vmatpush1.msra.mxu0 %v8975_v14  ;;  %v2887_v31 = vpop.trf.xlu1  ;;  %2695 = vmatprep.mubr.f32.mxu1 %v8009_v2 }
 0x4e7   :  { %6934 = vmatmul.mubr.msk.f32.gmra.mxu0 %vm1682_vm15, %v2887_v31 }
 0x4e8   :  { %3106 = vmatprep.mubr.f32.mxu0 %v8009_v2  ;;  %v2472_v10 = vpop.trf.xlu0 }
 0x4e9   :  { %6904 = vmatmul.mubr.msk.f32.gmra.mxu1 %vm1682_vm15, %v2472_v10 }
 0x4ea   :  { %v2888_v18 = vpop.trf.xlu1  ;;  %2701 = vmatprep.mubr.f32.mxu1 %v8009_v2 }
 0x4eb   :  { %6935 = vmatmul.mubr.msk.f32.gmra.mxu0 %vm1682_vm15, %v2888_v18 }
 0x4ec   :  { %3112 = vmatprep.mubr.f32.mxu0 %v8009_v2  ;;  %v2473_v35 = vpop.trf.xlu0 }
 0x4ed   :  { %6905 = vmatmul.mubr.msk.f32.gmra.mxu1 %vm1682_vm15, %v2473_v35 }
 0x4ee   :  { %v2889_v38 = vpop.trf.xlu1  ;;  %2707 = vmatprep.mubr.f32.mxu1 %v8009_v2 }
 0x4ef   :  { %6936 = vmatmul.mubr.msk.f32.gmra.mxu0 %vm1682_vm15, %v2889_v38 }
 0x4f0   :  { %3118 = vmatprep.mubr.f32.mxu0 %v8009_v2  ;;  %v2474_v11 = vpop.trf.xlu0 }
 0x4f1   :  { %6906 = vmatmul.mubr.msk.f32.gmra.mxu1 %vm1682_vm15, %v2474_v11 }
 0x4f2   :  { %v2890_v14 = vpop.trf.xlu1  ;;  %2713 = vmatprep.mubr.f32.mxu1 %v8009_v2 }
 0x4f3   :  { %6937 = vmatmul.mubr.msk.f32.gmra.mxu0 %vm1682_vm15, %v2890_v14 }
 0x4f4   :  { %3124 = vmatprep.mubr.f32.mxu0 %v8009_v2  ;;  %v2475_v19 = vpop.trf.xlu0 }
 0x4f5   :  { %6907 = vmatmul.mubr.msk.f32.gmra.mxu1 %vm1682_vm15, %v2475_v19  ;;  %v1845_v5 = vpop.f32.mrf.mxu1 }
 0x4f6   :  { %2485 = vxpose.xlu0.b32.start [1/2] (short) %v8805_v41, 128  ;;  %v2891_v55 = vpop.trf.xlu1  ;;  %2719 = vmatprep.mubr.f32.mxu1 %v8009_v2 }
 0x4f7   :  { %6938 = vmatmul.mubr.msk.f32.gmra.mxu0 %vm1682_vm15, %v2891_v55  ;;  %v1847_v50 = vpop.f32.mrf.mxu1 }
 0x4f8   :  { %3130 = vmatprep.mubr.f32.mxu0 %v8009_v2  ;;  %v2476_v12 = vpop.trf.xlu0  ;;  %v7349_v15 = vpack.c.bf16 %v1847_v50, %v1845_v5 }
 0x4f9   :  { %6908 = vmatmul.mubr.msk.f32.gmra.mxu1 %vm1682_vm15, %v2476_v12  ;;  %v1851_v37 = vpop.f32.mrf.mxu1 }
 0x4fa   :  { %2486 = vxpose.xlu0.b32.end [2/2] (short) %v8809_v28, 128  ;;  %v2892_v3 = vpop.trf.xlu1  ;;  %2725 = vmatprep.mubr.f32.mxu1 %v8009_v2  ;;  %6491 = vst [vmem:[#allocation9] sm:$0xff] %v7349_v15 }
 0x4fb   :  { %6939 = vmatmul.mubr.msk.f32.gmra.mxu0 %vm1682_vm15, %v2892_v3  ;;  %v1853_v41 = vpop.f32.mrf.mxu1 }
 0x4fc   :  { %2902 = vxpose.xlu1.b32.start [1/2] (short) %v8817_v4, 128  ;;  %3136 = vmatprep.mubr.f32.mxu0 %v8009_v2  ;;  %v2477_v48 = vpop.trf.xlu0  ;;  %v7350_v20 = vpack.c.bf16 %v1853_v41, %v1851_v37 }
 0x4fd   :  { %6909 = vmatmul.mubr.msk.f32.gmra.mxu1 %vm1682_vm15, %v2477_v48  ;;  %v1857_v45 = vpop.f32.mrf.mxu1 }
 0x4fe   :  { %v2893_v42 = vpop.trf.xlu1  ;;  %2731 = vmatprep.mubr.f32.mxu1 %v8009_v2  ;;  %6492 = vst [vmem:[#allocation9 + $0x8] sm:$0xff] %v7350_v20  ;;  %v2262_v28 = vpop.f32.mrf.mxu0 }
 0x4ff   :  { %6940 = vmatmul.mubr.msk.f32.gmra.mxu0 %vm1682_vm15, %v2893_v42  ;;  %v1859_v59 = vpop.f32.mrf.mxu1 }
 0x500   :  { %2903 = vxpose.xlu1.b32.end [2/2] (short) %v8824_v32, 128  ;;  %3142 = vmatprep.mubr.f32.mxu0 %v8009_v2  ;;  %v2478_v4 = vpop.trf.xlu0  ;;  %v7351_v0 = vpack.c.bf16 %v1859_v59, %v1857_v45  ;;  %v2264_v7 = vpop.f32.mrf.mxu0 }
 0x501   :  { %6910 = vmatmul.mubr.msk.f32.gmra.mxu1 %vm1682_vm15, %v2478_v4  ;;  %v1863_v22 = vpop.f32.mrf.mxu1  ;;  %v7381_v23 = vpack.c.bf16 %v2264_v7, %v2262_v28 }
 0x502   :  { %v2894_v61 = vpop.trf.xlu1  ;;  %2737 = vmatprep.mubr.f32.mxu1 %v8009_v2  ;;  %6493 = vst [vmem:[#allocation9 + $0x10] sm:$0xff] %v7351_v0  ;;  %v2268_v29 = vpop.f32.mrf.mxu0 }
 0x503   :  { %6941 = vmatmul.mubr.msk.f32.gmra.mxu0 %vm1682_vm15, %v2894_v61  ;;  %v1865_v13 = vpop.f32.mrf.mxu1  ;;  %6523 = vst [vmem:[#allocation9 + $0x100] sm:$0xff] %v7381_v23 }
 0x504   :  { %3148 = vmatprep.mubr.f32.mxu0 %v8009_v2  ;;  %v2479_v32 = vpop.trf.xlu0  ;;  %v7352_v16 = vpack.c.bf16 %v1865_v13, %v1863_v22  ;;  %v2270_v34 = vpop.f32.mrf.mxu0 }
 0x505   :  { %6911 = vmatmul.mubr.msk.f32.gmra.mxu1 %vm1682_vm15, %v2479_v32  ;;  %v1869_v63 = vpop.f32.mrf.mxu1  ;;  %v7382_v21 = vpack.c.bf16 %v2270_v34, %v2268_v29 }
 0x506   :  { %v2895_v25 = vpop.trf.xlu1  ;;  %2743 = vmatprep.mubr.f32.mxu1 %v8009_v2  ;;  %6494 = vst [vmem:[#allocation9 + $0x18] sm:$0xff] %v7352_v16  ;;  %v2274_v53 = vpop.f32.mrf.mxu0 }
 0x507   :  { %6942 = vmatmul.mubr.msk.f32.gmra.mxu0 %vm1682_vm15, %v2895_v25  ;;  %v1871_v27 = vpop.f32.mrf.mxu1  ;;  %6524 = vst [vmem:[#allocation9 + $0x108] sm:$0xff] %v7382_v21 }
 0x508   :  { %3154 = vmatprep.mubr.f32.mxu0 %v8009_v2  ;;  %v2480_v49 = vpop.trf.xlu0  ;;  %v2276_v30 = vpop.f32.mrf.mxu0  ;;  %v7353_v54 = vpack.c.bf16 %v1871_v27, %v1869_v63 }
 0x509   :  { %6912 = vmatmul.mubr.msk.f32.gmra.mxu1 %vm1682_vm15, %v2480_v49  ;;  %v1875_v57 = vpop.f32.mrf.mxu1  ;;  %v7383_v26 = vpack.c.bf16 %v2276_v30, %v2274_v53 }
 0x50a   :  { %v2896_v24 = vpop.trf.xlu1  ;;  %2749 = vmatprep.mubr.f32.mxu1 %v8009_v2  ;;  %v2280_v33 = vpop.f32.mrf.mxu0  ;;  %6495 = vst [vmem:[#allocation9 + $0x20] sm:$0xff] %v7353_v54 }
 0x50b   :  { %6943 = vmatmul.mubr.msk.f32.gmra.mxu0 %vm1682_vm15, %v2896_v24  ;;  %v1877_v40 = vpop.f32.mrf.mxu1  ;;  %6525 = vst [vmem:[#allocation9 + $0x110] sm:$0xff] %v7383_v26 }
 0x50c   :  { %3160 = vmatprep.mubr.f32.mxu0 %v8009_v2  ;;  %v2481_v31 = vpop.trf.xlu0  ;;  %v2282_v10 = vpop.f32.mrf.mxu0  ;;  %v7354_v18 = vpack.c.bf16 %v1877_v40, %v1875_v57 }
 0x50d   :  { %6913 = vmatmul.mubr.msk.f32.gmra.mxu1 %vm1682_vm15, %v2481_v31  ;;  %v1881_v35 = vpop.f32.mrf.mxu1  ;;  %v7384_v38 = vpack.c.bf16 %v2282_v10, %v2280_v33 }
 0x50e   :  { %v2897_v11 = vpop.trf.xlu1  ;;  %2755 = vmatprep.mubr.f32.mxu1 %v8009_v2  ;;  %v2286_v14 = vpop.f32.mrf.mxu0  ;;  %6496 = vst [vmem:[#allocation9 + $0x28] sm:$0xff] %v7354_v18 }
 0x50f   :  { %6944 = vmatmul.mubr.msk.f32.gmra.mxu0 %vm1682_vm15, %v2897_v11  ;;  %v1883_v19 = vpop.f32.mrf.mxu1  ;;  %6526 = vst [vmem:[#allocation9 + $0x118] sm:$0xff] %v7384_v38 }
 0x510   :  { %3166 = vmatprep.mubr.f32.mxu0 %v8009_v2  ;;  %v2482_v5 = vpop.trf.xlu0  ;;  %v2288_v55 = vpop.f32.mrf.mxu0  ;;  %v7355_v50 = vpack.c.bf16 %v1883_v19, %v1881_v35 }
 0x511   :  { %6914 = vmatmul.mubr.msk.f32.gmra.mxu1 %vm1682_vm15, %v2482_v5  ;;  %v1887_v12 = vpop.f32.mrf.mxu1  ;;  %v7385_v15 = vpack.c.bf16 %v2288_v55, %v2286_v14 }
 0x512   :  { %v2898_v37 = vpop.trf.xlu1  ;;  %2761 = vmatprep.mubr.f32.mxu1 %v8009_v2  ;;  %v2292_v3 = vpop.f32.mrf.mxu0  ;;  %6497 = vst [vmem:[#allocation9 + $0x30] sm:$0xff] %v7355_v50 }
 0x513   :  { %6945 = vmatmul.mubr.msk.f32.gmra.mxu0 %vm1682_vm15, %v2898_v37  ;;  %v1889_v41 = vpop.f32.mrf.mxu1  ;;  %6527 = vst [vmem:[#allocation9 + $0x120] sm:$0xff] %v7385_v15 }
 0x514   :  { %3172 = vmatprep.mubr.f32.mxu0 %v8009_v2  ;;  %v2483_v48 = vpop.trf.xlu0  ;;  %v2294_v20 = vpop.f32.mrf.mxu0  ;;  %v7356_v45 = vpack.c.bf16 %v1889_v41, %v1887_v12 }
 0x515   :  { %6915 = vmatmul.mubr.msk.f32.gmra.mxu1 %vm1682_vm15, %v2483_v48  ;;  %v1893_v42 = vpop.f32.mrf.mxu1  ;;  %v7386_v28 = vpack.c.bf16 %v2294_v20, %v2292_v3 }
 0x516   :  { %v2899_v59 = vpop.trf.xlu1  ;;  %2767 = vmatprep.mubr.f32.mxu1 %v8009_v2  ;;  %v2298_v4 = vpop.f32.mrf.mxu0  ;;  %6498 = vst [vmem:[#allocation9 + $0x38] sm:$0xff] %v7356_v45 }
 0x517   :  { %6946 = vmatmul.mubr.msk.f32.gmra.mxu0 %vm1682_vm15, %v2899_v59  ;;  %v1895_v0 = vpop.f32.mrf.mxu1  ;;  %6528 = vst [vmem:[#allocation9 + $0x128] sm:$0xff] %v7386_v28 }
 0x518   :  { %3178 = vmatprep.mubr.f32.mxu0 %v8009_v2  ;;  %v2484_v7 = vpop.trf.xlu0  ;;  %v7357_v22 = vpack.c.bf16 %v1895_v0, %v1893_v42  ;;  %v2300_v23 = vpop.f32.mrf.mxu0 }
 0x519   :  { %6916 = vmatmul.mubr.msk.f32.gmra.mxu1 %vm1682_vm15, %v2484_v7  ;;  %v1899_v61 = vpop.f32.mrf.mxu1  ;;  %v7387_v29 = vpack.c.bf16 %v2300_v23, %v2298_v4 }
 0x51a   :  { %v2900_v13 = vpop.trf.xlu1  ;;  %6499 = vst [vmem:[#allocation9 + $0x40] sm:$0xff] %v7357_v22  ;;  %v2304_v32 = vpop.f32.mrf.mxu0  ;;  %2773 = vmatprep.mubr.f32.mxu1 %v8009_v2 }
 0x51b   :  { %6947 = vmatmul.mubr.msk.f32.gmra.mxu0 %vm1682_vm15, %v2900_v13  ;;  %v1901_v16 = vpop.f32.mrf.mxu1  ;;  %6529 = vst [vmem:[#allocation9 + $0x130] sm:$0xff] %v7387_v29 }
 0x51c   :  { %3184 = vmatprep.mubr.f32.mxu0 %v8009_v2  ;;  %v7358_v34 = vpack.c.bf16 %v1901_v16, %v1899_v61  ;;  %v2306_v63 = vpop.f32.mrf.mxu0 }
 0x51d   :  { %v1905_v21 = vpop.f32.mrf.mxu1  ;;  %v7388_v25 = vpack.c.bf16 %v2306_v63, %v2304_v32 }
 0x51e   :  { %v2901_v53 = vpop.trf.xlu1  ;;  %6500 = vst [vmem:[#allocation9 + $0x48] sm:$0xff] %v7358_v34  ;;  %v2310_v27 = vpop.f32.mrf.mxu0 }
 0x51f   :  { %6948 = vmatmul.mubr.msk.f32.gmra.mxu0 %vm1682_vm15, %v2901_v53  ;;  %v1907_v49 = vpop.f32.mrf.mxu1  ;;  %6530 = vst [vmem:[#allocation9 + $0x138] sm:$0xff] %v7388_v25 }
 0x520   :  { %v7359_v30 = vpack.c.bf16 %v1907_v49, %v1905_v21  ;;  %v2312_v54 = vpop.f32.mrf.mxu0  ;;  %3190 = vmatprep.mubr.f32.mxu0 %v8009_v2 }
 0x521   :  { %v1911_v57 = vpop.f32.mrf.mxu1  ;;  %v7389_v26 = vpack.c.bf16 %v2312_v54, %v2310_v27 }
 0x522   :  { %6501 = vst [vmem:[#allocation9 + $0x50] sm:$0xff] %v7359_v30  ;;  %v2316_v24 = vpop.f32.mrf.mxu0 }
 0x523   :  { %v1913_v33 = vpop.f32.mrf.mxu1  ;;  %6531 = vst [vmem:[#allocation9 + $0x140] sm:$0xff] %v7389_v26 }
 0x524   :  { %v7360_v40 = vpack.c.bf16 %v1913_v33, %v1911_v57  ;;  %v2318_v31 = vpop.f32.mrf.mxu0 }
 0x525   :  { %v1917_v10 = vpop.f32.mrf.mxu1  ;;  %v7390_v18 = vpack.c.bf16 %v2318_v31, %v2316_v24 }
 0x526   :  { %6502 = vst [vmem:[#allocation9 + $0x58] sm:$0xff] %v7360_v40 }
 0x527   :  { %v1919_v35 = vpop.f32.mrf.mxu1  ;;  %6532 = vst [vmem:[#allocation9 + $0x148] sm:$0xff] %v7390_v18 }
 0x528   :  { %v7361_v38 = vpack.c.bf16 %v1919_v35, %v1917_v10 }
 0x529   :  { %v1923_v11 = vpop.f32.mrf.mxu1  ;;  %v2322_v14 = vpop.f32.mrf.mxu0 }
 0x52a   :  { %6503 = vst [vmem:[#allocation9 + $0x60] sm:$0xff] %v7361_v38 }
 0x52b   :  { %v1925_v19 = vpop.f32.mrf.mxu1  ;;  %v2324_v5 = vpop.f32.mrf.mxu0 }
 0x52c   :  { %v7362_v55 = vpack.c.bf16 %v1925_v19, %v1923_v11  ;;  %v7391_v50 = vpack.c.bf16 %v2324_v5, %v2322_v14 }
 0x52d   :  { %v1929_v12 = vpop.f32.mrf.mxu1  ;;  %v2328_v15 = vpop.f32.mrf.mxu0 }
 0x52e   :  { %6504 = vst [vmem:[#allocation9 + $0x68] sm:$0xff] %v7362_v55  ;;  %6533 = vst [vmem:[#allocation9 + $0x150] sm:$0xff] %v7391_v50 }
 0x52f   :  { %v1931_v37 = vpop.f32.mrf.mxu1  ;;  %v2330_v3 = vpop.f32.mrf.mxu0 }
 0x530   :  { %v7363_v41 = vpack.c.bf16 %v1931_v37, %v1929_v12  ;;  %v7392_v48 = vpack.c.bf16 %v2330_v3, %v2328_v15 }
 0x531   :  { %v1935_v20 = vpop.f32.mrf.mxu1  ;;  %v2334_v45 = vpop.f32.mrf.mxu0 }
 0x532   :  { %6505 = vst [vmem:[#allocation9 + $0x70] sm:$0xff] %v7363_v41  ;;  %6534 = vst [vmem:[#allocation9 + $0x158] sm:$0xff] %v7392_v48 }
 0x533   :  { %3287 = vxpose.xlu0.b32.start [1/2] (short) %v8928_v46, 128  ;;  %v1937_v42 = vpop.f32.mrf.mxu1  ;;  %v2336_v28 = vpop.f32.mrf.mxu0 }
 0x534   :  { %v7364_v59 = vpack.c.bf16 %v1937_v42, %v1935_v20  ;;  %v7393_v4 = vpack.c.bf16 %v2336_v28, %v2334_v45 }
 0x535   :  { %v1941_v0 = vpop.f32.mrf.mxu1  ;;  %v2340_v7 = vpop.f32.mrf.mxu0 }
 0x536   :  { %6506 = vst [vmem:[#allocation9 + $0x78] sm:$0xff] %v7364_v59  ;;  %6535 = vst [vmem:[#allocation9 + $0x160] sm:$0xff] %v7393_v4 }
 0x537   :  { %3288 = vxpose.xlu0.b32.end [2/2] (short) %v8931_v39, 128  ;;  %v1943_v22 = vpop.f32.mrf.mxu1  ;;  %v2342_v23 = vpop.f32.mrf.mxu0 }
 0x538   :  { %v7365_v61 = vpack.c.bf16 %v1943_v22, %v1941_v0  ;;  %v7394_v29 = vpack.c.bf16 %v2342_v23, %v2340_v7 }
 0x539   :  { %3704 = vxpose.xlu1.b32.start [1/2] (short) %v8978_v17, 128  ;;  %v1947_v13 = vpop.f32.mrf.mxu1  ;;  %v2346_v32 = vpop.f32.mrf.mxu0 }
 0x53a   :  { %6507 = vst [vmem:[#allocation9 + $0x80] sm:$0xff] %v7365_v61  ;;  %6536 = vst [vmem:[#allocation9 + $0x168] sm:$0xff] %v7394_v29 }
 0x53b   :  { %v1949_v46 = vpop.f32.mrf.mxu1  ;;  %v2348_v16 = vpop.f32.mrf.mxu0 }
 0x53c   :  { %v7366_v34 = vpack.c.bf16 %v1949_v46, %v1947_v13  ;;  %v7395_v63 = vpack.c.bf16 %v2348_v16, %v2346_v32 }
 0x53d   :  { %3705 = vxpose.xlu1.b32.end [2/2] (short) %v8981_v51, 128  ;;  %v1953_v21 = vpop.f32.mrf.mxu1  ;;  %v2352_v25 = vpop.f32.mrf.mxu0 }
 0x53e   :  { %6508 = vst [vmem:[#allocation9 + $0x88] sm:$0xff] %v7366_v34  ;;  %6537 = vst [vmem:[#allocation9 + $0x170] sm:$0xff] %v7395_v63 }
 0x53f   :  { %v1955_v39 = vpop.f32.mrf.mxu1  ;;  %v2354_v53 = vpop.f32.mrf.mxu0 }
 0x540   :  { %v7367_v27 = vpack.c.bf16 %v1955_v39, %v1953_v21  ;;  %v7396_v49 = vpack.c.bf16 %v2354_v53, %v2352_v25  ;;  %v921_v21 = vstv %s6820_s0 }
 0x541   :  { %v1959_v30 = vpop.f32.mrf.mxu1  ;;  %v2358_v17 = vpop.f32.mrf.mxu0 }
 0x542   :  { %6509 = vst [vmem:[#allocation9 + $0x90] sm:$0xff] %v7367_v27  ;;  %6538 = vst [vmem:[#allocation9 + $0x178] sm:$0xff] %v7396_v49 }
 0x543   :  { %v1961_v54 = vpop.f32.mrf.mxu1  ;;  %v2360_v57 = vpop.f32.mrf.mxu0 }
 0x544   :  { %v7368_v26 = vpack.c.bf16 %v1961_v54, %v1959_v30  ;;  %v7397_v24 = vpack.c.bf16 %v2360_v57, %v2358_v17  ;;  %v9567_v30 = vld [vmem:[#allocation16_spill] sm:$0xff]  ;;  %v9568_v17 = vld [vmem:[#allocation14_spill] sm:$0xff] }
 0x545   :  { %v1965_v33 = vpop.f32.mrf.mxu1  ;;  %v2364_v40 = vpop.f32.mrf.mxu0  ;;  %vm937_vm0 = vcmp.lt.s32.totalorder %v9567_v30, %v921_v21  ;;  %vm936_vm1 = vcmp.lt.s32.totalorder %v9568_v17, %v921_v21 }
 0x546   :  { %6510 = vst [vmem:[#allocation9 + $0x98] sm:$0xff] %v7368_v26  ;;  %6539 = vst [vmem:[#allocation9 + $0x180] sm:$0xff] %v7397_v24 }
 0x547   :  { %v1967_v51 = vpop.f32.mrf.mxu1  ;;  %v2366_v31 = vpop.f32.mrf.mxu0 }
 0x548   :  { %v7369_v10 = vpack.c.bf16 %v1967_v51, %v1965_v33  ;;  %v7398_v18 = vpack.c.bf16 %v2366_v31, %v2364_v40  ;;  %v6836_v31 = vsel %vm937_vm0, 1.0, %v8009_v2 }
 0x549   :  { %v1971_v35 = vpop.f32.mrf.mxu1  ;;  %v2370_v38 = vpop.f32.mrf.mxu0 }
 0x54a   :  { %6511 = vst [vmem:[#allocation9 + $0xa0] sm:$0xff] %v7369_v10  ;;  %6540 = vst [vmem:[#allocation9 + $0x188] sm:$0xff] %v7398_v18  ;;  %v6835_v18 = vsel %vm936_vm1, 1.0, %v8009_v2 }
 0x54b   :  { %v1973_v11 = vpop.f32.mrf.mxu1  ;;  %v2372_v14 = vpop.f32.mrf.mxu0 }
 0x54c   :  { %v7370_v19 = vpack.c.bf16 %v1973_v11, %v1971_v35  ;;  %v7399_v5 = vpack.c.bf16 %v2372_v14, %v2370_v38 }
 0x54d   :  { %v1977_v55 = vpop.f32.mrf.mxu1  ;;  %v2376_v50 = vpop.f32.mrf.mxu0 }
 0x54e   :  { %6512 = vst [vmem:[#allocation9 + $0xa8] sm:$0xff] %v7370_v19  ;;  %6541 = vst [vmem:[#allocation9 + $0x190] sm:$0xff] %v7399_v5 }
 0x54f   :  { %v1979_v12 = vpop.f32.mrf.mxu1  ;;  %v2378_v15 = vpop.f32.mrf.mxu0 }
 0x550   :  { %v7371_v37 = vpack.c.bf16 %v1979_v12, %v1977_v55  ;;  %v7400_v3 = vpack.c.bf16 %v2378_v15, %v2376_v50 }
 0x551   :  { %v1983_v41 = vpop.f32.mrf.mxu1  ;;  %v2382_v48 = vpop.f32.mrf.mxu0 }
 0x552   :  { %v847_v20 = vpop.xlane.xlu1 %846  ;;  %v844_v45 = vpop.xlane.xlu0 %843  ;;  %6513 = vst [vmem:[#allocation9 + $0xb0] sm:$0xff] %v7371_v37  ;;  %6542 = vst [vmem:[#allocation9 + $0x198] sm:$0xff] %v7400_v3 }
 0x553   :  { %7876 = vlog2.f32 %v847_v20  ;;  %v1985_v42 = vpop.f32.mrf.mxu1  ;;  %v2384_v28 = vpop.f32.mrf.mxu0 }
 0x554   :  { %7878 = vlog2.f32 %v844_v45  ;;  %v7372_v59 = vpack.c.bf16 %v1985_v42, %v1983_v41  ;;  %v7401_v4 = vpack.c.bf16 %v2384_v28, %v2382_v48 }
 0x555   :  { %v1989_v0 = vpop.f32.mrf.mxu1  ;;  %v2388_v7 = vpop.f32.mrf.mxu0 }
 0x556   :  { %6514 = vst [vmem:[#allocation9 + $0xb8] sm:$0xff] %v7372_v59  ;;  %6543 = vst [vmem:[#allocation9 + $0x1a0] sm:$0xff] %v7401_v4 }
 0x557   :  { %v1991_v22 = vpop.f32.mrf.mxu1  ;;  %v2390_v23 = vpop.f32.mrf.mxu0 }
 0x558   :  { %v7373_v61 = vpack.c.bf16 %v1991_v22, %v1989_v0  ;;  %v7402_v29 = vpack.c.bf16 %v2390_v23, %v2388_v7 }
 0x559   :  { %v1995_v13 = vpop.f32.mrf.mxu1  ;;  %v2394_v32 = vpop.f32.mrf.mxu0 }
 0x55a   :  { %6515 = vst [vmem:[#allocation9 + $0xc0] sm:$0xff] %v7373_v61  ;;  %6544 = vst [vmem:[#allocation9 + $0x1a8] sm:$0xff] %v7402_v29 }
 0x55b   :  { %v1997_v46 = vpop.f32.mrf.mxu1  ;;  %v2396_v16 = vpop.f32.mrf.mxu0 }
 0x55c   :  { %v7374_v34 = vpack.c.bf16 %v1997_v46, %v1995_v13  ;;  %v7403_v63 = vpack.c.bf16 %v2396_v16, %v2394_v32 }
 0x55d   :  { %v2001_v25 = vpop.f32.mrf.mxu1  ;;  %v2400_v39 = vpop.f32.mrf.mxu0 }
 0x55e   :  { %6516 = vst [vmem:[#allocation9 + $0xc8] sm:$0xff] %v7374_v34  ;;  %6545 = vst [vmem:[#allocation9 + $0x1b0] sm:$0xff] %v7403_v63 }
 0x55f   :  { %v2003_v53 = vpop.f32.mrf.mxu1  ;;  %v2402_v27 = vpop.f32.mrf.mxu0 }
 0x560   :  { %v7877_v49 = vpop.eup %7876  ;;  %v7375_v54 = vpack.c.bf16 %v2003_v53, %v2001_v25  ;;  %v7404_v57 = vpack.c.bf16 %v2402_v27, %v2400_v39 }
 0x561   :  { %v7879_v26 = vpop.eup %7878  ;;  %v879_v24 = vmul.f32 0.6931472, %v7877_v49  ;;  %v2007_v33 = vpop.f32.mrf.mxu1 }
 0x562   :  { %v2406_v40 = vpop.f32.mrf.mxu0  ;;  %v877_v51 = vmul.f32 0.6931472, %v7879_v26  ;;  %6517 = vst [vmem:[#allocation9 + $0xd0] sm:$0xff] %v7375_v54  ;;  %6546 = vst [vmem:[#allocation9 + $0x1b8] sm:$0xff] %v7404_v57 }
 0x563   :  { %v895_v10 = vadd.f32 %v879_v24, %v9565_v9  ;;  %v2009_v35 = vpop.f32.mrf.mxu1 }
 0x564   :  { %v2408_v38 = vpop.f32.mrf.mxu0  ;;  %v894_v11 = vadd.f32 %v877_v51, %v8417_v6  ;;  %v7376_v14 = vpack.c.bf16 %v2009_v35, %v2007_v33 }
 0x565   :  { %v7405_v19 = vpack.c.bf16 %v2408_v38, %v2406_v40  ;;  %v2013_v5 = vpop.f32.mrf.mxu1  ;;  %v985_v50 = vadd.f32 %v6836_v31, %v895_v10 }
 0x566   :  { %v2412_v55 = vpop.f32.mrf.mxu0  ;;  %v984_v12 = vadd.f32 %v6835_v18, %v894_v11  ;;  %6518 = vst [vmem:[#allocation9 + $0xd8] sm:$0xff] %v7376_v14 }
 0x567   :  { %6547 = vst [vmem:[#allocation9 + $0x1c0] sm:$0xff] %v7405_v19  ;;  %v2015_v15 = vpop.f32.mrf.mxu1 }
 0x568   :  { %v2414_v37 = vpop.f32.mrf.mxu0  ;;  %v1035_v3 = vmax.f32 %v984_v12, %v985_v50  ;;  %v7377_v41 = vpack.c.bf16 %v2015_v15, %v2013_v5 }
 0x569   :  { %v7406_v48 = vpack.c.bf16 %v2414_v37, %v2412_v55  ;;  %v2019_v9 = vpop.f32.mrf.mxu1 }
 0x56a   :  { %v2418_v20 = vpop.f32.mrf.mxu0  ;;  %v1036_v45 = vrot.slane %v1035_v3, 4  ;;  %6519 = vst [vmem:[#allocation9 + $0xe0] sm:$0xff] %v7377_v41 }
 0x56b   :  { %6548 = vst [vmem:[#allocation9 + $0x1c8] sm:$0xff] %v7406_v48  ;;  %v2021_v42 = vpop.f32.mrf.mxu1 }
 0x56c   :  { %v2420_v6 = vpop.f32.mrf.mxu0  ;;  %v1037_v28 = vmax.f32 %v1035_v3, %v1036_v45  ;;  %v7378_v59 = vpack.c.bf16 %v2021_v42, %v2019_v9 }
 0x56d   :  { %v7407_v4 = vpack.c.bf16 %v2420_v6, %v2418_v20  ;;  %v2025_v0 = vpop.f32.mrf.mxu1 }
 0x56e   :  { %v2424_v7 = vpop.f32.mrf.mxu0  ;;  %v1038_v22 = vrot.slane %v1037_v28, 2  ;;  %6520 = vst [vmem:[#allocation9 + $0xe8] sm:$0xff] %v7378_v59 }
 0x56f   :  { %6549 = vst [vmem:[#allocation9 + $0x1d0] sm:$0xff] %v7407_v4  ;;  %v2027_v23 = vpop.f32.mrf.mxu1 }
 0x570   :  { %v2426_v61 = vpop.f32.mrf.mxu0  ;;  %v1039_v29 = vmax.f32 %v1037_v28, %v1038_v22  ;;  %3319 = vxpose.xlu0.b32.start [1/2] (short) %v8862_v52, 128  ;;  %v7379_v13 = vpack.c.bf16 %v2027_v23, %v2025_v0 }
 0x571   :  { %v7408_v32 = vpack.c.bf16 %v2426_v61, %v2424_v7  ;;  %v2031_v46 = vpop.f32.mrf.mxu1 }
 0x572   :  { %v1040_v16 = vrot.slane %v1039_v29, 1  ;;  %v2501_v34 = vpop.trf.xlu0  ;;  %6521 = vst [vmem:[#allocation9 + $0xf0] sm:$0xff] %v7379_v13 }
 0x573   :  { %6550 = vst [vmem:[#allocation9 + $0x1d8] sm:$0xff] %v7408_v32  ;;  %6917 = vmatmul.mubr.msk.f32.gmra.mxu1 %vm1682_vm15, %v2501_v34  ;;  %v2033_v63 = vpop.f32.mrf.mxu1 }
 0x574   :  { %v1041_v21 = vmax.f32 %v1039_v29, %v1040_v16  ;;  %3320 = vxpose.xlu0.b32.end [2/2] (short) %v8865_v47, 128  ;;  %2779 = vmatprep.mubr.f32.mxu1 %v8009_v2  ;;  %v7380_v25 = vpack.c.bf16 %v2033_v63, %v2031_v46 }
 0x575   :  { %v2430_v39 = vpop.f32.mrf.mxu1 }
 0x576   :  { %v1056_v53 = vsub.f32 %v984_v12, %v1041_v21  ;;  %v1057_v27 = vsub.f32 %v985_v50, %v1041_v21  ;;  %3736 = vxpose.xlu1.b32.start [1/2] (short) %v8896_v44, 128  ;;  %v2502_v52 = vpop.trf.xlu0  ;;  %6522 = vst [vmem:[#allocation9 + $0xf8] sm:$0xff] %v7380_v25 }
 0x577   :  { %6918 = vmatmul.mubr.msk.f32.gmra.mxu1 %vm1682_vm15, %v2502_v52  ;;  %v2432_v49 = vpop.f32.mrf.mxu1 }
 0x578   :  { %v1086_v30 = vmul.f32 1.442695, %v1056_v53  ;;  %v1088_v17 = vmul.f32 1.442695, %v1057_v27  ;;  %2785 = vmatprep.mubr.f32.mxu1 %v8009_v2  ;;  %v2918_v54 = vpop.trf.xlu1  ;;  %v7409_v57 = vpack.c.bf16 %v2432_v49, %v2430_v39 }
 0x579   :  { %6949 = vmatmul.mubr.msk.f32.gmra.mxu0 %vm1682_vm15, %v2918_v54  ;;  %v2436_v47 = vpop.f32.mrf.mxu1 }
 0x57a   :  { %7880 = vpow2.f32 %v1086_v30  ;;  %3737 = vxpose.xlu1.b32.end [2/2] (short) %v8899_v60, 128  ;;  %v2503_v26 = vpop.trf.xlu0  ;;  %3196 = vmatprep.mubr.f32.mxu0 %v8009_v2  ;;  %6551 = vst [vmem:[#allocation9 + $0x1e0] sm:$0xff] %v7409_v57 }
 0x57b   :  { %7882 = vpow2.f32 %v1088_v17  ;;  %6919 = vmatmul.mubr.msk.f32.gmra.mxu1 %vm1682_vm15, %v2503_v26  ;;  %v2438_v44 = vpop.f32.mrf.mxu1 }
 0x57c   :  { %2791 = vmatprep.mubr.f32.mxu1 %v8009_v2  ;;  %v2919_v24 = vpop.trf.xlu1  ;;  %v7410_v33 = vpack.c.bf16 %v2438_v44, %v2436_v47  ;;  %v9200_v47 = vld [vmem:[#allocation4 + $0xe8] sm:$0xff]  ;;  %v9204_v44 = vld [vmem:[#allocation4 + $0xf8] sm:$0xff] }
 0x57d   :  { %6950 = vmatmul.mubr.msk.f32.gmra.mxu0 %vm1682_vm15, %v2919_v24  ;;  %v2442_v40 = vpop.f32.mrf.mxu1 }
 0x57e   :  { %v2504_v51 = vpop.trf.xlu0  ;;  %3202 = vmatprep.mubr.f32.mxu0 %v8009_v2  ;;  %6552 = vst [vmem:[#allocation9 + $0x1e8] sm:$0xff] %v7410_v33  ;;  %v9208_v33 = vld [vmem:[#allocation4 + $0xe0] sm:$0xff] }
 0x57f   :  { %6920 = vmatmul.mubr.msk.f32.gmra.mxu1 %vm1682_vm15, %v2504_v51  ;;  %v2444_v60 = vpop.f32.mrf.mxu1  ;;  %v9212_v51 = vld [vmem:[#allocation4 + $0xf0] sm:$0xff] }
 0x580   :  { %2797 = vmatprep.mubr.f32.mxu1 %v8009_v2  ;;  %v2920_v31 = vpop.trf.xlu1  ;;  %v7411_v10 = vpack.c.bf16 %v2444_v60, %v2442_v40 }
 0x581   :  { %6951 = vmatmul.mubr.msk.f32.gmra.mxu0 %vm1682_vm15, %v2920_v31  ;;  %v2448_v18 = vpop.f32.mrf.mxu1 }
 0x582   :  { %v2505_v35 = vpop.trf.xlu0  ;;  %3208 = vmatprep.mubr.f32.mxu0 %v8009_v2  ;;  %6553 = vst [vmem:[#allocation9 + $0x1f0] sm:$0xff] %v7411_v10 }
 0x583   :  { %6921 = vmatmul.mubr.msk.f32.gmra.mxu1 %vm1682_vm15, %v2505_v35  ;;  %v2450_v38 = vpop.f32.mrf.mxu1 }
 0x584   :  { %2803 = vmatprep.mubr.f32.mxu1 %v8009_v2  ;;  %v2921_v11 = vpop.trf.xlu1  ;;  %v7412_v14 = vpack.c.bf16 %v2450_v38, %v2448_v18 }
 0x585   :  { %6952 = vmatmul.mubr.msk.f32.gmra.mxu0 %vm1682_vm15, %v2921_v11 }
 0x586   :  { %v2506_v19 = vpop.trf.xlu0  ;;  %3214 = vmatprep.mubr.f32.mxu0 %v8009_v2  ;;  %6554 = vst [vmem:[#allocation9 + $0x1f8] sm:$0xff] %v7412_v14 }
 0x587   :  { %v9155_v5 = vpop.eup %7880  ;;  %6922 = vmatmul.mubr.msk.f32.gmra.mxu1 %vm1682_vm15, %v2506_v19 }
 0x588   :  { %v9158_v55 = vpop.eup %7882  ;;  %2809 = vmatprep.mubr.f32.mxu1 %v8009_v2  ;;  %v2922_v50 = vpop.trf.xlu1 }
 0x589   :  { %v1139_v12 = vadd.f32 %v9158_v55, %v9155_v5  ;;  %6953 = vmatmul.mubr.msk.f32.gmra.mxu0 %vm1682_vm15, %v2922_v50 }
 0x58a   :  { %v2507_v15 = vpop.trf.xlu0  ;;  %3220 = vmatprep.mubr.f32.mxu0 %v8009_v2 }
 0x58b   :  { %v1140_v37 = vrot.slane %v1139_v12, 4  ;;  %6923 = vmatmul.mubr.msk.f32.gmra.mxu1 %vm1682_vm15, %v2507_v15 }
 0x58c   :  { %2815 = vmatprep.mubr.f32.mxu1 %v8009_v2  ;;  %v2923_v3 = vpop.trf.xlu1 }
 0x58d   :  { %v1141_v41 = vadd.f32 %v1140_v37, %v1139_v12  ;;  %6954 = vmatmul.mubr.msk.f32.gmra.mxu0 %vm1682_vm15, %v2923_v3 }
 0x58e   :  { %v2508_v48 = vpop.trf.xlu0  ;;  %3226 = vmatprep.mubr.f32.mxu0 %v8009_v2 }
 0x58f   :  { %v1142_v9 = vrot.slane %v1141_v41, 2  ;;  %6924 = vmatmul.mubr.msk.f32.gmra.mxu1 %vm1682_vm15, %v2508_v48 }
 0x590   :  { %2821 = vmatprep.mubr.f32.mxu1 %v8009_v2  ;;  %v2924_v20 = vpop.trf.xlu1 }
 0x591   :  { %v1143_v45 = vadd.f32 %v1142_v9, %v1141_v41  ;;  %6955 = vmatmul.mubr.msk.f32.gmra.mxu0 %vm1682_vm15, %v2924_v20 }
 0x592   :  { %v2509_v42 = vpop.trf.xlu0  ;;  %3232 = vmatprep.mubr.f32.mxu0 %v8009_v2 }
 0x593   :  { %v1144_v6 = vrot.slane %v1143_v45, 1  ;;  %6925 = vmatmul.mubr.msk.f32.gmra.mxu1 %vm1682_vm15, %v2509_v42 }
 0x594   :  { %2827 = vmatprep.mubr.f32.mxu1 %v8009_v2  ;;  %v2925_v28 = vpop.trf.xlu1 }
 0x595   :  { %v1145_v59 = vadd.f32 %v1144_v6, %v1143_v45  ;;  %6956 = vmatmul.mubr.msk.f32.gmra.mxu0 %vm1682_vm15, %v2925_v28 }
 0x596   :  { %v2510_v4 = vpop.trf.xlu0  ;;  %3238 = vmatprep.mubr.f32.mxu0 %v8009_v2 }
 0x597   :  { %7884 = vrcp.f32 %v1145_v59  ;;  %6926 = vmatmul.mubr.msk.f32.gmra.mxu1 %vm1682_vm15, %v2510_v4 }
 0x598   :  { %2833 = vmatprep.mubr.f32.mxu1 %v8009_v2  ;;  %v2926_v0 = vpop.trf.xlu1 }
 0x599   :  { %6957 = vmatmul.mubr.msk.f32.gmra.mxu0 %vm1682_vm15, %v2926_v0 }
 0x59a   :  { %v2511_v7 = vpop.trf.xlu0  ;;  %3244 = vmatprep.mubr.f32.mxu0 %v8009_v2 }
 0x59b   :  { %6927 = vmatmul.mubr.msk.f32.gmra.mxu1 %vm1682_vm15, %v2511_v7 }
 0x59c   :  { %2839 = vmatprep.mubr.f32.mxu1 %v8009_v2  ;;  %v2927_v22 = vpop.trf.xlu1 }
 0x59d   :  { %6958 = vmatmul.mubr.msk.f32.gmra.mxu0 %vm1682_vm15, %v2927_v22  ;;  %v2679_v23 = vpop.f32.mrf.mxu1 }
 0x59e   :  { %v2512_v61 = vpop.trf.xlu0  ;;  %3250 = vmatprep.mubr.f32.mxu0 %v8009_v2 }
 0x59f   :  { %6928 = vmatmul.mubr.msk.f32.gmra.mxu1 %vm1682_vm15, %v2512_v61  ;;  %v2681_v29 = vpop.f32.mrf.mxu1 }
 0x5a0   :  { %2845 = vmatprep.mubr.f32.mxu1 %v8009_v2  ;;  %v2928_v13 = vpop.trf.xlu1  ;;  %v7413_v32 = vpack.c.bf16 %v2681_v29, %v2679_v23 }
 0x5a1   :  { %6959 = vmatmul.mubr.msk.f32.gmra.mxu0 %vm1682_vm15, %v2928_v13  ;;  %v2685_v46 = vpop.f32.mrf.mxu1 }
 0x5a2   :  { %v2513_v16 = vpop.trf.xlu0  ;;  %3256 = vmatprep.mubr.f32.mxu0 %v8009_v2  ;;  %6555 = vst [vmem:[#allocation9 + $0x200] sm:$0xff] %v7413_v32 }
 0x5a3   :  { %6929 = vmatmul.mubr.msk.f32.gmra.mxu1 %vm1682_vm15, %v2513_v16  ;;  %v3096_v34 = vpop.f32.mrf.mxu0  ;;  %v2687_v63 = vpop.f32.mrf.mxu1 }
 0x5a4   :  { %v7885_v21 = vpop.eup %7884  ;;  %2851 = vmatprep.mubr.f32.mxu1 %v8009_v2  ;;  %v2929_v25 = vpop.trf.xlu1  ;;  %v7414_v39 = vpack.c.bf16 %v2687_v63, %v2685_v46 }
 0x5a5   :  { %6960 = vmatmul.mubr.msk.f32.gmra.mxu0 %vm1682_vm15, %v2929_v25  ;;  %v3098_v53 = vpop.f32.mrf.mxu0  ;;  %v2691_v27 = vpop.f32.mrf.mxu1  ;;  %v9193_v52 = vmul.f32 %v7885_v21, %v9155_v5  ;;  %v9196_v49 = vmul.f32 %v7885_v21, %v9158_v55 }
 0x5a6   :  { %v2514_v30 = vpop.trf.xlu0  ;;  %3262 = vmatprep.mubr.f32.mxu0 %v8009_v2  ;;  %v7445_v17 = vpack.c.bf16 %v3098_v53, %v3096_v34  ;;  %6556 = vst [vmem:[#allocation9 + $0x208] sm:$0xff] %v7414_v39 }
 0x5a7   :  { %6930 = vmatmul.mubr.msk.f32.gmra.mxu1 %vm1682_vm15, %v2514_v30  ;;  %v3102_v54 = vpop.f32.mrf.mxu0  ;;  %v2693_v57 = vpop.f32.mrf.mxu1  ;;  %v1199_v26 = vmul.f32 %v9200_v47, %v9193_v52  ;;  %v1201_v24 = vmul.f32 %v9204_v44, %v9196_v49  ;;  %v1198_v40 = vmul.f32 %v9208_v33, %v9193_v52  ;;  %v1200_v60 = vmul.f32 %v9212_v51, %v9196_v49 }
 0x5a8   :  { %2857 = vmatprep.mubr.f32.mxu1 %v8009_v2  ;;  %v2930_v31 = vpop.trf.xlu1  ;;  %6587 = vst [vmem:[#allocation9 + $0x300] sm:$0xff] %v7445_v17  ;;  %v7415_v10 = vpack.c.bf16 %v2693_v57, %v2691_v27 }
 0x5a9   :  { %6961 = vmatmul.mubr.msk.f32.gmra.mxu0 %vm1682_vm15, %v2930_v31  ;;  %v3104_v18 = vpop.f32.mrf.mxu0  ;;  %v1307_v35 = vadd.f32 %v1201_v24, %v1199_v26  ;;  %v1300_v38 = vadd.f32 %v1200_v60, %v1198_v40  ;;  %v2697_v11 = vpop.f32.mrf.mxu1 }
 0x5aa   :  { %v2515_v14 = vpop.trf.xlu0  ;;  %3268 = vmatprep.mubr.f32.mxu0 %v8009_v2  ;;  %v7446_v19 = vpack.c.bf16 %v3104_v18, %v3102_v54  ;;  %6557 = vst [vmem:[#allocation9 + $0x210] sm:$0xff] %v7415_v10 }
 0x5ab   :  { %6931 = vmatmul.mubr.msk.f32.gmra.mxu1 %vm1682_vm15, %v2515_v14  ;;  %v3108_v5 = vpop.f32.mrf.mxu0  ;;  %v1308_v55 = vrot.slane %v1307_v35, 4  ;;  %v1301_v50 = vrot.slane %v1300_v38, 4  ;;  %v2699_v12 = vpop.f32.mrf.mxu1 }
 0x5ac   :  { %2863 = vmatprep.mubr.f32.mxu1 %v8009_v2  ;;  %v2931_v15 = vpop.trf.xlu1  ;;  %6588 = vst [vmem:[#allocation9 + $0x308] sm:$0xff] %v7446_v19  ;;  %v7416_v37 = vpack.c.bf16 %v2699_v12, %v2697_v11 }
 0x5ad   :  { %4121 = vxpose.xlu0.b32.start [1/2] (short) %v8988_v62, 128  ;;  %6962 = vmatmul.mubr.msk.f32.gmra.mxu0 %vm1682_vm15, %v2931_v15  ;;  %v3110_v3 = vpop.f32.mrf.mxu0  ;;  %v1309_v41 = vadd.f32 %v1308_v55, %v1307_v35  ;;  %v1302_v48 = vadd.f32 %v1301_v50, %v1300_v38  ;;  %v2703_v9 = vpop.f32.mrf.mxu1 }
 0x5ae   :  { %v2516_v20 = vpop.trf.xlu0  ;;  %3274 = vmatprep.mubr.f32.mxu0 %v8009_v2  ;;  %v7447_v45 = vpack.c.bf16 %v3110_v3, %v3108_v5  ;;  %6558 = vst [vmem:[#allocation9 + $0x218] sm:$0xff] %v7416_v37 }
 0x5af   :  { %6932 = vmatmul.mubr.msk.f32.gmra.mxu1 %vm1682_vm15, %v2516_v20  ;;  %v1310_v42 = vrot.slane %v1309_v41, 2  ;;  %v1303_v6 = vrot.slane %v1302_v48, 2  ;;  %v3114_v28 = vpop.f32.mrf.mxu0  ;;  %v2705_v59 = vpop.f32.mrf.mxu1 }
 0x5b0   :  { %3511 = vmatprep.mubr.f32.mxu1 %v8009_v2  ;;  %v2932_v62 = vpop.trf.xlu1  ;;  %6589 = vst [vmem:[#allocation9 + $0x310] sm:$0xff] %v7447_v45  ;;  %v7417_v4 = vpack.c.bf16 %v2705_v59, %v2703_v9 }
 0x5b1   :  { %4122 = vxpose.xlu0.b32.end [2/2] (short) %v8991_v58, 128  ;;  %6963 = vmatmul.mubr.msk.f32.gmra.mxu0 %vm1682_vm15, %v2932_v62  ;;  %v1311_v0 = vadd.f32 %v1310_v42, %v1309_v41  ;;  %v1304_v7 = vadd.f32 %v1303_v6, %v1302_v48  ;;  %v3116_v22 = vpop.f32.mrf.mxu0  ;;  %v2709_v23 = vpop.f32.mrf.mxu1 }
 0x5b2   :  { %v3303_v61 = vpop.trf.xlu0  ;;  %3280 = vmatprep.mubr.f32.mxu0 %v8009_v2  ;;  %v7448_v29 = vpack.c.bf16 %v3116_v22, %v3114_v28  ;;  %6559 = vst [vmem:[#allocation9 + $0x220] sm:$0xff] %v7417_v4 }
 0x5b3   :  { %6965 = vmatmul.mubr.msk.f32.vlgmr.msra.gmra.mxu1 %vm1682_vm15, %v3303_v61  ;;  %v1312_v13 = vrot.slane %v1311_v0, 1  ;;  %v1305_v32 = vrot.slane %v1304_v7, 1  ;;  %v3120_v46 = vpop.f32.mrf.mxu0  ;;  %v2711_v16 = vpop.f32.mrf.mxu1 }
 0x5b4   :  { %4310 = vmatpush1.msra.mxu1 %v8994_v1  ;;  %v2933_v58 = vpop.trf.xlu1  ;;  %3517 = vmatprep.mubr.f32.mxu1 %v8009_v2  ;;  %6590 = vst [vmem:[#allocation9 + $0x318] sm:$0xff] %v7448_v29  ;;  %v7418_v34 = vpack.c.bf16 %v2711_v16, %v2709_v23 }
 0x5b5   :  { %4311 = vmatprep.subr.mxu1 %v8957_v8  ;;  %6964 = vmatmul.mubr.msk.f32.gmra.mxu0 %vm1682_vm15, %v2933_v58  ;;  %v1313_v63 = vadd.f32 %v1312_v13, %v1311_v0  ;;  %v1306_v21 = vadd.f32 %v1305_v32, %v1304_v7  ;;  %v3122_v25 = vpop.f32.mrf.mxu0  ;;  %v2715_v39 = vpop.f32.mrf.mxu1 }
 0x5b6   :  { %4312 = vmatpush1.msra.mxu1 %v8997_v43  ;;  %v3304_v53 = vpop.trf.xlu0  ;;  %3928 = vmatprep.mubr.f32.mxu0 %v8009_v2  ;;  %v7449_v27 = vpack.c.bf16 %v3122_v25, %v3120_v46  ;;  %6560 = vst [vmem:[#allocation9 + $0x228] sm:$0xff] %v7418_v34 }
 0x5b7   :  { %v9237_v1 = vsub.f32 %v9200_v47, %v1313_v63  ;;  %v9240_v30 = vsub.f32 %v9204_v44, %v1313_v63  ;;  %v9243_v8 = vsub.f32 %v9208_v33, %v1306_v21  ;;  %v9246_v17 = vsub.f32 %v9212_v51, %v1306_v21  ;;  %6966 = vmatmul.mubr.msk.f32.gmra.mxu1 %vm1682_vm15, %v3304_v53  ;;  %v3126_v43 = vpop.f32.mrf.mxu0  ;;  %v2717_v54 = vpop.f32.mrf.mxu1 }
 0x5b8   :  { %v3720_v57 = vpop.trf.xlu1  ;;  %3523 = vmatprep.mubr.f32.mxu1 %v8009_v2  ;;  %6591 = vst [vmem:[#allocation9 + $0x320] sm:$0xff] %v7449_v27  ;;  %v7419_v26 = vpack.c.bf16 %v2717_v54, %v2715_v39 }
 0x5b9   :  { %6997 = vmatmul.mubr.msk.f32.vlgmr.msra.gmra.mxu0 %vm1682_vm15, %v3720_v57  ;;  %v9253_v47 = vmul.f32 %v9237_v1, %v9193_v52  ;;  %v9257_v44 = vmul.f32 %v9240_v30, %v9196_v49  ;;  %v9261_v24 = vmul.f32 %v9243_v8, %v9193_v52  ;;  %v9265_v33 = vmul.f32 %v9246_v17, %v9196_v49  ;;  %v3128_v40 = vpop.f32.mrf.mxu0  ;;  %v2721_v51 = vpop.f32.mrf.mxu1 }
 0x5ba   :  { %v3305_v60 = vpop.trf.xlu0  ;;  %3934 = vmatprep.mubr.f32.mxu0 %v8009_v2  ;;  %v7450_v31 = vpack.c.bf16 %v3128_v40, %v3126_v43  ;;  %6561 = vst [vmem:[#allocation9 + $0x230] sm:$0xff] %v7419_v26 }
 0x5bb   :  { %v1407_v10 = vmul.f32 %v9253_v47, %v9237_v1  ;;  %v1409_v18 = vmul.f32 %v9257_v44, %v9240_v30  ;;  %v1406_v52 = vmul.f32 %v9261_v24, %v9243_v8  ;;  %v1408_v49 = vmul.f32 %v9265_v33, %v9246_v17  ;;  %6967 = vmatmul.mubr.msk.f32.gmra.mxu1 %vm1682_vm15, %v3305_v60  ;;  %v3132_v35 = vpop.f32.mrf.mxu0  ;;  %v2723_v38 = vpop.f32.mrf.mxu1 }
 0x5bc   :  { %v3721_v11 = vpop.trf.xlu1  ;;  %3529 = vmatprep.mubr.f32.mxu1 %v8009_v2  ;;  %6592 = vst [vmem:[#allocation9 + $0x328] sm:$0xff] %v7450_v31  ;;  %v7420_v14 = vpack.c.bf16 %v2723_v38, %v2721_v51 }
 0x5bd   :  { %v1515_v19 = vadd.f32 %v1409_v18, %v1407_v10  ;;  %v1508_v5 = vadd.f32 %v1408_v49, %v1406_v52  ;;  %6998 = vmatmul.mubr.msk.f32.gmra.mxu0 %vm1682_vm15, %v3721_v11  ;;  %v3134_v55 = vpop.f32.mrf.mxu0  ;;  %v2727_v50 = vpop.f32.mrf.mxu1 }
 0x5be   :  { %v3306_v12 = vpop.trf.xlu0  ;;  %3940 = vmatprep.mubr.f32.mxu0 %v8009_v2  ;;  %v7451_v15 = vpack.c.bf16 %v3134_v55, %v3132_v35  ;;  %6562 = vst [vmem:[#allocation9 + $0x238] sm:$0xff] %v7420_v14 }
 0x5bf   :  { %v1516_v37 = vrot.slane %v1515_v19, 4  ;;  %v1509_v3 = vrot.slane %v1508_v5, 4  ;;  %6968 = vmatmul.mubr.msk.f32.gmra.mxu1 %vm1682_vm15, %v3306_v12  ;;  %v3138_v41 = vpop.f32.mrf.mxu0  ;;  %v2729_v48 = vpop.f32.mrf.mxu1 }
 0x5c0   :  { %v3722_v9 = vpop.trf.xlu1  ;;  %3535 = vmatprep.mubr.f32.mxu1 %v8009_v2  ;;  %6593 = vst [vmem:[#allocation9 + $0x330] sm:$0xff] %v7451_v15  ;;  %v7421_v20 = vpack.c.bf16 %v2729_v48, %v2727_v50 }
 0x5c1   :  { %v1517_v45 = vadd.f32 %v1516_v37, %v1515_v19  ;;  %v1510_v42 = vadd.f32 %v1509_v3, %v1508_v5  ;;  %6999 = vmatmul.mubr.msk.f32.gmra.mxu0 %vm1682_vm15, %v3722_v9  ;;  %v3140_v6 = vpop.f32.mrf.mxu0  ;;  %v2733_v28 = vpop.f32.mrf.mxu1 }
 0x5c2   :  { %v3307_v59 = vpop.trf.xlu0  ;;  %3946 = vmatprep.mubr.f32.mxu0 %v8009_v2  ;;  %v7452_v62 = vpack.c.bf16 %v3140_v6, %v3138_v41  ;;  %6563 = vst [vmem:[#allocation9 + $0x240] sm:$0xff] %v7421_v20 }
 0x5c3   :  { %v1518_v4 = vrot.slane %v1517_v45, 2  ;;  %v1511_v0 = vrot.slane %v1510_v42, 2  ;;  %6969 = vmatmul.mubr.msk.f32.gmra.mxu1 %vm1682_vm15, %v3307_v59  ;;  %v3144_v7 = vpop.f32.mrf.mxu0  ;;  %v2735_v22 = vpop.f32.mrf.mxu1 }
 0x5c4   :  { %v3723_v23 = vpop.trf.xlu1  ;;  %3541 = vmatprep.mubr.f32.mxu1 %v8009_v2  ;;  %6594 = vst [vmem:[#allocation9 + $0x338] sm:$0xff] %v7452_v62  ;;  %v7422_v61 = vpack.c.bf16 %v2735_v22, %v2733_v28 }
 0x5c5   :  { %v1519_v29 = vadd.f32 %v1518_v4, %v1517_v45  ;;  %v1512_v13 = vadd.f32 %v1511_v0, %v1510_v42  ;;  %7000 = vmatmul.mubr.msk.f32.gmra.mxu0 %vm1682_vm15, %v3723_v23  ;;  %v3146_v32 = vpop.f32.mrf.mxu0  ;;  %v2739_v46 = vpop.f32.mrf.mxu1 }
 0x5c6   :  { %v3308_v16 = vpop.trf.xlu0  ;;  %3952 = vmatprep.mubr.f32.mxu0 %v8009_v2  ;;  %v7453_v58 = vpack.c.bf16 %v3146_v32, %v3144_v7  ;;  %6564 = vst [vmem:[#allocation9 + $0x248] sm:$0xff] %v7422_v61 }
 0x5c7   :  { %v1520_v34 = vrot.slane %v1519_v29, 1  ;;  %v1513_v63 = vrot.slane %v1512_v13, 1  ;;  %6970 = vmatmul.mubr.msk.f32.gmra.mxu1 %vm1682_vm15, %v3308_v16  ;;  %v3150_v21 = vpop.f32.mrf.mxu0  ;;  %v2741_v25 = vpop.f32.mrf.mxu1 }
 0x5c8   :  { %v3724_v39 = vpop.trf.xlu1  ;;  %3547 = vmatprep.mubr.f32.mxu1 %v8009_v2  ;;  %6595 = vst [vmem:[#allocation9 + $0x340] sm:$0xff] %v7453_v58  ;;  %v7423_v53 = vpack.c.bf16 %v2741_v25, %v2739_v46 }
 0x5c9   :  { %v1521_v27 = vadd.f32 %v1520_v34, %v1519_v29  ;;  %v1514_v43 = vadd.f32 %v1513_v63, %v1512_v13  ;;  %7001 = vmatmul.mubr.msk.f32.gmra.mxu0 %vm1682_vm15, %v3724_v39  ;;  %v3152_v54 = vpop.f32.mrf.mxu0  ;;  %v2745_v57 = vpop.f32.mrf.mxu1 }
 0x5ca   :  { %v3309_v26 = vpop.trf.xlu0  ;;  %3958 = vmatprep.mubr.f32.mxu0 %v8009_v2  ;;  %v7454_v40 = vpack.c.bf16 %v3152_v54, %v3150_v21  ;;  %6565 = vst [vmem:[#allocation9 + $0x250] sm:$0xff] %v7423_v53 }
 0x5cb   :  { %v1537_v51 = vadd.f32 1e-09, %v1521_v27  ;;  %v1536_v60 = vadd.f32 1e-09, %v1514_v43  ;;  %6971 = vmatmul.mubr.msk.f32.gmra.mxu1 %vm1682_vm15, %v3309_v26  ;;  %v3156_v31 = vpop.f32.mrf.mxu0  ;;  %v2747_v10 = vpop.f32.mrf.mxu1 }
 0x5cc   :  { %v3725_v18 = vpop.trf.xlu1  ;;  %3553 = vmatprep.mubr.f32.mxu1 %v8009_v2  ;;  %6596 = vst [vmem:[#allocation9 + $0x348] sm:$0xff] %v7454_v40  ;;  %v7424_v52 = vpack.c.bf16 %v2747_v10, %v2745_v57 }
 0x5cd   :  { %7886 = vrsqrt.f32 %v1537_v51  ;;  %7002 = vmatmul.mubr.msk.f32.gmra.mxu0 %vm1682_vm15, %v3725_v18  ;;  %v3158_v49 = vpop.f32.mrf.mxu0  ;;  %v2751_v35 = vpop.f32.mrf.mxu1 }
 0x5ce   :  { %v3310_v38 = vpop.trf.xlu0  ;;  %7888 = vrsqrt.f32 %v1536_v60  ;;  %3964 = vmatprep.mubr.f32.mxu0 %v8009_v2  ;;  %v7455_v11 = vpack.c.bf16 %v3158_v49, %v3156_v31  ;;  %6566 = vst [vmem:[#allocation9 + $0x258] sm:$0xff] %v7424_v52 }
 0x5cf   :  { %6972 = vmatmul.mubr.msk.f32.gmra.mxu1 %vm1682_vm15, %v3310_v38  ;;  %v3162_v14 = vpop.f32.mrf.mxu0  ;;  %v2753_v19 = vpop.f32.mrf.mxu1 }
 0x5d0   :  { %v3726_v5 = vpop.trf.xlu1  ;;  %3559 = vmatprep.mubr.f32.mxu1 %v8009_v2  ;;  %6597 = vst [vmem:[#allocation9 + $0x350] sm:$0xff] %v7455_v11  ;;  %v7425_v55 = vpack.c.bf16 %v2753_v19, %v2751_v35 }
 0x5d1   :  { %7003 = vmatmul.mubr.msk.f32.gmra.mxu0 %vm1682_vm15, %v3726_v5  ;;  %v3164_v50 = vpop.f32.mrf.mxu0  ;;  %v2757_v12 = vpop.f32.mrf.mxu1 }
 0x5d2   :  { %v3311_v15 = vpop.trf.xlu0  ;;  %3970 = vmatprep.mubr.f32.mxu0 %v8009_v2  ;;  %v7456_v37 = vpack.c.bf16 %v3164_v50, %v3162_v14  ;;  %6567 = vst [vmem:[#allocation9 + $0x260] sm:$0xff] %v7425_v55 }
 0x5d3   :  { %6973 = vmatmul.mubr.msk.f32.gmra.mxu1 %vm1682_vm15, %v3311_v15  ;;  %v3168_v3 = vpop.f32.mrf.mxu0  ;;  %v2759_v41 = vpop.f32.mrf.mxu1 }
 0x5d4   :  { %v3727_v48 = vpop.trf.xlu1  ;;  %3565 = vmatprep.mubr.f32.mxu1 %v8009_v2  ;;  %6598 = vst [vmem:[#allocation9 + $0x358] sm:$0xff] %v7456_v37  ;;  %v7426_v9 = vpack.c.bf16 %v2759_v41, %v2757_v12 }
 0x5d5   :  { %7004 = vmatmul.mubr.msk.f32.gmra.mxu0 %vm1682_vm15, %v3727_v48  ;;  %v3170_v20 = vpop.f32.mrf.mxu0  ;;  %v2763_v45 = vpop.f32.mrf.mxu1 }
 0x5d6   :  { %v3312_v42 = vpop.trf.xlu0  ;;  %3976 = vmatprep.mubr.f32.mxu0 %v8009_v2  ;;  %v7457_v6 = vpack.c.bf16 %v3170_v20, %v3168_v3  ;;  %6568 = vst [vmem:[#allocation9 + $0x268] sm:$0xff] %v7426_v9 }
 0x5d7   :  { %6974 = vmatmul.mubr.msk.f32.gmra.mxu1 %vm1682_vm15, %v3312_v42  ;;  %v3174_v28 = vpop.f32.mrf.mxu0  ;;  %v2765_v59 = vpop.f32.mrf.mxu1 }
 0x5d8   :  { %v3728_v62 = vpop.trf.xlu1  ;;  %3571 = vmatprep.mubr.f32.mxu1 %v8009_v2  ;;  %6599 = vst [vmem:[#allocation9 + $0x360] sm:$0xff] %v7457_v6  ;;  %v7427_v4 = vpack.c.bf16 %v2765_v59, %v2763_v45 }
 0x5d9   :  { %7005 = vmatmul.mubr.msk.f32.gmra.mxu0 %vm1682_vm15, %v3728_v62  ;;  %v3176_v0 = vpop.f32.mrf.mxu0  ;;  %v2769_v7 = vpop.f32.mrf.mxu1 }
 0x5da   :  { %v7887_v22 = vpop.eup %7886  ;;  %v3313_v23 = vpop.trf.xlu0  ;;  %3982 = vmatprep.mubr.f32.mxu0 %v8009_v2  ;;  %v7458_v61 = vpack.c.bf16 %v3176_v0, %v3174_v28  ;;  %6569 = vst [vmem:[#allocation9 + $0x270] sm:$0xff] %v7427_v4 }
 0x5db   :  { %v7889_v29 = vpop.eup %7888  ;;  %v1617_v13 = vmul.f32 %v7887_v22, %v9240_v30  ;;  %6975 = vmatmul.mubr.msk.f32.gmra.mxu1 %vm1682_vm15, %v3313_v23  ;;  %v3180_v32 = vpop.f32.mrf.mxu0  ;;  %v9311_v16 = vmul.f32 %v7887_v22, %v9253_v47  ;;  %v9314_v58 = vmul.f32 %v7887_v22, %v9257_v44  ;;  %v1615_v30 = vmul.f32 %v7887_v22, %v9237_v1 }
 0x5dc   :  { %v2771_v46 = vpop.f32.mrf.mxu1  ;;  %v1582_v34 = vmul.f32 %v7889_v29, %v9261_v24  ;;  %v1616_v63 = vmul.f32 %v7889_v29, %v9246_v17  ;;  %v3729_v21 = vpop.trf.xlu1  ;;  %3577 = vmatprep.mubr.f32.mxu1 %v8009_v2  ;;  %6600 = vst [vmem:[#allocation9 + $0x368] sm:$0xff] %v7458_v61  ;;  %v1614_v47 = vmul.f32 %v7889_v29, %v9243_v8 }
 0x5dd   :  { %4726 = vmatprep.subr.mxu0 %v1617_v13  ;;  %7006 = vmatmul.mubr.msk.f32.gmra.mxu0 %vm1682_vm15, %v3729_v21  ;;  %v3182_v25 = vpop.f32.mrf.mxu0  ;;  %v7428_v39 = vpack.c.bf16 %v2771_v46, %v2769_v7  ;;  %v1584_v24 = vmul.f32 %v7889_v29, %v9265_v33 }
 0x5de   :  { %4538 = vxpose.xlu1.b32.start [1/2] (short) %v1582_v34, 128  ;;  %4727 = vmatpush1.msra.mxu0 %v1616_v63  ;;  %v3314_v44 = vpop.trf.xlu0  ;;  %v7459_v53 = vpack.c.bf16 %v3182_v25, %v3180_v32 }
 0x5df   :  { %4728 = vmatprep.subr.mxu0 %v1615_v30  ;;  %3988 = vmatprep.mubr.f32.mxu0 %v8009_v2  ;;  %v3186_v17 = vpop.f32.mrf.mxu0  ;;  %6570 = vst [vmem:[#allocation9 + $0x278] sm:$0xff] %v7428_v39 }
 0x5e0   :  { %4729 = vmatpush1.msra.mxu0 %v1614_v47  ;;  %v3730_v27 = vpop.trf.xlu1  ;;  %6976 = vmatmul.mubr.msk.f32.gmra.mxu1 %vm1682_vm15, %v3314_v44  ;;  %6601 = vst [vmem:[#allocation9 + $0x370] sm:$0xff] %v7459_v53 }
 0x5e1   :  { %7007 = vmatmul.mubr.msk.f32.gmra.mxu0 %vm1682_vm15, %v3730_v27  ;;  %3583 = vmatprep.mubr.f32.mxu1 %v8009_v2  ;;  %v3188_v1 = vpop.f32.mrf.mxu0 }
 0x5e2   :  { %4539 = vxpose.xlu1.b32.end [2/2] (short) %v1584_v24, 128  ;;  %v3315_v8 = vpop.trf.xlu0  ;;  %3994 = vmatprep.mubr.f32.mxu0 %v8009_v2  ;;  %v7460_v43 = vpack.c.bf16 %v3188_v1, %v3186_v17 }
 0x5e4   :  { %v3731_v54 = vpop.trf.xlu1  ;;  %6977 = vmatmul.mubr.msk.f32.gmra.mxu1 %vm1682_vm15, %v3315_v8  ;;  %6602 = vst [vmem:[#allocation9 + $0x378] sm:$0xff] %v7460_v43 }
 0x5e5   :  { %7008 = vmatmul.mubr.msk.f32.gmra.mxu0 %vm1682_vm15, %v3731_v54  ;;  %3589 = vmatprep.mubr.f32.mxu1 %v8009_v2 }
 0x5e6   :  { %v3316_v33 = vpop.trf.xlu0  ;;  %4000 = vmatprep.mubr.f32.mxu0 %v8009_v2 }
 0x5e8   :  { %v3732_v57 = vpop.trf.xlu1  ;;  %6978 = vmatmul.mubr.msk.f32.gmra.mxu1 %vm1682_vm15, %v3316_v33 }
 0x5e9   :  { %7009 = vmatmul.mubr.msk.f32.gmra.mxu0 %vm1682_vm15, %v3732_v57  ;;  %3595 = vmatprep.mubr.f32.mxu1 %v8009_v2 }
 0x5ea   :  { %v3317_v26 = vpop.trf.xlu0  ;;  %4153 = vxpose.xlu0.b32.start [1/2] (short) %v8961_v36, 128  ;;  %4006 = vmatprep.mubr.f32.mxu0 %v8009_v2 }
 0x5ec   :  { %v3733_v40 = vpop.trf.xlu1  ;;  %6979 = vmatmul.mubr.msk.f32.gmra.mxu1 %vm1682_vm15, %v3317_v26 }
 0x5ed   :  { %7010 = vmatmul.mubr.msk.f32.gmra.mxu0 %vm1682_vm15, %v3733_v40  ;;  %3601 = vmatprep.mubr.f32.mxu1 %v8009_v2 }
 0x5ee   :  { %4154 = vxpose.xlu0.b32.end [2/2] (short) %v8965_v56, 128  ;;  %4012 = vmatprep.mubr.f32.mxu0 %v8009_v2  ;;  %v3318_v51 = vpop.trf.xlu0 }
 0x5f0   :  { %v3734_v60 = vpop.trf.xlu1  ;;  %6980 = vmatmul.mubr.msk.f32.gmra.mxu1 %vm1682_vm15, %v3318_v51 }
 0x5f1   :  { %7011 = vmatmul.mubr.msk.f32.gmra.mxu0 %vm1682_vm15, %v3734_v60  ;;  %3607 = vmatprep.mubr.f32.mxu1 %v8009_v2 }
 0x5f2   :  { %4018 = vmatprep.mubr.f32.mxu0 %v8009_v2  ;;  %v3335_v36 = vpop.trf.xlu0 }
 0x5f4   :  { %v3735_v31 = vpop.trf.xlu1  ;;  %6981 = vmatmul.mubr.msk.f32.gmra.mxu1 %vm1682_vm15, %v3335_v36 }
 0x5f5   :  { %7012 = vmatmul.mubr.msk.f32.gmra.mxu0 %vm1682_vm15, %v3735_v31  ;;  %3613 = vmatprep.mubr.f32.mxu1 %v8009_v2 }
 0x5f6   :  { %4024 = vmatprep.mubr.f32.mxu0 %v8009_v2  ;;  %v3336_v56 = vpop.trf.xlu0 }
 0x5f8   :  { %v3752_v10 = vpop.trf.xlu1  ;;  %6982 = vmatmul.mubr.msk.f32.gmra.mxu1 %vm1682_vm15, %v3336_v56 }
 0x5f9   :  { %7013 = vmatmul.mubr.msk.f32.gmra.mxu0 %vm1682_vm15, %v3752_v10  ;;  %3619 = vmatprep.mubr.f32.mxu1 %v8009_v2 }
 0x5fa   :  { %4030 = vmatprep.mubr.f32.mxu0 %v8009_v2  ;;  %v3337_v18 = vpop.trf.xlu0 }
 0x5fc   :  { %v3753_v52 = vpop.trf.xlu1  ;;  %6983 = vmatmul.mubr.msk.f32.gmra.mxu1 %vm1682_vm15, %v3337_v18 }
 0x5fd   :  { %7014 = vmatmul.mubr.msk.f32.gmra.mxu0 %vm1682_vm15, %v3753_v52  ;;  %3625 = vmatprep.mubr.f32.mxu1 %v8009_v2 }
 0x5fe   :  { %4036 = vmatprep.mubr.f32.mxu0 %v8009_v2  ;;  %v3338_v49 = vpop.trf.xlu0 }
 0x600   :  { %v3754_v35 = vpop.trf.xlu1  ;;  %6984 = vmatmul.mubr.msk.f32.gmra.mxu1 %vm1682_vm15, %v3338_v49 }
 0x601   :  { %7015 = vmatmul.mubr.msk.f32.gmra.mxu0 %vm1682_vm15, %v3754_v35  ;;  %3631 = vmatprep.mubr.f32.mxu1 %v8009_v2 }
 0x602   :  { %4042 = vmatprep.mubr.f32.mxu0 %v8009_v2  ;;  %v3339_v38 = vpop.trf.xlu0 }
 0x604   :  { %v3755_v11 = vpop.trf.xlu1  ;;  %6985 = vmatmul.mubr.msk.f32.gmra.mxu1 %vm1682_vm15, %v3339_v38 }
 0x605   :  { %7016 = vmatmul.mubr.msk.f32.gmra.mxu0 %vm1682_vm15, %v3755_v11  ;;  %3637 = vmatprep.mubr.f32.mxu1 %v8009_v2 }
 0x606   :  { %4048 = vmatprep.mubr.f32.mxu0 %v8009_v2  ;;  %v3340_v14 = vpop.trf.xlu0 }
 0x608   :  { %v3756_v19 = vpop.trf.xlu1  ;;  %6986 = vmatmul.mubr.msk.f32.gmra.mxu1 %vm1682_vm15, %v3340_v14 }
 0x609   :  { %7017 = vmatmul.mubr.msk.f32.gmra.mxu0 %vm1682_vm15, %v3756_v19  ;;  %3643 = vmatprep.mubr.f32.mxu1 %v8009_v2 }
 0x60a   :  { %4054 = vmatprep.mubr.f32.mxu0 %v8009_v2  ;;  %v3341_v5 = vpop.trf.xlu0 }
 0x60c   :  { %v3757_v55 = vpop.trf.xlu1  ;;  %6987 = vmatmul.mubr.msk.f32.gmra.mxu1 %vm1682_vm15, %v3341_v5 }
 0x60d   :  { %7018 = vmatmul.mubr.msk.f32.gmra.mxu0 %vm1682_vm15, %v3757_v55  ;;  %3649 = vmatprep.mubr.f32.mxu1 %v8009_v2 }
 0x60e   :  { %4060 = vmatprep.mubr.f32.mxu0 %v8009_v2  ;;  %v3342_v50 = vpop.trf.xlu0 }
 0x610   :  { %v3758_v12 = vpop.trf.xlu1  ;;  %6988 = vmatmul.mubr.msk.f32.gmra.mxu1 %vm1682_vm15, %v3342_v50 }
 0x611   :  { %7019 = vmatmul.mubr.msk.f32.gmra.mxu0 %vm1682_vm15, %v3758_v12  ;;  %3655 = vmatprep.mubr.f32.mxu1 %v8009_v2 }
 0x612   :  { %4066 = vmatprep.mubr.f32.mxu0 %v8009_v2  ;;  %v3343_v15 = vpop.trf.xlu0 }
 0x614   :  { %v3759_v37 = vpop.trf.xlu1  ;;  %6989 = vmatmul.mubr.msk.f32.gmra.mxu1 %vm1682_vm15, %v3343_v15 }
 0x615   :  { %7020 = vmatmul.mubr.msk.f32.gmra.mxu0 %vm1682_vm15, %v3759_v37  ;;  %3661 = vmatprep.mubr.f32.mxu1 %v8009_v2 }
 0x616   :  { %4072 = vmatprep.mubr.f32.mxu0 %v8009_v2  ;;  %v3344_v3 = vpop.trf.xlu0 }
 0x618   :  { %v3760_v41 = vpop.trf.xlu1  ;;  %6990 = vmatmul.mubr.msk.f32.gmra.mxu1 %vm1682_vm15, %v3344_v3 }
 0x619   :  { %7021 = vmatmul.mubr.msk.f32.gmra.mxu0 %vm1682_vm15, %v3760_v41  ;;  %3667 = vmatprep.mubr.f32.mxu1 %v8009_v2 }
 0x61a   :  { %4078 = vmatprep.mubr.f32.mxu0 %v8009_v2  ;;  %v3345_v48 = vpop.trf.xlu0 }
 0x61b   :  { %4570 = vxpose.xlu1.b32.start [1/2] (short) %v9311_v16, 128 }
 0x61c   :  { %v3761_v9 = vpop.trf.xlu1  ;;  %6991 = vmatmul.mubr.msk.f32.gmra.mxu1 %vm1682_vm15, %v3345_v48 }
 0x61d   :  { %7022 = vmatmul.mubr.msk.f32.gmra.mxu0 %vm1682_vm15, %v3761_v9  ;;  %3673 = vmatprep.mubr.f32.mxu1 %v8009_v2 }
 0x61e   :  { %4084 = vmatprep.mubr.f32.mxu0 %v8009_v2  ;;  %v3346_v20 = vpop.trf.xlu0 }
 0x61f   :  { %4571 = vxpose.xlu1.b32.end [2/2] (short) %v9314_v58, 128 }
 0x620   :  { %v3762_v45 = vpop.trf.xlu1  ;;  %6992 = vmatmul.mubr.msk.f32.gmra.mxu1 %vm1682_vm15, %v3346_v20 }
 0x621   :  { %7023 = vmatmul.mubr.msk.f32.gmra.mxu0 %vm1682_vm15, %v3762_v45  ;;  %3679 = vmatprep.mubr.f32.mxu1 %v8009_v2 }
 0x622   :  { %4090 = vmatprep.mubr.f32.mxu0 %v8009_v2  ;;  %v3347_v42 = vpop.trf.xlu0 }
 0x624   :  { %v3763_v6 = vpop.trf.xlu1  ;;  %6993 = vmatmul.mubr.msk.f32.gmra.mxu1 %vm1682_vm15, %v3347_v42 }
 0x625   :  { %7024 = vmatmul.mubr.msk.f32.gmra.mxu0 %vm1682_vm15, %v3763_v6  ;;  %3685 = vmatprep.mubr.f32.mxu1 %v8009_v2 }
 0x626   :  { %4096 = vmatprep.mubr.f32.mxu0 %v8009_v2  ;;  %v3348_v28 = vpop.trf.xlu0 }
 0x628   :  { %v3764_v59 = vpop.trf.xlu1  ;;  %6994 = vmatmul.mubr.msk.f32.gmra.mxu1 %vm1682_vm15, %v3348_v28 }
 0x629   :  { %7025 = vmatmul.mubr.msk.f32.gmra.mxu0 %vm1682_vm15, %v3764_v59  ;;  %3691 = vmatprep.mubr.f32.mxu1 %v8009_v2 }
 0x62a   :  { %4102 = vmatprep.mubr.f32.mxu0 %v8009_v2  ;;  %v3349_v62 = vpop.trf.xlu0 }
 0x62c   :  { %v3765_v4 = vpop.trf.xlu1  ;;  %6995 = vmatmul.mubr.msk.f32.gmra.mxu1 %vm1682_vm15, %v3349_v62 }
 0x62d   :  { %7026 = vmatmul.mubr.msk.f32.gmra.mxu0 %vm1682_vm15, %v3765_v4  ;;  %3697 = vmatprep.mubr.f32.mxu1 %v8009_v2 }
 0x62e   :  { %4108 = vmatprep.mubr.f32.mxu0 %v8009_v2  ;;  %v3350_v0 = vpop.trf.xlu0 }
 0x630   :  { %v3766_v7 = vpop.trf.xlu1  ;;  %6996 = vmatmul.mubr.msk.f32.gmra.mxu1 %vm1682_vm15, %v3350_v0 }
 0x631   :  { %7027 = vmatmul.mubr.msk.f32.gmra.mxu0 %vm1682_vm15, %v3766_v7  ;;  %4345 = vmatprep.mubr.f32.mxu1 %v8009_v2 }
 0x632   :  { %4114 = vmatprep.mubr.f32.mxu0 %v8009_v2  ;;  %v4137_v22 = vpop.trf.xlu0 }
 0x633   :  { %v2775_v23 = vpop.f32.mrf.mxu1 }
 0x634   :  { %v3767_v61 = vpop.trf.xlu1  ;;  %7029 = vmatmul.mubr.msk.f32.vlgmr.msra.gmra.mxu1 %vm1682_vm15, %v4137_v22 }
 0x635   :  { %7028 = vmatmul.mubr.msk.f32.gmra.mxu0 %vm1682_vm15, %v3767_v61  ;;  %v2777_v29 = vpop.f32.mrf.mxu1  ;;  %4351 = vmatprep.mubr.f32.mxu1 %v8009_v2 }
 0x636   :  { %4762 = vmatprep.mubr.f32.mxu0 %v8009_v2  ;;  %v7429_v13 = vpack.c.bf16 %v2777_v29, %v2775_v23  ;;  %v4138_v32 = vpop.trf.xlu0 }
 0x637   :  { %v2781_v46 = vpop.f32.mrf.mxu1 }
 0x638   :  { %6571 = vst [vmem:[#allocation9 + $0x280] sm:$0xff] %v7429_v13  ;;  %7030 = vmatmul.mubr.msk.f32.gmra.mxu1 %vm1682_vm15, %v4138_v32 }
 0x639   :  { %v3192_v16 = vpop.f32.mrf.mxu0  ;;  %v2783_v58 = vpop.f32.mrf.mxu1  ;;  %4357 = vmatprep.mubr.f32.mxu1 %v8009_v2 }
 0x63a   :  { %v7430_v34 = vpack.c.bf16 %v2783_v58, %v2781_v46  ;;  %v4139_v63 = vpop.trf.xlu0 }
 0x63b   :  { %v3194_v21 = vpop.f32.mrf.mxu0  ;;  %v2787_v30 = vpop.f32.mrf.mxu1 }
 0x63c   :  { %v7461_v25 = vpack.c.bf16 %v3194_v21, %v3192_v16  ;;  %6572 = vst [vmem:[#allocation9 + $0x288] sm:$0xff] %v7430_v34  ;;  %7031 = vmatmul.mubr.msk.f32.gmra.mxu1 %vm1682_vm15, %v4139_v63 }
 0x63d   :  { %v3198_v39 = vpop.f32.mrf.mxu0  ;;  %v2789_v47 = vpop.f32.mrf.mxu1  ;;  %4363 = vmatprep.mubr.f32.mxu1 %v8009_v2 }
 0x63e   :  { %6603 = vst [vmem:[#allocation9 + $0x380] sm:$0xff] %v7461_v25  ;;  %v7431_v44 = vpack.c.bf16 %v2789_v47, %v2787_v30  ;;  %v4140_v53 = vpop.trf.xlu0 }
 0x63f   :  { %v3200_v17 = vpop.f32.mrf.mxu0  ;;  %v2793_v24 = vpop.f32.mrf.mxu1 }
 0x640   :  { %v7462_v27 = vpack.c.bf16 %v3200_v17, %v3198_v39  ;;  %6573 = vst [vmem:[#allocation9 + $0x290] sm:$0xff] %v7431_v44  ;;  %7032 = vmatmul.mubr.msk.f32.gmra.mxu1 %vm1682_vm15, %v4140_v53 }
 0x641   :  { %v3204_v1 = vpop.f32.mrf.mxu0  ;;  %v2795_v8 = vpop.f32.mrf.mxu1  ;;  %4369 = vmatprep.mubr.f32.mxu1 %v8009_v2 }
 0x642   :  { %6604 = vst [vmem:[#allocation9 + $0x388] sm:$0xff] %v7462_v27  ;;  %v7432_v43 = vpack.c.bf16 %v2795_v8, %v2793_v24  ;;  %v4141_v54 = vpop.trf.xlu0 }
 0x643   :  { %v3206_v33 = vpop.f32.mrf.mxu0  ;;  %v2799_v57 = vpop.f32.mrf.mxu1 }
 0x644   :  { %v7463_v26 = vpack.c.bf16 %v3206_v33, %v3204_v1  ;;  %6574 = vst [vmem:[#allocation9 + $0x298] sm:$0xff] %v7432_v43  ;;  %7033 = vmatmul.mubr.msk.f32.gmra.mxu1 %vm1682_vm15, %v4141_v54 }
 0x645   :  { %v3210_v40 = vpop.f32.mrf.mxu0  ;;  %v2801_v51 = vpop.f32.mrf.mxu1  ;;  %4375 = vmatprep.mubr.f32.mxu1 %v8009_v2 }
 0x646   :  { %6605 = vst [vmem:[#allocation9 + $0x390] sm:$0xff] %v7463_v26  ;;  %v7433_v60 = vpack.c.bf16 %v2801_v51, %v2799_v57  ;;  %v4142_v36 = vpop.trf.xlu0 }
 0x647   :  { %v3212_v31 = vpop.f32.mrf.mxu0  ;;  %v2805_v56 = vpop.f32.mrf.mxu1 }
 0x648   :  { %v7464_v10 = vpack.c.bf16 %v3212_v31, %v3210_v40  ;;  %6575 = vst [vmem:[#allocation9 + $0x2a0] sm:$0xff] %v7433_v60  ;;  %7034 = vmatmul.mubr.msk.f32.gmra.mxu1 %vm1682_vm15, %v4142_v36 }
 0x649   :  { %v3216_v18 = vpop.f32.mrf.mxu0  ;;  %v2807_v52 = vpop.f32.mrf.mxu1  ;;  %4381 = vmatprep.mubr.f32.mxu1 %v8009_v2 }
 0x64a   :  { %6606 = vst [vmem:[#allocation9 + $0x398] sm:$0xff] %v7464_v10  ;;  %v7434_v49 = vpack.c.bf16 %v2807_v52, %v2805_v56  ;;  %v4143_v35 = vpop.trf.xlu0 }
 0x64b   :  { %v3218_v38 = vpop.f32.mrf.mxu0  ;;  %v2811_v11 = vpop.f32.mrf.mxu1 }
 0x64c   :  { %v7465_v14 = vpack.c.bf16 %v3218_v38, %v3216_v18  ;;  %6576 = vst [vmem:[#allocation9 + $0x2a8] sm:$0xff] %v7434_v49  ;;  %7035 = vmatmul.mubr.msk.f32.gmra.mxu1 %vm1682_vm15, %v4143_v35 }
 0x64d   :  { %v3222_v19 = vpop.f32.mrf.mxu0  ;;  %v2813_v5 = vpop.f32.mrf.mxu1  ;;  %4387 = vmatprep.mubr.f32.mxu1 %v8009_v2 }
 0x64e   :  { %6607 = vst [vmem:[#allocation9 + $0x3a0] sm:$0xff] %v7465_v14  ;;  %v7435_v55 = vpack.c.bf16 %v2813_v5, %v2811_v11  ;;  %v4144_v50 = vpop.trf.xlu0 }
 0x64f   :  { %v3224_v12 = vpop.f32.mrf.mxu0  ;;  %v2817_v15 = vpop.f32.mrf.mxu1 }
 0x650   :  { %v7466_v37 = vpack.c.bf16 %v3224_v12, %v3222_v19  ;;  %6577 = vst [vmem:[#allocation9 + $0x2b0] sm:$0xff] %v7435_v55  ;;  %7036 = vmatmul.mubr.msk.f32.gmra.mxu1 %vm1682_vm15, %v4144_v50 }
 0x651   :  { %v3228_v3 = vpop.f32.mrf.mxu0  ;;  %v2819_v41 = vpop.f32.mrf.mxu1  ;;  %4393 = vmatprep.mubr.f32.mxu1 %v8009_v2 }
 0x652   :  { %6608 = vst [vmem:[#allocation9 + $0x3a8] sm:$0xff] %v7466_v37  ;;  %v7436_v48 = vpack.c.bf16 %v2819_v41, %v2817_v15  ;;  %v4145_v9 = vpop.trf.xlu0 }
 0x653   :  { %v3230_v20 = vpop.f32.mrf.mxu0  ;;  %v2823_v45 = vpop.f32.mrf.mxu1 }
 0x654   :  { %v7467_v42 = vpack.c.bf16 %v3230_v20, %v3228_v3  ;;  %6578 = vst [vmem:[#allocation9 + $0x2b8] sm:$0xff] %v7436_v48  ;;  %7037 = vmatmul.mubr.msk.f32.gmra.mxu1 %vm1682_vm15, %v4145_v9 }
 0x655   :  { %v3234_v6 = vpop.f32.mrf.mxu0  ;;  %v2825_v28 = vpop.f32.mrf.mxu1  ;;  %4399 = vmatprep.mubr.f32.mxu1 %v8009_v2 }
 0x656   :  { %6609 = vst [vmem:[#allocation9 + $0x3b0] sm:$0xff] %v7467_v42  ;;  %v7437_v59 = vpack.c.bf16 %v2825_v28, %v2823_v45  ;;  %v4146_v62 = vpop.trf.xlu0 }
 0x657   :  { %v3236_v4 = vpop.f32.mrf.mxu0  ;;  %v2829_v0 = vpop.f32.mrf.mxu1 }
 0x658   :  { %v7468_v7 = vpack.c.bf16 %v3236_v4, %v3234_v6  ;;  %6579 = vst [vmem:[#allocation9 + $0x2c0] sm:$0xff] %v7437_v59  ;;  %7038 = vmatmul.mubr.msk.f32.gmra.mxu1 %vm1682_vm15, %v4146_v62 }
 0x659   :  { %v3240_v22 = vpop.f32.mrf.mxu0  ;;  %v2831_v23 = vpop.f32.mrf.mxu1  ;;  %4405 = vmatprep.mubr.f32.mxu1 %v8009_v2 }
 0x65a   :  { %v4554_v61 = vpop.trf.xlu1  ;;  %6610 = vst [vmem:[#allocation9 + $0x3b8] sm:$0xff] %v7468_v7  ;;  %v7438_v29 = vpack.c.bf16 %v2831_v23, %v2829_v0  ;;  %v4147_v13 = vpop.trf.xlu0 }
 0x65b   :  { %7061 = vmatmul.mubr.msk.f32.vlgmr.msra.gmra.mxu0 %vm1682_vm15, %v4554_v61  ;;  %v3242_v32 = vpop.f32.mrf.mxu0  ;;  %v2835_v46 = vpop.f32.mrf.mxu1 }
 0x65c   :  { %4768 = vmatprep.mubr.f32.mxu0 %v8009_v2  ;;  %v7469_v16 = vpack.c.bf16 %v3242_v32, %v3240_v22  ;;  %6580 = vst [vmem:[#allocation9 + $0x2c8] sm:$0xff] %v7438_v29  ;;  %7039 = vmatmul.mubr.msk.f32.gmra.mxu1 %vm1682_vm15, %v4147_v13 }
 0x65d   :  { %v3246_v58 = vpop.f32.mrf.mxu0  ;;  %v2837_v34 = vpop.f32.mrf.mxu1  ;;  %4411 = vmatprep.mubr.f32.mxu1 %v8009_v2 }
 0x65e   :  { %v4555_v63 = vpop.trf.xlu1  ;;  %6611 = vst [vmem:[#allocation9 + $0x3c0] sm:$0xff] %v7469_v16  ;;  %v7439_v21 = vpack.c.bf16 %v2837_v34, %v2835_v46  ;;  %v4148_v30 = vpop.trf.xlu0 }
 0x65f   :  { %7062 = vmatmul.mubr.msk.f32.gmra.mxu0 %vm1682_vm15, %v4555_v63  ;;  %v3248_v25 = vpop.f32.mrf.mxu0  ;;  %v2841_v39 = vpop.f32.mrf.mxu1 }
 0x660   :  { %4774 = vmatprep.mubr.f32.mxu0 %v8009_v2  ;;  %v7470_v47 = vpack.c.bf16 %v3248_v25, %v3246_v58  ;;  %6581 = vst [vmem:[#allocation9 + $0x2d0] sm:$0xff] %v7439_v21  ;;  %7040 = vmatmul.mubr.msk.f32.gmra.mxu1 %vm1682_vm15, %v4148_v30 }
 0x661   :  { %v3252_v44 = vpop.f32.mrf.mxu0  ;;  %v2843_v53 = vpop.f32.mrf.mxu1  ;;  %4417 = vmatprep.mubr.f32.mxu1 %v8009_v2 }
 0x662   :  { %v4556_v17 = vpop.trf.xlu1  ;;  %6612 = vst [vmem:[#allocation9 + $0x3c8] sm:$0xff] %v7470_v47  ;;  %v7440_v24 = vpack.c.bf16 %v2843_v53, %v2841_v39  ;;  %v4149_v27 = vpop.trf.xlu0 }
 0x663   :  { %7063 = vmatmul.mubr.msk.f32.gmra.mxu0 %vm1682_vm15, %v4556_v17  ;;  %v3254_v1 = vpop.f32.mrf.mxu0  ;;  %v2847_v8 = vpop.f32.mrf.mxu1 }
 0x664   :  { %4780 = vmatprep.mubr.f32.mxu0 %v8009_v2  ;;  %v7471_v43 = vpack.c.bf16 %v3254_v1, %v3252_v44  ;;  %6582 = vst [vmem:[#allocation9 + $0x2d8] sm:$0xff] %v7440_v24  ;;  %7041 = vmatmul.mubr.msk.f32.gmra.mxu1 %vm1682_vm15, %v4149_v27 }
 0x665   :  { %v3258_v54 = vpop.f32.mrf.mxu0  ;;  %v2849_v33 = vpop.f32.mrf.mxu1  ;;  %4423 = vmatprep.mubr.f32.mxu1 %v8009_v2 }
 0x666   :  { %v4557_v57 = vpop.trf.xlu1  ;;  %6613 = vst [vmem:[#allocation9 + $0x3d0] sm:$0xff] %v7471_v43  ;;  %v7441_v26 = vpack.c.bf16 %v2849_v33, %v2847_v8  ;;  %v4150_v40 = vpop.trf.xlu0 }
 0x667   :  { %7064 = vmatmul.mubr.msk.f32.gmra.mxu0 %vm1682_vm15, %v4557_v57  ;;  %v3260_v51 = vpop.f32.mrf.mxu0  ;;  %v2853_v60 = vpop.f32.mrf.mxu1 }
 0x668   :  { %4786 = vmatprep.mubr.f32.mxu0 %v8009_v2  ;;  %v7472_v36 = vpack.c.bf16 %v3260_v51, %v3258_v54  ;;  %6583 = vst [vmem:[#allocation9 + $0x2e0] sm:$0xff] %v7441_v26  ;;  %7042 = vmatmul.mubr.msk.f32.gmra.mxu1 %vm1682_vm15, %v4150_v40 }
 0x669   :  { %v3264_v31 = vpop.f32.mrf.mxu0  ;;  %v2855_v56 = vpop.f32.mrf.mxu1  ;;  %4429 = vmatprep.mubr.f32.mxu1 %v8009_v2 }
 0x66a   :  { %v4558_v10 = vpop.trf.xlu1  ;;  %6614 = vst [vmem:[#allocation9 + $0x3d8] sm:$0xff] %v7472_v36  ;;  %v7442_v18 = vpack.c.bf16 %v2855_v56, %v2853_v60  ;;  %v4151_v52 = vpop.trf.xlu0 }
 0x66b   :  { %7065 = vmatmul.mubr.msk.f32.gmra.mxu0 %vm1682_vm15, %v4558_v10  ;;  %v3266_v49 = vpop.f32.mrf.mxu0  ;;  %v2859_v35 = vpop.f32.mrf.mxu1 }
 0x66c   :  { %4792 = vmatprep.mubr.f32.mxu0 %v8009_v2  ;;  %v7473_v38 = vpack.c.bf16 %v3266_v49, %v3264_v31  ;;  %6584 = vst [vmem:[#allocation9 + $0x2e8] sm:$0xff] %v7442_v18  ;;  %7043 = vmatmul.mubr.msk.f32.gmra.mxu1 %vm1682_vm15, %v4151_v52 }
 0x66d   :  { %v3270_v11 = vpop.f32.mrf.mxu0  ;;  %v2861_v14 = vpop.f32.mrf.mxu1  ;;  %4435 = vmatprep.mubr.f32.mxu1 %v8009_v2 }
 0x66e   :  { %v4559_v19 = vpop.trf.xlu1  ;;  %6615 = vst [vmem:[#allocation9 + $0x3e0] sm:$0xff] %v7473_v38  ;;  %v7443_v5 = vpack.c.bf16 %v2861_v14, %v2859_v35  ;;  %v4152_v55 = vpop.trf.xlu0 }
 0x66f   :  { %7066 = vmatmul.mubr.msk.f32.gmra.mxu0 %vm1682_vm15, %v4559_v19  ;;  %v3272_v50 = vpop.f32.mrf.mxu0  ;;  %v2865_v12 = vpop.f32.mrf.mxu1 }
 0x670   :  { %4798 = vmatprep.mubr.f32.mxu0 %v8009_v2  ;;  %v7474_v15 = vpack.c.bf16 %v3272_v50, %v3270_v11  ;;  %6585 = vst [vmem:[#allocation9 + $0x2f0] sm:$0xff] %v7443_v5  ;;  %7044 = vmatmul.mubr.msk.f32.gmra.mxu1 %vm1682_vm15, %v4152_v55 }
 0x671   :  { %v3276_v37 = vpop.f32.mrf.mxu0  ;;  %v2867_v3 = vpop.f32.mrf.mxu1  ;;  %4441 = vmatprep.mubr.f32.mxu1 %v8009_v2 }
 0x672   :  { %v4560_v41 = vpop.trf.xlu1  ;;  %6616 = vst [vmem:[#allocation9 + $0x3e8] sm:$0xff] %v7474_v15  ;;  %v7444_v48 = vpack.c.bf16 %v2867_v3, %v2865_v12  ;;  %v4169_v9 = vpop.trf.xlu0 }
 0x673   :  { %7067 = vmatmul.mubr.msk.f32.gmra.mxu0 %vm1682_vm15, %v4560_v41  ;;  %v3278_v20 = vpop.f32.mrf.mxu0  ;;  %v3513_v45 = vpop.f32.mrf.mxu1 }
 0x674   :  { %4804 = vmatprep.mubr.f32.mxu0 %v8009_v2  ;;  %v7475_v42 = vpack.c.bf16 %v3278_v20, %v3276_v37  ;;  %6586 = vst [vmem:[#allocation9 + $0x2f8] sm:$0xff] %v7444_v48  ;;  %7045 = vmatmul.mubr.msk.f32.gmra.mxu1 %vm1682_vm15, %v4169_v9 }
 0x675   :  { %v3282_v6 = vpop.f32.mrf.mxu0  ;;  %v3515_v28 = vpop.f32.mrf.mxu1  ;;  %4447 = vmatprep.mubr.f32.mxu1 %v8009_v2 }
 0x676   :  { %v4561_v59 = vpop.trf.xlu1  ;;  %6617 = vst [vmem:[#allocation9 + $0x3f0] sm:$0xff] %v7475_v42  ;;  %v7477_v62 = vpack.c.bf16 %v3515_v28, %v3513_v45  ;;  %v4170_v4 = vpop.trf.xlu0 }
 0x677   :  { %7068 = vmatmul.mubr.msk.f32.gmra.mxu0 %vm1682_vm15, %v4561_v59  ;;  %v3284_v0 = vpop.f32.mrf.mxu0  ;;  %v3519_v7 = vpop.f32.mrf.mxu1 }
 0x678   :  { %4810 = vmatprep.mubr.f32.mxu0 %v8009_v2  ;;  %v7476_v22 = vpack.c.bf16 %v3284_v0, %v3282_v6  ;;  %6619 = vst [vmem:[#allocation9 + $0x400] sm:$0xff] %v7477_v62  ;;  %7046 = vmatmul.mubr.msk.f32.gmra.mxu1 %vm1682_vm15, %v4170_v4 }
 0x679   :  { %v3930_v23 = vpop.f32.mrf.mxu0  ;;  %v3521_v61 = vpop.f32.mrf.mxu1  ;;  %4453 = vmatprep.mubr.f32.mxu1 %v8009_v2 }
 0x67a   :  { %v4562_v29 = vpop.trf.xlu1  ;;  %6618 = vst [vmem:[#allocation9 + $0x3f8] sm:$0xff] %v7476_v22  ;;  %v7478_v13 = vpack.c.bf16 %v3521_v61, %v3519_v7  ;;  %v4171_v32 = vpop.trf.xlu0 }
 0x67b   :  { %7069 = vmatmul.mubr.msk.f32.gmra.mxu0 %vm1682_vm15, %v4562_v29  ;;  %v3932_v46 = vpop.f32.mrf.mxu0  ;;  %v3525_v16 = vpop.f32.mrf.mxu1 }
 0x67c   :  { %4816 = vmatprep.mubr.f32.mxu0 %v8009_v2  ;;  %v7509_v58 = vpack.c.bf16 %v3932_v46, %v3930_v23  ;;  %6620 = vst [vmem:[#allocation9 + $0x408] sm:$0xff] %v7478_v13  ;;  %7047 = vmatmul.mubr.msk.f32.gmra.mxu1 %vm1682_vm15, %v4171_v32 }
 0x67d   :  { %v3936_v34 = vpop.f32.mrf.mxu0  ;;  %v3527_v63 = vpop.f32.mrf.mxu1  ;;  %4459 = vmatprep.mubr.f32.mxu1 %v8009_v2 }
 0x67e   :  { %v4563_v21 = vpop.trf.xlu1  ;;  %6651 = vst [vmem:[#allocation9 + $0x500] sm:$0xff] %v7509_v58  ;;  %v7479_v30 = vpack.c.bf16 %v3527_v63, %v3525_v16  ;;  %v4172_v25 = vpop.trf.xlu0 }
 0x67f   :  { %7070 = vmatmul.mubr.msk.f32.gmra.mxu0 %vm1682_vm15, %v4563_v21  ;;  %v3938_v39 = vpop.f32.mrf.mxu0  ;;  %v3531_v47 = vpop.f32.mrf.mxu1 }
 0x680   :  { %4822 = vmatprep.mubr.f32.mxu0 %v8009_v2  ;;  %v7510_v44 = vpack.c.bf16 %v3938_v39, %v3936_v34  ;;  %6621 = vst [vmem:[#allocation9 + $0x410] sm:$0xff] %v7479_v30  ;;  %7048 = vmatmul.mubr.msk.f32.gmra.mxu1 %vm1682_vm15, %v4172_v25 }
 0x681   :  { %v3942_v53 = vpop.f32.mrf.mxu0  ;;  %v3533_v17 = vpop.f32.mrf.mxu1  ;;  %4465 = vmatprep.mubr.f32.mxu1 %v8009_v2 }
 0x682   :  { %v4564_v24 = vpop.trf.xlu1  ;;  %6652 = vst [vmem:[#allocation9 + $0x508] sm:$0xff] %v7510_v44  ;;  %v7480_v27 = vpack.c.bf16 %v3533_v17, %v3531_v47  ;;  %v4173_v1 = vpop.trf.xlu0 }
 0x683   :  { %7071 = vmatmul.mubr.msk.f32.gmra.mxu0 %vm1682_vm15, %v4564_v24  ;;  %v3944_v8 = vpop.f32.mrf.mxu0  ;;  %v3537_v43 = vpop.f32.mrf.mxu1 }
 0x684   :  { %4828 = vmatprep.mubr.f32.mxu0 %v8009_v2  ;;  %v7511_v54 = vpack.c.bf16 %v3944_v8, %v3942_v53  ;;  %6622 = vst [vmem:[#allocation9 + $0x418] sm:$0xff] %v7480_v27  ;;  %7049 = vmatmul.mubr.msk.f32.gmra.mxu1 %vm1682_vm15, %v4173_v1 }
 0x685   :  { %v3948_v33 = vpop.f32.mrf.mxu0  ;;  %v3539_v57 = vpop.f32.mrf.mxu1  ;;  %4471 = vmatprep.mubr.f32.mxu1 %v8009_v2 }
 0x686   :  { %v4565_v26 = vpop.trf.xlu1  ;;  %6653 = vst [vmem:[#allocation9 + $0x510] sm:$0xff] %v7511_v54  ;;  %v7481_v40 = vpack.c.bf16 %v3539_v57, %v3537_v43  ;;  %v4174_v51 = vpop.trf.xlu0 }
 0x687   :  { %7072 = vmatmul.mubr.msk.f32.gmra.mxu0 %vm1682_vm15, %v4565_v26  ;;  %v3950_v60 = vpop.f32.mrf.mxu0  ;;  %v3543_v36 = vpop.f32.mrf.mxu1 }
 0x688   :  { %4834 = vmatprep.mubr.f32.mxu0 %v8009_v2  ;;  %v7512_v31 = vpack.c.bf16 %v3950_v60, %v3948_v33  ;;  %6623 = vst [vmem:[#allocation9 + $0x420] sm:$0xff] %v7481_v40  ;;  %7050 = vmatmul.mubr.msk.f32.gmra.mxu1 %vm1682_vm15, %v4174_v51 }
 0x689   :  { %v3954_v56 = vpop.f32.mrf.mxu0  ;;  %v3545_v10 = vpop.f32.mrf.mxu1  ;;  %4477 = vmatprep.mubr.f32.mxu1 %v8009_v2 }
 0x68a   :  { %v4566_v18 = vpop.trf.xlu1  ;;  %6654 = vst [vmem:[#allocation9 + $0x518] sm:$0xff] %v7512_v31  ;;  %v7482_v52 = vpack.c.bf16 %v3545_v10, %v3543_v36  ;;  %v4175_v49 = vpop.trf.xlu0 }
 0x68b   :  { %7073 = vmatmul.mubr.msk.f32.gmra.mxu0 %vm1682_vm15, %v4566_v18  ;;  %v3956_v35 = vpop.f32.mrf.mxu0  ;;  %v3549_v38 = vpop.f32.mrf.mxu1 }
 0x68c   :  { %4840 = vmatprep.mubr.f32.mxu0 %v8009_v2  ;;  %v7513_v11 = vpack.c.bf16 %v3956_v35, %v3954_v56  ;;  %6624 = vst [vmem:[#allocation9 + $0x428] sm:$0xff] %v7482_v52  ;;  %7051 = vmatmul.mubr.msk.f32.gmra.mxu1 %vm1682_vm15, %v4175_v49 }
 0x68d   :  { %v3960_v14 = vpop.f32.mrf.mxu0  ;;  %v3551_v19 = vpop.f32.mrf.mxu1  ;;  %4483 = vmatprep.mubr.f32.mxu1 %v8009_v2 }
 0x68e   :  { %v4567_v5 = vpop.trf.xlu1  ;;  %6655 = vst [vmem:[#allocation9 + $0x520] sm:$0xff] %v7513_v11  ;;  %v7483_v55 = vpack.c.bf16 %v3551_v19, %v3549_v38  ;;  %v4176_v50 = vpop.trf.xlu0 }
 0x68f   :  { %7074 = vmatmul.mubr.msk.f32.gmra.mxu0 %vm1682_vm15, %v4567_v5  ;;  %v3962_v12 = vpop.f32.mrf.mxu0  ;;  %v3555_v15 = vpop.f32.mrf.mxu1 }
 0x690   :  { %4846 = vmatprep.mubr.f32.mxu0 %v8009_v2  ;;  %v7514_v37 = vpack.c.bf16 %v3962_v12, %v3960_v14  ;;  %6625 = vst [vmem:[#allocation9 + $0x430] sm:$0xff] %v7483_v55  ;;  %7052 = vmatmul.mubr.msk.f32.gmra.mxu1 %vm1682_vm15, %v4176_v50 }
 0x691   :  { %v3966_v3 = vpop.f32.mrf.mxu0  ;;  %v3557_v41 = vpop.f32.mrf.mxu1  ;;  %4489 = vmatprep.mubr.f32.mxu1 %v8009_v2 }
 0x692   :  { %v4568_v48 = vpop.trf.xlu1  ;;  %6656 = vst [vmem:[#allocation9 + $0x528] sm:$0xff] %v7514_v37  ;;  %v7484_v9 = vpack.c.bf16 %v3557_v41, %v3555_v15  ;;  %v4177_v20 = vpop.trf.xlu0 }
 0x693   :  { %7075 = vmatmul.mubr.msk.f32.gmra.mxu0 %vm1682_vm15, %v4568_v48  ;;  %v3968_v45 = vpop.f32.mrf.mxu0  ;;  %v3561_v42 = vpop.f32.mrf.mxu1 }
 0x694   :  { %4852 = vmatprep.mubr.f32.mxu0 %v8009_v2  ;;  %v7515_v6 = vpack.c.bf16 %v3968_v45, %v3966_v3  ;;  %6626 = vst [vmem:[#allocation9 + $0x438] sm:$0xff] %v7484_v9  ;;  %7053 = vmatmul.mubr.msk.f32.gmra.mxu1 %vm1682_vm15, %v4177_v20 }
 0x695   :  { %v3972_v28 = vpop.f32.mrf.mxu0  ;;  %v3563_v59 = vpop.f32.mrf.mxu1  ;;  %4495 = vmatprep.mubr.f32.mxu1 %v8009_v2 }
 0x696   :  { %v4569_v62 = vpop.trf.xlu1  ;;  %6657 = vst [vmem:[#allocation9 + $0x530] sm:$0xff] %v7515_v6  ;;  %v7485_v4 = vpack.c.bf16 %v3563_v59, %v3561_v42  ;;  %v4178_v0 = vpop.trf.xlu0 }
 0x697   :  { %7076 = vmatmul.mubr.msk.f32.gmra.mxu0 %vm1682_vm15, %v4569_v62  ;;  %v3974_v7 = vpop.f32.mrf.mxu0  ;;  %v3567_v22 = vpop.f32.mrf.mxu1 }
 0x698   :  { %4858 = vmatprep.mubr.f32.mxu0 %v8009_v2  ;;  %v7516_v23 = vpack.c.bf16 %v3974_v7, %v3972_v28  ;;  %6627 = vst [vmem:[#allocation9 + $0x440] sm:$0xff] %v7485_v4  ;;  %7054 = vmatmul.mubr.msk.f32.gmra.mxu1 %vm1682_vm15, %v4178_v0 }
 0x699   :  { %v3978_v61 = vpop.f32.mrf.mxu0  ;;  %v3569_v29 = vpop.f32.mrf.mxu1  ;;  %4501 = vmatprep.mubr.f32.mxu1 %v8009_v2 }
 0x69a   :  { %v4586_v13 = vpop.trf.xlu1  ;;  %6658 = vst [vmem:[#allocation9 + $0x538] sm:$0xff] %v7516_v23  ;;  %v7486_v32 = vpack.c.bf16 %v3569_v29, %v3567_v22  ;;  %v4179_v46 = vpop.trf.xlu0 }
 0x69b   :  { %7077 = vmatmul.mubr.msk.f32.gmra.mxu0 %vm1682_vm15, %v4586_v13  ;;  %v3980_v16 = vpop.f32.mrf.mxu0  ;;  %v3573_v58 = vpop.f32.mrf.mxu1 }
 0x69c   :  { %4864 = vmatprep.mubr.f32.mxu0 %v8009_v2  ;;  %v7517_v34 = vpack.c.bf16 %v3980_v16, %v3978_v61  ;;  %6628 = vst [vmem:[#allocation9 + $0x448] sm:$0xff] %v7486_v32  ;;  %7055 = vmatmul.mubr.msk.f32.gmra.mxu1 %vm1682_vm15, %v4179_v46 }
 0x69d   :  { %v3984_v63 = vpop.f32.mrf.mxu0  ;;  %v3575_v21 = vpop.f32.mrf.mxu1  ;;  %4507 = vmatprep.mubr.f32.mxu1 %v8009_v2 }
 0x69e   :  { %v4587_v30 = vpop.trf.xlu1  ;;  %6659 = vst [vmem:[#allocation9 + $0x540] sm:$0xff] %v7517_v34  ;;  %v7487_v25 = vpack.c.bf16 %v3575_v21, %v3573_v58  ;;  %v4180_v39 = vpop.trf.xlu0 }
 0x69f   :  { %7078 = vmatmul.mubr.msk.f32.gmra.mxu0 %vm1682_vm15, %v4587_v30  ;;  %v3986_v47 = vpop.f32.mrf.mxu0 }
 0x6a0   :  { %4870 = vmatprep.mubr.f32.mxu0 %v8009_v2  ;;  %v7518_v44 = vpack.c.bf16 %v3986_v47, %v3984_v63  ;;  %6629 = vst [vmem:[#allocation9 + $0x450] sm:$0xff] %v7487_v25  ;;  %v3579_v53 = vpop.f32.mrf.mxu1  ;;  %7056 = vmatmul.mubr.msk.f32.gmra.mxu1 %vm1682_vm15, %v4180_v39 }
 0x6a1   :  { %v3990_v17 = vpop.f32.mrf.mxu0  ;;  %4513 = vmatprep.mubr.f32.mxu1 %v8009_v2 }
 0x6a2   :  { %v4588_v24 = vpop.trf.xlu1  ;;  %6660 = vst [vmem:[#allocation9 + $0x548] sm:$0xff] %v7518_v44  ;;  %v3581_v27 = vpop.f32.mrf.mxu1 }
 0x6a3   :  { %7079 = vmatmul.mubr.msk.f32.gmra.mxu0 %vm1682_vm15, %v4588_v24  ;;  %v3992_v1 = vpop.f32.mrf.mxu0  ;;  %v7488_v8 = vpack.c.bf16 %v3581_v27, %v3579_v53  ;;  %v4181_v43 = vpop.trf.xlu0 }
 0x6a4   :  { %4876 = vmatprep.mubr.f32.mxu0 %v8009_v2  ;;  %v7519_v54 = vpack.c.bf16 %v3992_v1, %v3990_v17  ;;  %v3585_v33 = vpop.f32.mrf.mxu1  ;;  %7057 = vmatmul.mubr.msk.f32.gmra.mxu1 %vm1682_vm15, %v4181_v43 }
 0x6a5   :  { %v3996_v57 = vpop.f32.mrf.mxu0  ;;  %6630 = vst [vmem:[#allocation9 + $0x458] sm:$0xff] %v7488_v8  ;;  %4519 = vmatprep.mubr.f32.mxu1 %v8009_v2 }
 0x6a6   :  { %v4589_v26 = vpop.trf.xlu1  ;;  %6661 = vst [vmem:[#allocation9 + $0x550] sm:$0xff] %v7519_v54  ;;  %v3587_v40 = vpop.f32.mrf.mxu1 }
 0x6a7   :  { %7080 = vmatmul.mubr.msk.f32.gmra.mxu0 %vm1682_vm15, %v4589_v26  ;;  %v3998_v51 = vpop.f32.mrf.mxu0  ;;  %v7489_v60 = vpack.c.bf16 %v3587_v40, %v3585_v33  ;;  %v4182_v36 = vpop.trf.xlu0 }
 0x6a8   :  { %4882 = vmatprep.mubr.f32.mxu0 %v8009_v2  ;;  %v7520_v31 = vpack.c.bf16 %v3998_v51, %v3996_v57  ;;  %v3591_v56 = vpop.f32.mrf.mxu1  ;;  %7058 = vmatmul.mubr.msk.f32.gmra.mxu1 %vm1682_vm15, %v4182_v36 }
 0x6a9   :  { %v4002_v10 = vpop.f32.mrf.mxu0  ;;  %6631 = vst [vmem:[#allocation9 + $0x460] sm:$0xff] %v7489_v60  ;;  %4525 = vmatprep.mubr.f32.mxu1 %v8009_v2 }
 0x6aa   :  { %v4590_v18 = vpop.trf.xlu1  ;;  %6662 = vst [vmem:[#allocation9 + $0x558] sm:$0xff] %v7520_v31  ;;  %v3593_v52 = vpop.f32.mrf.mxu1 }
 0x6ab   :  { %7081 = vmatmul.mubr.msk.f32.gmra.mxu0 %vm1682_vm15, %v4590_v18  ;;  %v4004_v49 = vpop.f32.mrf.mxu0  ;;  %v7490_v35 = vpack.c.bf16 %v3593_v52, %v3591_v56  ;;  %v4183_v38 = vpop.trf.xlu0 }
 0x6ac   :  { %4888 = vmatprep.mubr.f32.mxu0 %v8009_v2  ;;  %v7521_v11 = vpack.c.bf16 %v4004_v49, %v4002_v10  ;;  %v3597_v14 = vpop.f32.mrf.mxu1  ;;  %7059 = vmatmul.mubr.msk.f32.gmra.mxu1 %vm1682_vm15, %v4183_v38 }
 0x6ad   :  { %v4008_v19 = vpop.f32.mrf.mxu0  ;;  %6632 = vst [vmem:[#allocation9 + $0x468] sm:$0xff] %v7490_v35  ;;  %4531 = vmatprep.mubr.f32.mxu1 %v8009_v2 }
 0x6ae   :  { %v4591_v5 = vpop.trf.xlu1  ;;  %6663 = vst [vmem:[#allocation9 + $0x560] sm:$0xff] %v7521_v11  ;;  %v3599_v55 = vpop.f32.mrf.mxu1 }
 0x6af   :  { %7082 = vmatmul.mubr.msk.f32.gmra.mxu0 %vm1682_vm15, %v4591_v5  ;;  %v4010_v50 = vpop.f32.mrf.mxu0  ;;  %v7491_v12 = vpack.c.bf16 %v3599_v55, %v3597_v14  ;;  %v4184_v15 = vpop.trf.xlu0 }
 0x6b0   :  { %4894 = vmatprep.mubr.f32.mxu0 %v8009_v2  ;;  %v7522_v37 = vpack.c.bf16 %v4010_v50, %v4008_v19  ;;  %v3603_v3 = vpop.f32.mrf.mxu1  ;;  %7060 = vmatmul.mubr.msk.f32.gmra.mxu1 %vm1682_vm15, %v4184_v15 }
 0x6b1   :  { %v4014_v41 = vpop.f32.mrf.mxu0  ;;  %6633 = vst [vmem:[#allocation9 + $0x470] sm:$0xff] %v7491_v12 }
 0x6b2   :  { %v4592_v48 = vpop.trf.xlu1  ;;  %6664 = vst [vmem:[#allocation9 + $0x568] sm:$0xff] %v7522_v37  ;;  %v3605_v9 = vpop.f32.mrf.mxu1 }
 0x6b3   :  { %7083 = vmatmul.mubr.msk.f32.gmra.mxu0 %vm1682_vm15, %v4592_v48  ;;  %v4016_v20 = vpop.f32.mrf.mxu0  ;;  %v7492_v45 = vpack.c.bf16 %v3605_v9, %v3603_v3 }
 0x6b4   :  { %4900 = vmatprep.mubr.f32.mxu0 %v8009_v2  ;;  %v7523_v42 = vpack.c.bf16 %v4016_v20, %v4014_v41  ;;  %v3609_v6 = vpop.f32.mrf.mxu1 }
 0x6b5   :  { %v4020_v28 = vpop.f32.mrf.mxu0  ;;  %6634 = vst [vmem:[#allocation9 + $0x478] sm:$0xff] %v7492_v45 }
 0x6b6   :  { %v4593_v59 = vpop.trf.xlu1  ;;  %6665 = vst [vmem:[#allocation9 + $0x570] sm:$0xff] %v7523_v42  ;;  %v3611_v62 = vpop.f32.mrf.mxu1 }
 0x6b7   :  { %7084 = vmatmul.mubr.msk.f32.gmra.mxu0 %vm1682_vm15, %v4593_v59  ;;  %v4022_v4 = vpop.f32.mrf.mxu0  ;;  %v7493_v0 = vpack.c.bf16 %v3611_v62, %v3609_v6 }
 0x6b8   :  { %4906 = vmatprep.mubr.f32.mxu0 %v8009_v2  ;;  %v7524_v7 = vpack.c.bf16 %v4022_v4, %v4020_v28  ;;  %v3615_v22 = vpop.f32.mrf.mxu1 }
 0x6b9   :  { %v4026_v23 = vpop.f32.mrf.mxu0  ;;  %6635 = vst [vmem:[#allocation9 + $0x480] sm:$0xff] %v7493_v0 }
 0x6ba   :  { %v4594_v61 = vpop.trf.xlu1  ;;  %6666 = vst [vmem:[#allocation9 + $0x578] sm:$0xff] %v7524_v7  ;;  %v3617_v29 = vpop.f32.mrf.mxu1 }
 0x6bb   :  { %7085 = vmatmul.mubr.msk.f32.gmra.mxu0 %vm1682_vm15, %v4594_v61  ;;  %v4028_v13 = vpop.f32.mrf.mxu0  ;;  %v7494_v32 = vpack.c.bf16 %v3617_v29, %v3615_v22 }
 0x6bc   :  { %4912 = vmatprep.mubr.f32.mxu0 %v8009_v2  ;;  %v7525_v46 = vpack.c.bf16 %v4028_v13, %v4026_v23  ;;  %v3621_v16 = vpop.f32.mrf.mxu1 }
 0x6bd   :  { %v4032_v58 = vpop.f32.mrf.mxu0  ;;  %6636 = vst [vmem:[#allocation9 + $0x488] sm:$0xff] %v7494_v32 }
 0x6be   :  { %v4595_v34 = vpop.trf.xlu1  ;;  %6667 = vst [vmem:[#allocation9 + $0x580] sm:$0xff] %v7525_v46  ;;  %v3623_v63 = vpop.f32.mrf.mxu1 }
 0x6bf   :  { %7086 = vmatmul.mubr.msk.f32.gmra.mxu0 %vm1682_vm15, %v4595_v34  ;;  %v4034_v21 = vpop.f32.mrf.mxu0  ;;  %v7495_v30 = vpack.c.bf16 %v3623_v63, %v3621_v16 }
 0x6c0   :  { %4918 = vmatprep.mubr.f32.mxu0 %v8009_v2  ;;  %v7526_v25 = vpack.c.bf16 %v4034_v21, %v4032_v58  ;;  %v3627_v39 = vpop.f32.mrf.mxu1 }
 0x6c1   :  { %v4038_v47 = vpop.f32.mrf.mxu0  ;;  %6637 = vst [vmem:[#allocation9 + $0x490] sm:$0xff] %v7495_v30 }
 0x6c2   :  { %v4596_v44 = vpop.trf.xlu1  ;;  %6668 = vst [vmem:[#allocation9 + $0x588] sm:$0xff] %v7526_v25  ;;  %v3629_v53 = vpop.f32.mrf.mxu1 }
 0x6c3   :  { %7087 = vmatmul.mubr.msk.f32.gmra.mxu0 %vm1682_vm15, %v4596_v44  ;;  %v4040_v17 = vpop.f32.mrf.mxu0  ;;  %v7496_v24 = vpack.c.bf16 %v3629_v53, %v3627_v39 }
 0x6c4   :  { %4924 = vmatprep.mubr.f32.mxu0 %v8009_v2  ;;  %v7527_v27 = vpack.c.bf16 %v4040_v17, %v4038_v47  ;;  %v3633_v1 = vpop.f32.mrf.mxu1 }
 0x6c5   :  { %v4044_v8 = vpop.f32.mrf.mxu0  ;;  %6638 = vst [vmem:[#allocation9 + $0x498] sm:$0xff] %v7496_v24 }
 0x6c6   :  { %v4597_v43 = vpop.trf.xlu1  ;;  %6669 = vst [vmem:[#allocation9 + $0x590] sm:$0xff] %v7527_v27  ;;  %v3635_v54 = vpop.f32.mrf.mxu1 }
 0x6c7   :  { %7088 = vmatmul.mubr.msk.f32.gmra.mxu0 %vm1682_vm15, %v4597_v43  ;;  %v4046_v33 = vpop.f32.mrf.mxu0  ;;  %v7497_v57 = vpack.c.bf16 %v3635_v54, %v3633_v1 }
 0x6c8   :  { %4930 = vmatprep.mubr.f32.mxu0 %v8009_v2  ;;  %v7528_v26 = vpack.c.bf16 %v4046_v33, %v4044_v8  ;;  %v3639_v40 = vpop.f32.mrf.mxu1 }
 0x6c9   :  { %v4050_v51 = vpop.f32.mrf.mxu0  ;;  %6639 = vst [vmem:[#allocation9 + $0x4a0] sm:$0xff] %v7497_v57 }
 0x6ca   :  { %v4598_v60 = vpop.trf.xlu1  ;;  %6670 = vst [vmem:[#allocation9 + $0x598] sm:$0xff] %v7528_v26  ;;  %v3641_v36 = vpop.f32.mrf.mxu1 }
 0x6cb   :  { %7089 = vmatmul.mubr.msk.f32.gmra.mxu0 %vm1682_vm15, %v4598_v60  ;;  %v4052_v31 = vpop.f32.mrf.mxu0  ;;  %v7498_v56 = vpack.c.bf16 %v3641_v36, %v3639_v40 }
 0x6cc   :  { %4936 = vmatprep.mubr.f32.mxu0 %v8009_v2  ;;  %v7529_v10 = vpack.c.bf16 %v4052_v31, %v4050_v51  ;;  %v3645_v18 = vpop.f32.mrf.mxu1 }
 0x6cd   :  { %v4056_v52 = vpop.f32.mrf.mxu0  ;;  %6640 = vst [vmem:[#allocation9 + $0x4a8] sm:$0xff] %v7498_v56 }
 0x6ce   :  { %v4599_v49 = vpop.trf.xlu1  ;;  %6671 = vst [vmem:[#allocation9 + $0x5a0] sm:$0xff] %v7529_v10  ;;  %v3647_v35 = vpop.f32.mrf.mxu1 }
 0x6cf   :  { %7090 = vmatmul.mubr.msk.f32.gmra.mxu0 %vm1682_vm15, %v4599_v49  ;;  %v4058_v38 = vpop.f32.mrf.mxu0  ;;  %v7499_v11 = vpack.c.bf16 %v3647_v35, %v3645_v18 }
 0x6d0   :  { %4942 = vmatprep.mubr.f32.mxu0 %v8009_v2  ;;  %v7530_v14 = vpack.c.bf16 %v4058_v38, %v4056_v52  ;;  %v3651_v19 = vpop.f32.mrf.mxu1 }
 0x6d1   :  { %v4062_v5 = vpop.f32.mrf.mxu0  ;;  %6641 = vst [vmem:[#allocation9 + $0x4b0] sm:$0xff] %v7499_v11 }
 0x6d2   :  { %v4600_v55 = vpop.trf.xlu1  ;;  %6672 = vst [vmem:[#allocation9 + $0x5a8] sm:$0xff] %v7530_v14  ;;  %v3653_v50 = vpop.f32.mrf.mxu1 }
 0x6d3   :  { %7091 = vmatmul.mubr.msk.f32.gmra.mxu0 %vm1682_vm15, %v4600_v55  ;;  %v4064_v12 = vpop.f32.mrf.mxu0  ;;  %v7500_v15 = vpack.c.bf16 %v3653_v50, %v3651_v19 }
 0x6d4   :  { %4948 = vmatprep.mubr.f32.mxu0 %v8009_v2  ;;  %v7531_v37 = vpack.c.bf16 %v4064_v12, %v4062_v5  ;;  %v3657_v3 = vpop.f32.mrf.mxu1 }
 0x6d5   :  { %v4068_v41 = vpop.f32.mrf.mxu0  ;;  %6642 = vst [vmem:[#allocation9 + $0x4b8] sm:$0xff] %v7500_v15 }
 0x6d6   :  { %v4601_v48 = vpop.trf.xlu1  ;;  %6673 = vst [vmem:[#allocation9 + $0x5b0] sm:$0xff] %v7531_v37  ;;  %v3659_v9 = vpop.f32.mrf.mxu1 }
 0x6d7   :  { %7092 = vmatmul.mubr.msk.f32.gmra.mxu0 %vm1682_vm15, %v4601_v48  ;;  %v4070_v20 = vpop.f32.mrf.mxu0  ;;  %v7501_v45 = vpack.c.bf16 %v3659_v9, %v3657_v3 }
 0x6d8   :  { %v7532_v42 = vpack.c.bf16 %v4070_v20, %v4068_v41  ;;  %v3663_v6 = vpop.f32.mrf.mxu1 }
 0x6d9   :  { %v4074_v28 = vpop.f32.mrf.mxu0  ;;  %6643 = vst [vmem:[#allocation9 + $0x4c0] sm:$0xff] %v7501_v45 }
 0x6da   :  { %6674 = vst [vmem:[#allocation9 + $0x5b8] sm:$0xff] %v7532_v42  ;;  %v3665_v59 = vpop.f32.mrf.mxu1 }
 0x6db   :  { %v4076_v62 = vpop.f32.mrf.mxu0  ;;  %v7502_v4 = vpack.c.bf16 %v3665_v59, %v3663_v6 }
 0x6dc   :  { %v7533_v2 = vpack.c.bf16 %v4076_v62, %v4074_v28  ;;  %v3669_v0 = vpop.f32.mrf.mxu1 }
 0x6dd   :  { %v4080_v7 = vpop.f32.mrf.mxu0  ;;  %6644 = vst [vmem:[#allocation9 + $0x4c8] sm:$0xff] %v7502_v4 }
 0x6de   :  { %6675 = vst [vmem:[#allocation9 + $0x5c0] sm:$0xff] %v7533_v2  ;;  %v3671_v22 = vpop.f32.mrf.mxu1 }
 0x6df   :  { %v4082_v23 = vpop.f32.mrf.mxu0  ;;  %v7503_v61 = vpack.c.bf16 %v3671_v22, %v3669_v0 }
 0x6e0   :  { %v7534_v29 = vpack.c.bf16 %v4082_v23, %v4080_v7  ;;  %v3675_v13 = vpop.f32.mrf.mxu1 }
 0x6e1   :  { %v4086_v32 = vpop.f32.mrf.mxu0  ;;  %6645 = vst [vmem:[#allocation9 + $0x4d0] sm:$0xff] %v7503_v61 }
 0x6e2   :  { %6676 = vst [vmem:[#allocation9 + $0x5c8] sm:$0xff] %v7534_v29  ;;  %v3677_v46 = vpop.f32.mrf.mxu1 }
 0x6e3   :  { %v4088_v16 = vpop.f32.mrf.mxu0  ;;  %v7504_v58 = vpack.c.bf16 %v3677_v46, %v3675_v13 }
 0x6e4   :  { %v7535_v34 = vpack.c.bf16 %v4088_v16, %v4086_v32  ;;  %v3681_v63 = vpop.f32.mrf.mxu1 }
 0x6e5   :  { %v4092_v21 = vpop.f32.mrf.mxu0  ;;  %6646 = vst [vmem:[#allocation9 + $0x4d8] sm:$0xff] %v7504_v58 }
 0x6e6   :  { %6677 = vst [vmem:[#allocation9 + $0x5d0] sm:$0xff] %v7535_v34  ;;  %v3683_v30 = vpop.f32.mrf.mxu1 }
 0x6e7   :  { %v4094_v25 = vpop.f32.mrf.mxu0  ;;  %v7505_v39 = vpack.c.bf16 %v3683_v30, %v3681_v63 }
 0x6e8   :  { %v7536_v47 = vpack.c.bf16 %v4094_v25, %v4092_v21  ;;  %v3687_v44 = vpop.f32.mrf.mxu1 }
 0x6e9   :  { %v4098_v53 = vpop.f32.mrf.mxu0  ;;  %6647 = vst [vmem:[#allocation9 + $0x4e0] sm:$0xff] %v7505_v39 }
 0x6ea   :  { %6678 = vst [vmem:[#allocation9 + $0x5d8] sm:$0xff] %v7536_v47  ;;  %v3689_v17 = vpop.f32.mrf.mxu1 }
 0x6eb   :  { %v4100_v24 = vpop.f32.mrf.mxu0  ;;  %v7506_v27 = vpack.c.bf16 %v3689_v17, %v3687_v44 }
 0x6ec   :  { %v7537_v1 = vpack.c.bf16 %v4100_v24, %v4098_v53  ;;  %v3693_v8 = vpop.f32.mrf.mxu1 }
 0x6ed   :  { %v4104_v43 = vpop.f32.mrf.mxu0  ;;  %6648 = vst [vmem:[#allocation9 + $0x4e8] sm:$0xff] %v7506_v27 }
 0x6ee   :  { %6679 = vst [vmem:[#allocation9 + $0x5e0] sm:$0xff] %v7537_v1  ;;  %v3695_v54 = vpop.f32.mrf.mxu1 }
 0x6ef   :  { %v4106_v33 = vpop.f32.mrf.mxu0  ;;  %v7507_v57 = vpack.c.bf16 %v3695_v54, %v3693_v8 }
 0x6f0   :  { %v7538_v26 = vpack.c.bf16 %v4106_v33, %v4104_v43  ;;  %v3699_v40 = vpop.f32.mrf.mxu1 }
 0x6f1   :  { %v4110_v51 = vpop.f32.mrf.mxu0  ;;  %6649 = vst [vmem:[#allocation9 + $0x4f0] sm:$0xff] %v7507_v57 }
 0x6f2   :  { %6680 = vst [vmem:[#allocation9 + $0x5e8] sm:$0xff] %v7538_v26  ;;  %v3701_v60 = vpop.f32.mrf.mxu1 }
 0x6f3   :  { %v4112_v36 = vpop.f32.mrf.mxu0  ;;  %v7508_v31 = vpack.c.bf16 %v3701_v60, %v3699_v40 }
 0x6f4   :  { %v7539_v56 = vpack.c.bf16 %v4112_v36, %v4110_v51  ;;  %v4347_v10 = vpop.f32.mrf.mxu1 }
 0x6f5   :  { %v4116_v18 = vpop.f32.mrf.mxu0  ;;  %6650 = vst [vmem:[#allocation9 + $0x4f8] sm:$0xff] %v7508_v31 }
 0x6f6   :  { %6681 = vst [vmem:[#allocation9 + $0x5f0] sm:$0xff] %v7539_v56  ;;  %v4349_v52 = vpop.f32.mrf.mxu1 }
 0x6f7   :  { %v4118_v49 = vpop.f32.mrf.mxu0  ;;  %v7541_v35 = vpack.c.bf16 %v4349_v52, %v4347_v10 }
 0x6f8   :  { %v7540_v38 = vpack.c.bf16 %v4118_v49, %v4116_v18  ;;  %v4353_v11 = vpop.f32.mrf.mxu1 }
 0x6f9   :  { %6683 = vst [vmem:[#allocation9 + $0x600] sm:$0xff] %v7541_v35 }
 0x6fa   :  { %6682 = vst [vmem:[#allocation9 + $0x5f8] sm:$0xff] %v7540_v38  ;;  %v4355_v14 = vpop.f32.mrf.mxu1 }
 0x6fb   :  { %v7542_v19 = vpack.c.bf16 %v4355_v14, %v4353_v11 }
 0x6fc   :  { %v4359_v5 = vpop.f32.mrf.mxu1 }
 0x6fd   :  { %6684 = vst [vmem:[#allocation9 + $0x608] sm:$0xff] %v7542_v19 }
 0x6fe   :  { %v4361_v55 = vpop.f32.mrf.mxu1 }
 0x6ff   :  { %v7543_v50 = vpack.c.bf16 %v4361_v55, %v4359_v5 }
 0x700   :  { %v4365_v12 = vpop.f32.mrf.mxu1 }
 0x701   :  { %6685 = vst [vmem:[#allocation9 + $0x610] sm:$0xff] %v7543_v50 }
 0x702   :  { %v4367_v15 = vpop.f32.mrf.mxu1 }
 0x703   :  { %v7544_v37 = vpack.c.bf16 %v4367_v15, %v4365_v12 }
 0x704   :  { %v4371_v3 = vpop.f32.mrf.mxu1 }
 0x705   :  { %6686 = vst [vmem:[#allocation9 + $0x618] sm:$0xff] %v7544_v37 }
 0x706   :  { %v4373_v41 = vpop.f32.mrf.mxu1 }
 0x707   :  { %v7545_v48 = vpack.c.bf16 %v4373_v41, %v4371_v3 }
 0x708   :  { %v4377_v9 = vpop.f32.mrf.mxu1 }
 0x709   :  { %6687 = vst [vmem:[#allocation9 + $0x620] sm:$0xff] %v7545_v48 }
 0x70a   :  { %v4379_v20 = vpop.f32.mrf.mxu1 }
 0x70b   :  { %v7546_v45 = vpack.c.bf16 %v4379_v20, %v4377_v9 }
 0x70c   :  { %v4383_v42 = vpop.f32.mrf.mxu1 }
 0x70d   :  { %6688 = vst [vmem:[#allocation9 + $0x628] sm:$0xff] %v7546_v45 }
 0x70e   :  { %v4385_v6 = vpop.f32.mrf.mxu1 }
 0x70f   :  { %v7547_v28 = vpack.c.bf16 %v4385_v6, %v4383_v42 }
 0x710   :  { %v4389_v59 = vpop.f32.mrf.mxu1 }
 0x711   :  { %6689 = vst [vmem:[#allocation9 + $0x630] sm:$0xff] %v7547_v28 }
 0x712   :  { %v4391_v62 = vpop.f32.mrf.mxu1 }
 0x713   :  { %v7548_v4 = vpack.c.bf16 %v4391_v62, %v4389_v59 }
 0x714   :  { %v4395_v2 = vpop.f32.mrf.mxu1 }
 0x715   :  { %6690 = vst [vmem:[#allocation9 + $0x638] sm:$0xff] %v7548_v4 }
 0x716   :  { %v4397_v0 = vpop.f32.mrf.mxu1 }
 0x717   :  { %v7549_v7 = vpack.c.bf16 %v4397_v0, %v4395_v2 }
 0x718   :  { %v4401_v22 = vpop.f32.mrf.mxu1 }
 0x719   :  { %6691 = vst [vmem:[#allocation9 + $0x640] sm:$0xff] %v7549_v7 }
 0x71a   :  { %v4403_v23 = vpop.f32.mrf.mxu1 }
 0x71b   :  { %v4764_v61 = vpop.f32.mrf.mxu0  ;;  %v7550_v29 = vpack.c.bf16 %v4403_v23, %v4401_v22 }
 0x71c   :  { %v4407_v13 = vpop.f32.mrf.mxu1 }
 0x71d   :  { %v4766_v32 = vpop.f32.mrf.mxu0  ;;  %6692 = vst [vmem:[#allocation9 + $0x648] sm:$0xff] %v7550_v29 }
 0x71e   :  { %v7573_v46 = vpack.c.bf16 %v4766_v32, %v4764_v61  ;;  %v4409_v16 = vpop.f32.mrf.mxu1 }
 0x71f   :  { %v4770_v58 = vpop.f32.mrf.mxu0  ;;  %v7551_v34 = vpack.c.bf16 %v4409_v16, %v4407_v13 }
 0x720   :  { %6715 = vst [vmem:[#allocation9 + $0x700] sm:$0xff] %v7573_v46  ;;  %v4413_v63 = vpop.f32.mrf.mxu1 }
 0x721   :  { %v4772_v21 = vpop.f32.mrf.mxu0  ;;  %6693 = vst [vmem:[#allocation9 + $0x650] sm:$0xff] %v7551_v34 }
 0x722   :  { %v7574_v30 = vpack.c.bf16 %v4772_v21, %v4770_v58  ;;  %v4415_v25 = vpop.f32.mrf.mxu1 }
 0x723   :  { %v4776_v39 = vpop.f32.mrf.mxu0  ;;  %v7552_v47 = vpack.c.bf16 %v4415_v25, %v4413_v63 }
 0x724   :  { %6716 = vst [vmem:[#allocation9 + $0x708] sm:$0xff] %v7574_v30  ;;  %v4419_v44 = vpop.f32.mrf.mxu1 }
 0x725   :  { %v4778_v53 = vpop.f32.mrf.mxu0  ;;  %6694 = vst [vmem:[#allocation9 + $0x658] sm:$0xff] %v7552_v47 }
 0x726   :  { %v7575_v17 = vpack.c.bf16 %v4778_v53, %v4776_v39  ;;  %v4421_v24 = vpop.f32.mrf.mxu1 }
 0x727   :  { %v4782_v27 = vpop.f32.mrf.mxu0  ;;  %v7553_v1 = vpack.c.bf16 %v4421_v24, %v4419_v44 }
 0x728   :  { %6717 = vst [vmem:[#allocation9 + $0x710] sm:$0xff] %v7575_v17  ;;  %v4425_v8 = vpop.f32.mrf.mxu1 }
 0x729   :  { %v4784_v43 = vpop.f32.mrf.mxu0  ;;  %6695 = vst [vmem:[#allocation9 + $0x660] sm:$0xff] %v7553_v1 }
 0x72a   :  { %v7576_v54 = vpack.c.bf16 %v4784_v43, %v4782_v27  ;;  %v4427_v33 = vpop.f32.mrf.mxu1 }
 0x72b   :  { %v4788_v57 = vpop.f32.mrf.mxu0  ;;  %v7554_v26 = vpack.c.bf16 %v4427_v33, %v4425_v8 }
 0x72c   :  { %6718 = vst [vmem:[#allocation9 + $0x718] sm:$0xff] %v7576_v54  ;;  %v4431_v40 = vpop.f32.mrf.mxu1 }
 0x72d   :  { %v4790_v51 = vpop.f32.mrf.mxu0  ;;  %6696 = vst [vmem:[#allocation9 + $0x668] sm:$0xff] %v7554_v26 }
 0x72e   :  { %v7577_v60 = vpack.c.bf16 %v4790_v51, %v4788_v57  ;;  %v4433_v36 = vpop.f32.mrf.mxu1 }
 0x72f   :  { %v4794_v31 = vpop.f32.mrf.mxu0  ;;  %v7555_v56 = vpack.c.bf16 %v4433_v36, %v4431_v40 }
 0x730   :  { %6719 = vst [vmem:[#allocation9 + $0x720] sm:$0xff] %v7577_v60  ;;  %v4437_v10 = vpop.f32.mrf.mxu1 }
 0x731   :  { %v4796_v18 = vpop.f32.mrf.mxu0  ;;  %6697 = vst [vmem:[#allocation9 + $0x670] sm:$0xff] %v7555_v56 }
 0x732   :  { %v7578_v52 = vpack.c.bf16 %v4796_v18, %v4794_v31  ;;  %v4439_v49 = vpop.f32.mrf.mxu1 }
 0x733   :  { %v4800_v35 = vpop.f32.mrf.mxu0  ;;  %v7556_v38 = vpack.c.bf16 %v4439_v49, %v4437_v10 }
 0x734   :  { %6720 = vst [vmem:[#allocation9 + $0x728] sm:$0xff] %v7578_v52  ;;  %v4443_v11 = vpop.f32.mrf.mxu1 }
 0x735   :  { %v4802_v14 = vpop.f32.mrf.mxu0  ;;  %6698 = vst [vmem:[#allocation9 + $0x678] sm:$0xff] %v7556_v38 }
 0x736   :  { %v7579_v19 = vpack.c.bf16 %v4802_v14, %v4800_v35  ;;  %v4445_v5 = vpop.f32.mrf.mxu1 }
 0x737   :  { %v4806_v55 = vpop.f32.mrf.mxu0  ;;  %v7557_v50 = vpack.c.bf16 %v4445_v5, %v4443_v11 }
 0x738   :  { %6721 = vst [vmem:[#allocation9 + $0x730] sm:$0xff] %v7579_v19  ;;  %v4449_v12 = vpop.f32.mrf.mxu1 }
 0x739   :  { %v4808_v15 = vpop.f32.mrf.mxu0  ;;  %6699 = vst [vmem:[#allocation9 + $0x680] sm:$0xff] %v7557_v50 }
 0x73a   :  { %v7580_v37 = vpack.c.bf16 %v4808_v15, %v4806_v55  ;;  %v4451_v3 = vpop.f32.mrf.mxu1 }
 0x73b   :  { %v4812_v41 = vpop.f32.mrf.mxu0  ;;  %v7558_v48 = vpack.c.bf16 %v4451_v3, %v4449_v12 }
 0x73c   :  { %6722 = vst [vmem:[#allocation9 + $0x738] sm:$0xff] %v7580_v37  ;;  %v4455_v9 = vpop.f32.mrf.mxu1 }
 0x73d   :  { %v4814_v20 = vpop.f32.mrf.mxu0  ;;  %6700 = vst [vmem:[#allocation9 + $0x688] sm:$0xff] %v7558_v48 }
 0x73e   :  { %v7581_v45 = vpack.c.bf16 %v4814_v20, %v4812_v41  ;;  %v4457_v42 = vpop.f32.mrf.mxu1 }
 0x73f   :  { %v4818_v6 = vpop.f32.mrf.mxu0  ;;  %v7559_v28 = vpack.c.bf16 %v4457_v42, %v4455_v9 }
 0x740   :  { %6723 = vst [vmem:[#allocation9 + $0x740] sm:$0xff] %v7581_v45  ;;  %v4461_v59 = vpop.f32.mrf.mxu1 }
 0x741   :  { %v4820_v62 = vpop.f32.mrf.mxu0  ;;  %6701 = vst [vmem:[#allocation9 + $0x690] sm:$0xff] %v7559_v28 }
 0x742   :  { %v7582_v4 = vpack.c.bf16 %v4820_v62, %v4818_v6  ;;  %v4463_v2 = vpop.f32.mrf.mxu1 }
 0x743   :  { %v4824_v0 = vpop.f32.mrf.mxu0  ;;  %v7560_v7 = vpack.c.bf16 %v4463_v2, %v4461_v59 }
 0x744   :  { %6724 = vst [vmem:[#allocation9 + $0x748] sm:$0xff] %v7582_v4  ;;  %v4467_v22 = vpop.f32.mrf.mxu1 }
 0x745   :  { %v4826_v23 = vpop.f32.mrf.mxu0  ;;  %6702 = vst [vmem:[#allocation9 + $0x698] sm:$0xff] %v7560_v7 }
 0x746   :  { %v7583_v61 = vpack.c.bf16 %v4826_v23, %v4824_v0  ;;  %v4469_v29 = vpop.f32.mrf.mxu1 }
 0x747   :  { %v4830_v13 = vpop.f32.mrf.mxu0  ;;  %v7561_v32 = vpack.c.bf16 %v4469_v29, %v4467_v22 }
 0x748   :  { %6725 = vst [vmem:[#allocation9 + $0x750] sm:$0xff] %v7583_v61  ;;  %v4473_v46 = vpop.f32.mrf.mxu1 }
 0x749   :  { %v4832_v16 = vpop.f32.mrf.mxu0  ;;  %6703 = vst [vmem:[#allocation9 + $0x6a0] sm:$0xff] %v7561_v32 }
 0x74a   :  { %v7584_v58 = vpack.c.bf16 %v4832_v16, %v4830_v13  ;;  %v4475_v34 = vpop.f32.mrf.mxu1 }
 0x74b   :  { %v4836_v63 = vpop.f32.mrf.mxu0  ;;  %v7562_v21 = vpack.c.bf16 %v4475_v34, %v4473_v46 }
 0x74c   :  { %6726 = vst [vmem:[#allocation9 + $0x758] sm:$0xff] %v7584_v58  ;;  %v4479_v30 = vpop.f32.mrf.mxu1 }
 0x74d   :  { %v4838_v25 = vpop.f32.mrf.mxu0  ;;  %6704 = vst [vmem:[#allocation9 + $0x6a8] sm:$0xff] %v7562_v21 }
 0x74e   :  { %v7585_v39 = vpack.c.bf16 %v4838_v25, %v4836_v63  ;;  %v4481_v47 = vpop.f32.mrf.mxu1 }
 0x74f   :  { %v4842_v44 = vpop.f32.mrf.mxu0  ;;  %v7563_v53 = vpack.c.bf16 %v4481_v47, %v4479_v30 }
 0x750   :  { %6727 = vst [vmem:[#allocation9 + $0x760] sm:$0xff] %v7585_v39  ;;  %v4485_v17 = vpop.f32.mrf.mxu1 }
 0x751   :  { %v4844_v24 = vpop.f32.mrf.mxu0  ;;  %6705 = vst [vmem:[#allocation9 + $0x6b0] sm:$0xff] %v7563_v53 }
 0x752   :  { %v7586_v27 = vpack.c.bf16 %v4844_v24, %v4842_v44  ;;  %v4487_v1 = vpop.f32.mrf.mxu1 }
 0x753   :  { %v4848_v8 = vpop.f32.mrf.mxu0  ;;  %v7564_v43 = vpack.c.bf16 %v4487_v1, %v4485_v17 }
 0x754   :  { %6728 = vst [vmem:[#allocation9 + $0x768] sm:$0xff] %v7586_v27  ;;  %v4491_v54 = vpop.f32.mrf.mxu1 }
 0x755   :  { %v4850_v33 = vpop.f32.mrf.mxu0  ;;  %6706 = vst [vmem:[#allocation9 + $0x6b8] sm:$0xff] %v7564_v43 }
 0x756   :  { %v7587_v57 = vpack.c.bf16 %v4850_v33, %v4848_v8  ;;  %v4493_v26 = vpop.f32.mrf.mxu1 }
 0x757   :  { %v4854_v40 = vpop.f32.mrf.mxu0  ;;  %v7565_v51 = vpack.c.bf16 %v4493_v26, %v4491_v54 }
 0x758   :  { %6729 = vst [vmem:[#allocation9 + $0x770] sm:$0xff] %v7587_v57  ;;  %v4497_v60 = vpop.f32.mrf.mxu1 }
 0x759   :  { %v4856_v36 = vpop.f32.mrf.mxu0  ;;  %6707 = vst [vmem:[#allocation9 + $0x6c0] sm:$0xff] %v7565_v51 }
 0x75a   :  { %v7588_v31 = vpack.c.bf16 %v4856_v36, %v4854_v40  ;;  %v4499_v56 = vpop.f32.mrf.mxu1 }
 0x75b   :  { %v4860_v10 = vpop.f32.mrf.mxu0  ;;  %v7566_v18 = vpack.c.bf16 %v4499_v56, %v4497_v60 }
 0x75c   :  { %6730 = vst [vmem:[#allocation9 + $0x778] sm:$0xff] %v7588_v31  ;;  %v4503_v52 = vpop.f32.mrf.mxu1 }
 0x75d   :  { %v4862_v49 = vpop.f32.mrf.mxu0  ;;  %6708 = vst [vmem:[#allocation9 + $0x6c8] sm:$0xff] %v7566_v18 }
 0x75e   :  { %v7589_v35 = vpack.c.bf16 %v4862_v49, %v4860_v10  ;;  %v4505_v38 = vpop.f32.mrf.mxu1 }
 0x75f   :  { %v4866_v11 = vpop.f32.mrf.mxu0  ;;  %v7567_v14 = vpack.c.bf16 %v4505_v38, %v4503_v52 }
 0x760   :  { %6731 = vst [vmem:[#allocation9 + $0x780] sm:$0xff] %v7589_v35  ;;  %v4509_v19 = vpop.f32.mrf.mxu1 }
 0x761   :  { %v4868_v5 = vpop.f32.mrf.mxu0  ;;  %6709 = vst [vmem:[#allocation9 + $0x6d0] sm:$0xff] %v7567_v14 }
 0x762   :  { %v7590_v55 = vpack.c.bf16 %v4868_v5, %v4866_v11  ;;  %v4511_v50 = vpop.f32.mrf.mxu1 }
 0x763   :  { %v4872_v12 = vpop.f32.mrf.mxu0  ;;  %v7568_v15 = vpack.c.bf16 %v4511_v50, %v4509_v19 }
 0x764   :  { %6732 = vst [vmem:[#allocation9 + $0x788] sm:$0xff] %v7590_v55  ;;  %v4515_v37 = vpop.f32.mrf.mxu1 }
 0x765   :  { %v4874_v3 = vpop.f32.mrf.mxu0  ;;  %6710 = vst [vmem:[#allocation9 + $0x6d8] sm:$0xff] %v7568_v15 }
 0x766   :  { %v7591_v41 = vpack.c.bf16 %v4874_v3, %v4872_v12  ;;  %v4517_v48 = vpop.f32.mrf.mxu1 }
 0x767   :  { %v4878_v9 = vpop.f32.mrf.mxu0  ;;  %v7569_v20 = vpack.c.bf16 %v4517_v48, %v4515_v37 }
 0x768   :  { %6733 = vst [vmem:[#allocation9 + $0x790] sm:$0xff] %v7591_v41  ;;  %v4521_v45 = vpop.f32.mrf.mxu1 }
 0x769   :  { %v4880_v42 = vpop.f32.mrf.mxu0  ;;  %6711 = vst [vmem:[#allocation9 + $0x6e0] sm:$0xff] %v7569_v20 }
 0x76a   :  { %v7592_v6 = vpack.c.bf16 %v4880_v42, %v4878_v9  ;;  %v4523_v28 = vpop.f32.mrf.mxu1 }
 0x76b   :  { %v4884_v59 = vpop.f32.mrf.mxu0  ;;  %v7570_v62 = vpack.c.bf16 %v4523_v28, %v4521_v45 }
 0x76c   :  { %6734 = vst [vmem:[#allocation9 + $0x798] sm:$0xff] %v7592_v6  ;;  %v4527_v4 = vpop.f32.mrf.mxu1 }
 0x76d   :  { %v4886_v2 = vpop.f32.mrf.mxu0  ;;  %6712 = vst [vmem:[#allocation9 + $0x6e8] sm:$0xff] %v7570_v62 }
 0x76e   :  { %v7593_v0 = vpack.c.bf16 %v4886_v2, %v4884_v59  ;;  %v4529_v7 = vpop.f32.mrf.mxu1 }
 0x76f   :  { %v4890_v22 = vpop.f32.mrf.mxu0  ;;  %v7571_v23 = vpack.c.bf16 %v4529_v7, %v4527_v4 }
 0x770   :  { %6735 = vst [vmem:[#allocation9 + $0x7a0] sm:$0xff] %v7593_v0  ;;  %v4533_v61 = vpop.f32.mrf.mxu1 }
 0x771   :  { %v4892_v29 = vpop.f32.mrf.mxu0  ;;  %6713 = vst [vmem:[#allocation9 + $0x6f0] sm:$0xff] %v7571_v23 }
 0x772   :  { %v7594_v13 = vpack.c.bf16 %v4892_v29, %v4890_v22  ;;  %v4535_v32 = vpop.f32.mrf.mxu1 }
 0x773   :  { %v4896_v46 = vpop.f32.mrf.mxu0  ;;  %v7572_v16 = vpack.c.bf16 %v4535_v32, %v4533_v61 }
 0x774   :  { %6736 = vst [vmem:[#allocation9 + $0x7a8] sm:$0xff] %v7594_v13 }
 0x775   :  { %v4898_v58 = vpop.f32.mrf.mxu0  ;;  %6714 = vst [vmem:[#allocation9 + $0x6f8] sm:$0xff] %v7572_v16 }
 0x776   :  { %v7595_v34 = vpack.c.bf16 %v4898_v58, %v4896_v46 }
 0x777   :  { %v4902_v63 = vpop.f32.mrf.mxu0 }
 0x778   :  { %6737 = vst [vmem:[#allocation9 + $0x7b0] sm:$0xff] %v7595_v34 }
 0x779   :  { %v4904_v21 = vpop.f32.mrf.mxu0 }
 0x77a   :  { %v7596_v30 = vpack.c.bf16 %v4904_v21, %v4902_v63 }
 0x77b   :  { %v4908_v25 = vpop.f32.mrf.mxu0 }
 0x77c   :  { %6738 = vst [vmem:[#allocation9 + $0x7b8] sm:$0xff] %v7596_v30 }
 0x77d   :  { %v4910_v39 = vpop.f32.mrf.mxu0 }
 0x77e   :  { %v7597_v47 = vpack.c.bf16 %v4910_v39, %v4908_v25 }
 0x77f   :  { %v4914_v44 = vpop.f32.mrf.mxu0 }
 0x780   :  { %6739 = vst [vmem:[#allocation9 + $0x7c0] sm:$0xff] %v7597_v47 }
 0x781   :  { %v4916_v53 = vpop.f32.mrf.mxu0 }
 0x782   :  { %v7598_v17 = vpack.c.bf16 %v4916_v53, %v4914_v44 }
 0x783   :  { %v4920_v24 = vpop.f32.mrf.mxu0 }
 0x784   :  { %6740 = vst [vmem:[#allocation9 + $0x7c8] sm:$0xff] %v7598_v17 }
 0x785   :  { %v4922_v27 = vpop.f32.mrf.mxu0 }
 0x786   :  { %v7599_v1 = vpack.c.bf16 %v4922_v27, %v4920_v24 }
 0x787   :  { %v4926_v8 = vpop.f32.mrf.mxu0 }
 0x788   :  { %6741 = vst [vmem:[#allocation9 + $0x7d0] sm:$0xff] %v7599_v1 }
 0x789   :  { %v4928_v43 = vpop.f32.mrf.mxu0 }
 0x78a   :  { %v7600_v54 = vpack.c.bf16 %v4928_v43, %v4926_v8 }
 0x78b   :  { %v4932_v33 = vpop.f32.mrf.mxu0 }
 0x78c   :  { %6742 = vst [vmem:[#allocation9 + $0x7d8] sm:$0xff] %v7600_v54 }
 0x78d   :  { %v4934_v57 = vpop.f32.mrf.mxu0 }
 0x78e   :  { %v7601_v26 = vpack.c.bf16 %v4934_v57, %v4932_v33 }
 0x78f   :  { %v4938_v40 = vpop.f32.mrf.mxu0 }
 0x790   :  { %6743 = vst [vmem:[#allocation9 + $0x7e0] sm:$0xff] %v7601_v26 }
 0x791   :  { %v4940_v51 = vpop.f32.mrf.mxu0 }
 0x792   :  { %v7602_v60 = vpack.c.bf16 %v4940_v51, %v4938_v40 }
 0x793   :  { %v4944_v36 = vpop.f32.mrf.mxu0 }
 0x794   :  { %6744 = vst [vmem:[#allocation9 + $0x7e8] sm:$0xff] %v7602_v60 }
 0x795   :  { %v4946_v31 = vpop.f32.mrf.mxu0 }
 0x796   :  { %v7603_v56 = vpack.c.bf16 %v4946_v31, %v4944_v36 }
 0x797   :  { %v4950_v10 = vpop.f32.mrf.mxu0 }
 0x798   :  { %6745 = vst [vmem:[#allocation9 + $0x7f0] sm:$0xff] %v7603_v56 }
 0x799   :  { %v4952_v18 = vpop.f32.mrf.mxu0 }
 0x79a   :  { %v7604_v52 = vpack.c.bf16 %v4952_v18, %v4950_v10 }
 0x79c   :  { %6746 = vst [vmem:[#allocation9 + $0x7f8] sm:$0xff] %v7604_v52 }
 0x79d   :  { %7985 = shalt.err (!%p7982_p5)
}
 0x79e   :  { %6758 = dma.vmem_to_hbm [thread:$0]  %s6753_s29, 32768, %s9552_s6, [#allocation6], %s8007_s11, %s8007_s11, %s8008_s12  }
 0x79f   :  { %8000 = dma.done.wait [#allocation6], 32768  }
 0x7a0   :  { %8001 = vsyncadd [#allocation6], 4294934528 }
 0x7a1   :  { %6762 = vsyncpa [#allocation5], 1 }
 0x7a2   :  { %6763 = vsyncpa [#allocation8], 1 }
 0x7a3   :  { %6764 = vsyncpa [#allocation6], 1 }

</bundles_post_ra>
